<compile_context>
chip_gen: v7x
topology: tpu7x:2x2x1
jax: 0.10.0
libtpu: 0.0.40
codegen_flags: <defaults>
</compile_context>

<pallas_src>
import math
import functools

import jax
import jax.numpy as jnp
from jax.experimental import pallas as pl
from jax.experimental.pallas import tpu as pltpu

F32_EPS = float(jnp.finfo(jnp.float32).eps)   # torch F.rms_norm default eps for f32
_NEG_INF = -1e30                              # finite mask value (avoids inf-inf NaNs)
_VMEM_LIMIT = 32 * 1024 * 1024                # safe on v5e / v6e / v7x


# ----------------------------- tiling helpers -------------------------------

def _tile(dim, target, align):
    """Largest multiple of `align` that divides `dim` and is <= target, else full dim."""
    if dim <= target:
        return dim
    t = (target // align) * align
    while t >= align:
        if dim % t == 0:
            return t
        t -= align
    return dim


# ----------------------------- Pallas kernels -------------------------------

def _rms_matmul_kernel(x_ref, w_ref, o_ref, *, relu_sq):
    """o = rmsnorm(x) @ w  (full K per block; rms stats in f32, MXU in bf16)."""
    x = x_ref[...].astype(jnp.float32)
    xn = x * jax.lax.rsqrt(jnp.mean(x * x, axis=-1, keepdims=True) + F32_EPS)
    acc = jnp.dot(xn.astype(jnp.bfloat16), w_ref[...],
                  preferred_element_type=jnp.float32)
    if relu_sq:                                   # fused MLP activation: relu(.)**2
        acc = jnp.maximum(acc, 0.0)
        acc = acc * acc
    o_ref[...] = acc.astype(o_ref.dtype)


def _matmul_residual_kernel(x_ref, w_ref, r_ref, o_ref, acc_ref):
    """o = residual + x @ w, K-tiled with f32 accumulator scratch."""
    k = pl.program_id(2)

    @pl.when(k == 0)
    def _():
        acc_ref[...] = jnp.zeros_like(acc_ref)

    acc_ref[...] += jnp.dot(x_ref[...], w_ref[...],
                            preferred_element_type=jnp.float32)

    @pl.when(k == pl.num_programs(2) - 1)
    def _():
        o_ref[...] = (acc_ref[...] + r_ref[...].astype(jnp.float32)).astype(o_ref.dtype)


def _rmsnorm_rope_f32(x, cos, sin):
    """rms_norm over head_dim then rotary, all in f32. x: (t, hd); cos/sin: (t, hd//2)."""
    x = x * jax.lax.rsqrt(jnp.mean(x * x, axis=-1, keepdims=True) + F32_EPS)
    d = x.shape[-1] // 2
    x1 = x[:, :d]
    x2 = x[:, d:]
    return jnp.concatenate([x1 * cos + x2 * sin, x2 * cos - x1 * sin], axis=-1)


def _flash_attn_kernel(q_ref, k_ref, v_ref, cq_ref, sq_ref, ck_ref, sk_ref,
                       o_ref, m_sc, l_sc, acc_sc, *, n_head):
    """Flash-style causal attention for one (batch, q-tile, kv-tile) grid step.

    All heads are processed per step (static Python head loop -> lane-dense C-wide
    output tile). q/k rmsnorm + rotary + scaling fused; online softmax in f32.
    """
    tq, C = q_ref.shape
    tk = k_ref.shape[0]
    hd = C // n_head
    scale = 1.0 / math.sqrt(hd)
    qi = pl.program_id(1)
    ki = pl.program_id(2)

    @pl.when(ki == 0)
    def _init():
        m_sc[...] = jnp.full_like(m_sc, -jnp.inf)
        l_sc[...] = jnp.zeros_like(l_sc)
        acc_sc[...] = jnp.zeros_like(acc_sc)

    # Skip KV tiles that are entirely above the causal diagonal.
    @pl.when(ki * tk <= qi * tq + (tq - 1))
    def _compute():
        cos_q = cq_ref[...].astype(jnp.float32)
        sin_q = sq_ref[...].astype(jnp.float32)
        cos_k = ck_ref[...].astype(jnp.float32)
        sin_k = sk_ref[...].astype(jnp.float32)
        row = qi * tq + jax.lax.broadcasted_iota(jnp.int32, (tq, tk), 0)
        col = ki * tk + jax.lax.broadcasted_iota(jnp.int32, (tq, tk), 1)
        causal = col <= row

        q_all = q_ref[...]
        k_all = k_ref[...]
        v_all = v_ref[...]
        for h in range(n_head):
            sl = slice(h * hd, (h + 1) * hd)
            q = _rmsnorm_rope_f32(q_all[:, sl].astype(jnp.float32), cos_q, sin_q) * scale
            k = _rmsnorm_rope_f32(k_all[:, sl].astype(jnp.float32), cos_k, sin_k)
            s = jax.lax.dot_general(
                q.astype(jnp.bfloat16), k.astype(jnp.bfloat16),
                dimension_numbers=(((1,), (1,)), ((), ())),
                preferred_element_type=jnp.float32)              # (tq, tk)
            s = jnp.where(causal, s, _NEG_INF)

            m_prev = m_sc[h]
            m_new = jnp.maximum(m_prev, jnp.max(s, axis=-1, keepdims=True))
            alpha = jnp.exp(m_prev - m_new)
            p = jnp.exp(s - m_new)
            l_sc[h] = alpha * l_sc[h] + jnp.sum(p, axis=-1, keepdims=True)
            acc_sc[h] = alpha * acc_sc[h] + jnp.dot(
                p.astype(jnp.bfloat16), v_all[:, sl],
                preferred_element_type=jnp.float32)
            m_sc[h] = m_new

    @pl.when(ki == pl.num_programs(2) - 1)
    def _finalize():
        for h in range(n_head):
            inv_l = pl.reciprocal(l_sc[h], approx=True)          # EUP, ~free
            o_ref[:, h * hd:(h + 1) * hd] = (acc_sc[h] * inv_l).astype(o_ref.dtype)


# ----------------------------- Pallas wrappers -------------------------------

def _rms_matmul(x2d, w, out_dtype, *, relu_sq=False, tm_target=512, tn_target=512):
    """rmsnorm(x) @ w with w pre-transposed [K, N]. Full K per block (K == n_embd)."""
    M, K = x2d.shape
    K2, N = w.shape
    assert K == K2
    tm = _tile(M, tm_target, 8)
    tn = _tile(N, tn_target, 128)
    return pl.pallas_call(
        functools.partial(_rms_matmul_kernel, relu_sq=relu_sq),
        out_shape=jax.ShapeDtypeStruct((M, N), out_dtype),
        grid=(M // tm, N // tn),
        in_specs=[pl.BlockSpec((tm, K), lambda i, j: (i, 0)),
                  pl.BlockSpec((K, tn), lambda i, j: (0, j))],
        out_specs=pl.BlockSpec((tm, tn), lambda i, j: (i, j)),
        compiler_params=pltpu.CompilerParams(
            dimension_semantics=("parallel", "parallel"),
            vmem_limit_bytes=_VMEM_LIMIT),
    )(x2d, w)


def _matmul_residual(x2d, w, resid, *, tm_target=512, tn_target=512, tk_target=512):
    """resid + x @ w with w pre-transposed [K, N]; K-tiled, f32 accumulator."""
    M, K = x2d.shape
    _, N = w.shape
    tm = _tile(M, tm_target, 8)
    tn = _tile(N, tn_target, 128)
    tk = _tile(K, tk_target, 128)
    return pl.pallas_call(
        _matmul_residual_kernel,
        out_shape=jax.ShapeDtypeStruct((M, N), jnp.bfloat16),
        grid=(M // tm, N // tn, K // tk),
        in_specs=[pl.BlockSpec((tm, tk), lambda i, j, k: (i, k)),
                  pl.BlockSpec((tk, tn), lambda i, j, k: (k, j)),
                  pl.BlockSpec((tm, tn), lambda i, j, k: (i, j))],
        out_specs=pl.BlockSpec((tm, tn), lambda i, j, k: (i, j)),
        scratch_shapes=[pltpu.VMEM((tm, tn), jnp.float32)],
        compiler_params=pltpu.CompilerParams(
            dimension_semantics=("parallel", "parallel", "arbitrary"),
            vmem_limit_bytes=_VMEM_LIMIT),
    )(x2d, w, resid)


def flash_attention(qkv, cos, sin, n_head):
    """qkv: (B, T, 3C) bf16 fused projection output -> (B, T, C) bf16."""
    B, T, C3 = qkv.shape
    C = C3 // 3
    hd = C // n_head
    hd2 = hd // 2
    tq = _tile(T, 128, 8)
    tk = _tile(T, 128, 8)

    if C % 128 == 0:
        # Slice the q/k/v thirds straight out of the fused QKV tensor via block indices
        # along the last axis -> no q/k/v split or transpose ever materialized in HBM.
        q_in = k_in = v_in = qkv
        q_spec = pl.BlockSpec((None, tq, C), lambda b, qi, ki: (b, qi, 0))
        k_spec = pl.BlockSpec((None, tk, C), lambda b, qi, ki: (b, ki, 1))
        v_spec = pl.BlockSpec((None, tk, C), lambda b, qi, ki: (b, ki, 2))
    else:
        # Fallback for lane-unaligned C: split outside (full-dim blocks are always legal).
        q_in, k_in, v_in = qkv[..., :C], qkv[..., C:2 * C], qkv[..., 2 * C:]
        q_spec = pl.BlockSpec((None, tq, C), lambda b, qi, ki: (b, qi, 0))
        k_spec = pl.BlockSpec((None, tk, C), lambda b, qi, ki: (b, ki, 0))
        v_spec = pl.BlockSpec((None, tk, C), lambda b, qi, ki: (b, ki, 0))

    cq_spec = pl.BlockSpec((tq, hd2), lambda b, qi, ki: (qi, 0))
    sq_spec = pl.BlockSpec((tq, hd2), lambda b, qi, ki: (qi, 0))
    ck_spec = pl.BlockSpec((tk, hd2), lambda b, qi, ki: (ki, 0))
    sk_spec = pl.BlockSpec((tk, hd2), lambda b, qi, ki: (ki, 0))

    return pl.pallas_call(
        functools.partial(_flash_attn_kernel, n_head=n_head),
        out_shape=jax.ShapeDtypeStruct((B, T, C), jnp.bfloat16),
        grid=(B, T // tq, T // tk),
        in_specs=[q_spec, k_spec, v_spec, cq_spec, sq_spec, ck_spec, sk_spec],
        out_specs=pl.BlockSpec((None, tq, C), lambda b, qi, ki: (b, qi, 0)),
        scratch_shapes=[
            pltpu.VMEM((n_head, tq, 1), jnp.float32),    # running row max
            pltpu.VMEM((n_head, tq, 1), jnp.float32),    # running row sum
            pltpu.VMEM((n_head, tq, hd), jnp.float32),   # un-normalized output acc
        ],
        compiler_params=pltpu.CompilerParams(
            dimension_semantics=("parallel", "parallel", "arbitrary"),
            vmem_limit_bytes=_VMEM_LIMIT),
    )(q_in, k_in, v_in, cos, sin, cos, sin)


# ----------------------------- model glue (JAX) ------------------------------

def rotary_cos_sin(T, head_dim, base=10000.0):
    inv_freq = 1.0 / (base ** (jnp.arange(0, head_dim, 2, dtype=jnp.float32) / head_dim))
    t = jnp.arange(T, dtype=jnp.float32)
    freqs = jnp.outer(t, inv_freq)                     # (T, head_dim // 2)
    # matches the torch Rotary cache (.bfloat16())
    return jnp.cos(freqs).astype(jnp.bfloat16), jnp.sin(freqs).astype(jnp.bfloat16)


def apply_rotary_emb(x, cos, sin):
    d = x.shape[-1] // 2
    x1 = x[..., :d]
    x2 = x[..., d:]
    y1 = x1 * cos + x2 * sin
    y2 = x1 * (-sin) + x2 * cos
    return jnp.concatenate([y1, y2], axis=-1)


def block_forward(x, p, cos, sin, B, T, n_head):
    """One transformer Block on the flattened (B*T, C) bf16 residual stream."""
    M, C = x.shape
    qkv = _rms_matmul(x, p['w_qkv'], jnp.bfloat16)                      # rmsnorm + QKV
    y = flash_attention(qkv.reshape(B, T, 3 * C), cos, sin, n_head)     # (B, T, C)
    x = _matmul_residual(y.reshape(M, C), p['w_o'], x)                  # x + y @ w_o
    h = _rms_matmul(x, p['w_fc'], jnp.bfloat16, relu_sq=True)           # relu(rms(x)@w_fc)^2
    x = _matmul_residual(h, p['w_proj'], x)                             # x + h @ w_proj
    return x


def gpt_forward(idx, params, cfg):
    B, T = idx.shape
    C = cfg['n_embd']
    H = cfg['n_head']
    cos, sin = rotary_cos_sin(T, C // H)
    # TODO(synk): embedding gather left to XLA (jnp.take); a Pallas DMA-gather kernel
    # with scalar-prefetched token ids would be the next step.
    x = jnp.take(params['wte'], idx, axis=0).reshape(B * T, C)          # bf16
    x = block_forward(x, params['mixin_block'], cos, sin, B, T, H)      # DigitMixinNoMixin
    for p in params['blocks']:                                          # transformer.h
        x = block_forward(x, p, cos, sin, B, T, H)
    # out_layer = Identity (n_layer_output == 0); final rmsnorm fused into tied lm_head.
    logits = _rms_matmul(x, params['lm_head_t'], jnp.float32)
    return logits.reshape(B, T, -1)


# ----------------------------- pure-JAX reference ----------------------------

def ref_forward(idx, params, cfg):
    """Pure-JAX reference mirroring the kernel's bf16-compute / f32-stats recipe."""
    B, T = idx.shape
    C, H = cfg['n_embd'], cfg['n_head']
    hd = C // H
    cos, sin = rotary_cos_sin(T, hd)
    cos4 = cos.astype(jnp.float32)[None, :, None, :]
    sin4 = sin.astype(jnp.float32)[None, :, None, :]
    scale = 1.0 / math.sqrt(hd)

    def rms(x):
        return x * jax.lax.rsqrt(jnp.mean(x * x, axis=-1, keepdims=True) + F32_EPS)

    def rms_mm(x, wmat):
        xn = rms(x.astype(jnp.float32)).astype(jnp.bfloat16)
        return jnp.dot(xn, wmat, preferred_element_type=jnp.float32)

    def attn(x, p):
        qkv = rms_mm(x, p['w_qkv']).astype(jnp.bfloat16)
        q = qkv[:, :C].reshape(B, T, H, hd).astype(jnp.float32)
        k = qkv[:, C:2 * C].reshape(B, T, H, hd).astype(jnp.float32)
        v = qkv[:, 2 * C:].reshape(B, T, H, hd)
        q = apply_rotary_emb(rms(q), cos4, sin4) * scale
        k = apply_rotary_emb(rms(k), cos4, sin4)
        s = jnp.einsum('bqhd,bkhd->bhqk', q.astype(jnp.bfloat16), k.astype(jnp.bfloat16),
                       preferred_element_type=jnp.float32)
        mask = jnp.tril(jnp.ones((T, T), dtype=bool))
        s = jnp.where(mask, s, _NEG_INF)
        pr = jax.nn.softmax(s, axis=-1).astype(jnp.bfloat16)
        y = jnp.einsum('bhqk,bkhd->bqhd', pr, v, preferred_element_type=jnp.float32)
        y = y.reshape(B * T, C).astype(jnp.bfloat16)
        return jnp.dot(y, p['w_o'], preferred_element_type=jnp.float32)

    def mlp(x, p):
        h = rms_mm(x, p['w_fc'])
        h = jnp.maximum(h, 0.0)
        h = (h * h).astype(jnp.bfloat16)
        return jnp.dot(h, p['w_proj'], preferred_element_type=jnp.float32)

    def blk(x, p):
        x = (x.astype(jnp.float32) + attn(x, p)).astype(jnp.bfloat16)
        x = (x.astype(jnp.float32) + mlp(x, p)).astype(jnp.bfloat16)
        return x

    x = jnp.take(params['wte'], idx, axis=0).reshape(B * T, C)
    x = blk(x, params['mixin_block'])
    for p in params['blocks']:
        x = blk(x, p)
    logits = rms_mm(x, params['lm_head_t'])
    return logits.reshape(B, T, -1)


# ----------------------------- params / main ---------------------------------

def init_params(key, cfg):
    C, V = cfg['n_embd'], cfg['vocab_size']
    n_blocks = cfg['n_layer'] + 1
    keys = iter(jax.random.split(key, 6 * n_blocks + 2))

    def w(shape, std=0.02):
        # Weights stored pre-transposed [in, out] (torch Linear is [out, in]) so no
        # transpose is ever issued under jit; bf16 for MXU / halved HBM traffic.
        return (std * jax.random.normal(next(keys), shape, jnp.float32)).astype(jnp.bfloat16)

    def block_params():
        return {
            'w_qkv': jnp.concatenate([w((C, C)), w((C, C)), w((C, C))], axis=1),  # [C, 3C]
            'w_o': w((C, C)),
            'w_fc': w((C, 4 * C)),
            'w_proj': w((4 * C, C)),
        }

    wte = w((V, C))
    return {
        'wte': wte,
        'lm_head_t': wte.T,          # tied lm_head, transposed ONCE at init
        'mixin_block': block_params(),
        'blocks': [block_params() for _ in range(cfg['n_layer'])],
    }


if __name__ == "__main__":
    # small, lane-aligned test config: C=256, H=2 -> head_dim=128
    cfg = dict(vocab_size=256, n_layer=2, n_head=2, n_embd=256, T=16)
    key = jax.random.PRNGKey(0)
    pkey, ikey = jax.random.split(key)
    params = init_params(pkey, cfg)

    B, T = 2, cfg['T']
    idx = jax.random.randint(ikey, (B, T), 0, cfg['vocab_size'], dtype=jnp.int32)

    fwd = jax.jit(functools.partial(gpt_forward, cfg=cfg))
    logits = fwd(idx, params)
    jax.block_until_ready(logits)

    ref = ref_forward(idx, params, cfg)
    assert logits.shape == (B, T, cfg['vocab_size'])
    err = float(jnp.max(jnp.abs(logits - ref)))
    assert jnp.allclose(logits, ref, rtol=2e-2, atol=2e-2), f"max abs err {err}"

    print("KERNEL_OK")
</pallas_src>

<mosaic_0001>
module attributes {stable_mosaic.version = 11 : i64} {
  func.func @_rms_matmul_kernel(%arg0: i32, %arg1: i32, %arg2: memref<32x256xbf16, #tpu.memory_space<vmem>>, %arg3: memref<256x384xbf16, #tpu.memory_space<vmem>>, %arg4: memref<32x384xbf16, #tpu.memory_space<vmem>>) attributes {dimension_semantics = [#tpu.dimension_semantics<parallel>, #tpu.dimension_semantics<parallel>], iteration_bounds = array<i64: 1, 2>, scalar_prefetch = 0 : i64, scratch_operands = 0 : i64, tpu.core_type = #tpu.core_type<tc>, window_params = [{transform_indices = @transform_0, window_bounds = array<i64: 32, 256>}, {transform_indices = @transform_1, window_bounds = array<i64: 256, 384>}, {transform_indices = @transform_2, window_bounds = array<i64: 32, 384>}]} {
    %c0 = arith.constant 0 : index
    %c0_0 = arith.constant 0 : index
    %0 = vector.load %arg2[%c0, %c0_0] : memref<32x256xbf16, #tpu.memory_space<vmem>>, vector<32x256xbf16>
    %1 = arith.extf %0 : vector<32x256xbf16> to vector<32x256xf32>
    %2 = arith.mulf %1, %1 : vector<32x256xf32>
    %cst = arith.constant dense<0.000000e+00> : vector<32xf32>
    %3 = vector.multi_reduction <add>, %2, %cst [1] : vector<32x256xf32> to vector<32xf32>
    %4 = vector.shape_cast %3 : vector<32xf32> to vector<32x1xf32>
    %cst_1 = arith.constant 2.560000e+02 : f32
    %5 = vector.broadcast %cst_1 : f32 to vector<32x1xf32>
    %6 = arith.divf %4, %5 : vector<32x1xf32>
    %cst_2 = arith.constant 1.1920929E-7 : f32
    %7 = vector.broadcast %cst_2 : f32 to vector<32x1xf32>
    %8 = arith.addf %6, %7 : vector<32x1xf32>
    %9 = math.rsqrt %8 : vector<32x1xf32>
    %10 = vector.broadcast %9 : vector<32x1xf32> to vector<32x256xf32>
    %11 = arith.mulf %1, %10 : vector<32x256xf32>
    %12 = arith.truncf %11 : vector<32x256xf32> to vector<32x256xbf16>
    %c0_3 = arith.constant 0 : index
    %c0_4 = arith.constant 0 : index
    %13 = vector.load %arg3[%c0_3, %c0_4] : memref<256x384xbf16, #tpu.memory_space<vmem>>, vector<256x384xbf16>
    %cst_5 = arith.constant dense<0.000000e+00> : vector<32x384xf32>
    %14 = tpu.matmul %12, %13, %cst_5 {dimension_numbers = #tpu.dot_dimension_numbers<[1], [0], [0], [1], [0, 0, 1, 1], [], []>} : vector<32x256xbf16>, vector<256x384xbf16>, vector<32x384xf32> -> vector<32x384xf32>
    %15 = arith.truncf %14 : vector<32x384xf32> to vector<32x384xbf16>
    %c0_6 = arith.constant 0 : index
    %c0_7 = arith.constant 0 : index
    %16 = vector.load %arg4[%c0_6, %c0_7] : memref<32x384xbf16, #tpu.memory_space<vmem>>, vector<32x384xbf16>
    tpu.vector_store %arg4[%c0_6, %c0_7], %15 {strides = array<i32>} : memref<32x384xbf16, #tpu.memory_space<vmem>>, vector<32x384xbf16>,
    return
  }
  func.func @transform_0(%arg0: i32, %arg1: i32) -> (i32, i32) {
    %c0_i32 = arith.constant 0 : i32
    %c0_i32_0 = arith.constant 0 : i32
    return %arg0, %c0_i32 : i32, i32
  }
  func.func @transform_1(%arg0: i32, %arg1: i32) -> (i32, i32) {
    %c0_i32 = arith.constant 0 : i32
    %c0_i32_0 = arith.constant 0 : i32
    return %c0_i32, %arg1 : i32, i32
  }
  func.func @transform_2(%arg0: i32, %arg1: i32) -> (i32, i32) {
    %c0_i32 = arith.constant 0 : i32
    return %arg0, %arg1 : i32, i32
  }
}

module attributes {stable_mosaic.version = 11 : i64} {
  func.func @_flash_attn_kernel(%arg0: i32, %arg1: i32, %arg2: i32, %arg3: memref<1x16x256xbf16, #tpu.memory_space<vmem>>, %arg4: memref<1x16x256xbf16, #tpu.memory_space<vmem>>, %arg5: memref<1x16x256xbf16, #tpu.memory_space<vmem>>, %arg6: memref<16x64xbf16, #tpu.memory_space<vmem>>, %arg7: memref<16x64xbf16, #tpu.memory_space<vmem>>, %arg8: memref<16x64xbf16, #tpu.memory_space<vmem>>, %arg9: memref<16x64xbf16, #tpu.memory_space<vmem>>, %arg10: memref<1x16x256xbf16, #tpu.memory_space<vmem>>, %arg11: memref<2x16x1xf32, #tpu.memory_space<vmem>>, %arg12: memref<2x16x1xf32, #tpu.memory_space<vmem>>, %arg13: memref<2x16x128xf32, #tpu.memory_space<vmem>>) attributes {dimension_semantics = [#tpu.dimension_semantics<parallel>, #tpu.dimension_semantics<parallel>, #tpu.dimension_semantics<arbitrary>], iteration_bounds = array<i64: 2, 1, 1>, scalar_prefetch = 0 : i64, scratch_operands = 3 : i64, tpu.core_type = #tpu.core_type<tc>, window_params = [{transform_indices = @transform_0, window_bounds = array<i64: 1, 16, 256>}, {transform_indices = @transform_1, window_bounds = array<i64: 1, 16, 256>}, {transform_indices = @transform_2, window_bounds = array<i64: 1, 16, 256>}, {transform_indices = @transform_3, window_bounds = array<i64: 16, 64>}, {transform_indices = @transform_4, window_bounds = array<i64: 16, 64>}, {transform_indices = @transform_5, window_bounds = array<i64: 16, 64>}, {transform_indices = @transform_6, window_bounds = array<i64: 16, 64>}, {transform_indices = @transform_7, window_bounds = array<i64: 1, 16, 256>}]} {
    %c0_i32 = arith.constant 0 : i32
    %0 = arith.cmpi eq, %arg2, %c0_i32 : i32
    %1 = arith.extui %0 : i1 to i32
    %c0_i32_0 = arith.constant 0 : i32
    %2 = arith.cmpi ne, %1, %c0_i32_0 : i32
    scf.if %2 {
      %cst = arith.constant 0xFF800000 : f32
      %12 = vector.broadcast %cst : f32 to vector<2x16x1xf32>
      %c0 = arith.constant 0 : index
      %c0_5 = arith.constant 0 : index
      %c0_6 = arith.constant 0 : index
      %13 = vector.load %arg11[%c0, %c0_5, %c0_6] : memref<2x16x1xf32, #tpu.memory_space<vmem>>, vector<2x16x1xf32>
      tpu.vector_store %arg11[%c0, %c0_5, %c0_6], %12 {strides = array<i32>} : memref<2x16x1xf32, #tpu.memory_space<vmem>>, vector<2x16x1xf32>,
      %cst_7 = arith.constant 0.000000e+00 : f32
      %14 = vector.broadcast %cst_7 : f32 to vector<2x16x1xf32>
      %c0_8 = arith.constant 0 : index
      %c0_9 = arith.constant 0 : index
      %c0_10 = arith.constant 0 : index
      %15 = vector.load %arg12[%c0_8, %c0_9, %c0_10] : memref<2x16x1xf32, #tpu.memory_space<vmem>>, vector<2x16x1xf32>
      tpu.vector_store %arg12[%c0_8, %c0_9, %c0_10], %14 {strides = array<i32>} : memref<2x16x1xf32, #tpu.memory_space<vmem>>, vector<2x16x1xf32>,
      %cst_11 = arith.constant 0.000000e+00 : f32
      %16 = vector.broadcast %cst_11 : f32 to vector<2x16x128xf32>
      %c0_12 = arith.constant 0 : index
      %c0_13 = arith.constant 0 : index
      %c0_14 = arith.constant 0 : index
      %17 = vector.load %arg13[%c0_12, %c0_13, %c0_14] : memref<2x16x128xf32, #tpu.memory_space<vmem>>, vector<2x16x128xf32>
      tpu.vector_store %arg13[%c0_12, %c0_13, %c0_14], %16 {strides = array<i32>} : memref<2x16x128xf32, #tpu.memory_space<vmem>>, vector<2x16x128xf32>,
    } else {
    }
    %c16_i32 = arith.constant 16 : i32
    %3 = arith.muli %arg2, %c16_i32 : i32
    %c16_i32_1 = arith.constant 16 : i32
    %4 = arith.muli %arg1, %c16_i32_1 : i32
    %c15_i32 = arith.constant 15 : i32
    %5 = arith.addi %4, %c15_i32 : i32
    %6 = arith.cmpi sle, %3, %5 : i32
    %7 = arith.extui %6 : i1 to i32
    %c0_i32_2 = arith.constant 0 : i32
    %8 = arith.cmpi ne, %7, %c0_i32_2 : i32
    scf.if %8 {
      %c0 = arith.constant 0 : index
      %c0_5 = arith.constant 0 : index
      %12 = vector.load %arg6[%c0, %c0_5] : memref<16x64xbf16, #tpu.memory_space<vmem>>, vector<16x64xbf16>
      %13 = arith.extf %12 : vector<16x64xbf16> to vector<16x64xf32>
      %c0_6 = arith.constant 0 : index
      %c0_7 = arith.constant 0 : index
      %14 = vector.load %arg7[%c0_6, %c0_7] : memref<16x64xbf16, #tpu.memory_space<vmem>>, vector<16x64xbf16>
      %15 = arith.extf %14 : vector<16x64xbf16> to vector<16x64xf32>
      %c0_8 = arith.constant 0 : index
      %c0_9 = arith.constant 0 : index
      %16 = vector.load %arg8[%c0_8, %c0_9] : memref<16x64xbf16, #tpu.memory_space<vmem>>, vector<16x64xbf16>
      %17 = arith.extf %16 : vector<16x64xbf16> to vector<16x64xf32>
      %c0_10 = arith.constant 0 : index
      %c0_11 = arith.constant 0 : index
      %18 = vector.load %arg9[%c0_10, %c0_11] : memref<16x64xbf16, #tpu.memory_space<vmem>>, vector<16x64xbf16>
      %19 = arith.extf %18 : vector<16x64xbf16> to vector<16x64xf32>
      %c16_i32_12 = arith.constant 16 : i32
      %20 = arith.muli %arg1, %c16_i32_12 : i32
      %21 = tpu.iota {dimensions = array<i32: 0>} : vector<16x16xi32>
      %22 = vector.broadcast %20 : i32 to vector<16x16xi32>
      %23 = arith.addi %22, %21 : vector<16x16xi32>
      %c16_i32_13 = arith.constant 16 : i32
      %24 = arith.muli %arg2, %c16_i32_13 : i32
      %25 = tpu.iota {dimensions = array<i32: 1>} : vector<16x16xi32>
      %26 = vector.broadcast %24 : i32 to vector<16x16xi32>
      %27 = arith.addi %26, %25 : vector<16x16xi32>
      %28 = arith.cmpi sle, %27, %23 : vector<16x16xi32>
      %c0_14 = arith.constant 0 : index
      %c0_15 = arith.constant 0 : index
      %c0_16 = arith.constant 0 : index
      %29 = vector.load %arg3[%c0_14, %c0_15, %c0_16] : memref<1x16x256xbf16, #tpu.memory_space<vmem>>, vector<1x16x256xbf16>
      %30 = vector.shape_cast %29 : vector<1x16x256xbf16> to vector<16x256xbf16>
      %c0_17 = arith.constant 0 : index
      %c0_18 = arith.constant 0 : index
      %c0_19 = arith.constant 0 : index
      %31 = vector.load %arg4[%c0_17, %c0_18, %c0_19] : memref<1x16x256xbf16, #tpu.memory_space<vmem>>, vector<1x16x256xbf16>
      %32 = vector.shape_cast %31 : vector<1x16x256xbf16> to vector<16x256xbf16>
      %c0_20 = arith.constant 0 : index
      %c0_21 = arith.constant 0 : index
      %c0_22 = arith.constant 0 : index
      %33 = vector.load %arg5[%c0_20, %c0_21, %c0_22] : memref<1x16x256xbf16, #tpu.memory_space<vmem>>, vector<1x16x256xbf16>
      %34 = vector.shape_cast %33 : vector<1x16x256xbf16> to vector<16x256xbf16>
      %35 = vector.extract_strided_slice %30 {offsets = [0, 0], sizes = [16, 128], strides = [1, 1]} : vector<16x256xbf16> to vector<16x128xbf16>
      %36 = arith.extf %35 : vector<16x128xbf16> to vector<16x128xf32>
      %37 = arith.mulf %36, %36 : vector<16x128xf32>
      %cst = arith.constant dense<0.000000e+00> : vector<16xf32>
      %38 = vector.multi_reduction <add>, %37, %cst [1] : vector<16x128xf32> to vector<16xf32>
      %39 = vector.shape_cast %38 : vector<16xf32> to vector<16x1xf32>
      %cst_23 = arith.constant 1.280000e+02 : f32
      %40 = vector.broadcast %cst_23 : f32 to vector<16x1xf32>
      %41 = arith.divf %39, %40 : vector<16x1xf32>
      %cst_24 = arith.constant 1.1920929E-7 : f32
      %42 = vector.broadcast %cst_24 : f32 to vector<16x1xf32>
      %43 = arith.addf %41, %42 : vector<16x1xf32>
      %44 = math.rsqrt %43 : vector<16x1xf32>
      %45 = vector.broadcast %44 : vector<16x1xf32> to vector<16x128xf32>
      %46 = arith.mulf %36, %45 : vector<16x128xf32>
      %47 = vector.extract_strided_slice %46 {offsets = [0, 0], sizes = [16, 64], strides = [1, 1]} : vector<16x128xf32> to vector<16x64xf32>
      %48 = vector.extract_strided_slice %46 {offsets = [0, 64], sizes = [16, 64], strides = [1, 1]} : vector<16x128xf32> to vector<16x64xf32>
      %49 = arith.mulf %47, %13 : vector<16x64xf32>
      %50 = arith.mulf %48, %15 : vector<16x64xf32>
      %51 = arith.addf %49, %50 : vector<16x64xf32>
      %52 = arith.mulf %48, %13 : vector<16x64xf32>
      %53 = arith.mulf %47, %15 : vector<16x64xf32>
      %54 = arith.subf %52, %53 : vector<16x64xf32>
      %55 = tpu.concatenate %51, %54 in 1 : vector<16x64xf32>, vector<16x64xf32> -> vector<16x128xf32>
      %cst_25 = arith.constant 0.0883883461 : f32
      %56 = vector.broadcast %cst_25 : f32 to vector<16x128xf32>
      %57 = arith.mulf %55, %56 : vector<16x128xf32>
      %58 = vector.extract_strided_slice %32 {offsets = [0, 0], sizes = [16, 128], strides = [1, 1]} : vector<16x256xbf16> to vector<16x128xbf16>
      %59 = arith.extf %58 : vector<16x128xbf16> to vector<16x128xf32>
      %60 = arith.mulf %59, %59 : vector<16x128xf32>
      %cst_26 = arith.constant dense<0.000000e+00> : vector<16xf32>
      %61 = vector.multi_reduction <add>, %60, %cst_26 [1] : vector<16x128xf32> to vector<16xf32>
      %62 = vector.shape_cast %61 : vector<16xf32> to vector<16x1xf32>
      %cst_27 = arith.constant 1.280000e+02 : f32
      %63 = vector.broadcast %cst_27 : f32 to vector<16x1xf32>
      %64 = arith.divf %62, %63 : vector<16x1xf32>
      %cst_28 = arith.constant 1.1920929E-7 : f32
      %65 = vector.broadcast %cst_28 : f32 to vector<16x1xf32>
      %66 = arith.addf %64, %65 : vector<16x1xf32>
      %67 = math.rsqrt %66 : vector<16x1xf32>
      %68 = vector.broadcast %67 : vector<16x1xf32> to vector<16x128xf32>
      %69 = arith.mulf %59, %68 : vector<16x128xf32>
      %70 = vector.extract_strided_slice %69 {offsets = [0, 0], sizes = [16, 64], strides = [1, 1]} : vector<16x128xf32> to vector<16x64xf32>
      %71 = vector.extract_strided_slice %69 {offsets = [0, 64], sizes = [16, 64], strides = [1, 1]} : vector<16x128xf32> to vector<16x64xf32>
      %72 = arith.mulf %70, %17 : vector<16x64xf32>
      %73 = arith.mulf %71, %19 : vector<16x64xf32>
      %74 = arith.addf %72, %73 : vector<16x64xf32>
      %75 = arith.mulf %71, %17 : vector<16x64xf32>
      %76 = arith.mulf %70, %19 : vector<16x64xf32>
      %77 = arith.subf %75, %76 : vector<16x64xf32>
      %78 = tpu.concatenate %74, %77 in 1 : vector<16x64xf32>, vector<16x64xf32> -> vector<16x128xf32>
      %79 = arith.truncf %57 : vector<16x128xf32> to vector<16x128xbf16>
      %80 = arith.truncf %78 : vector<16x128xf32> to vector<16x128xbf16>
      %cst_29 = arith.constant dense<0.000000e+00> : vector<16x16xf32>
      %81 = tpu.matmul %79, %80, %cst_29 {dimension_numbers = #tpu.dot_dimension_numbers<[1], [1], [0], [0], [0, 0, 1, 0], [], []>} : vector<16x128xbf16>, vector<16x128xbf16>, vector<16x16xf32> -> vector<16x16xf32>
      %cst_30 = arith.constant -1.000000e+30 : f32
      %82 = vector.broadcast %cst_30 : f32 to vector<16x16xf32>
      %83 = arith.select %28, %81, %82 : vector<16x16xi1>, vector<16x16xf32>
      %c0_31 = arith.constant 0 : index
      %c0_32 = arith.constant 0 : index
      %c0_33 = arith.constant 0 : index
      %84 = vector.load %arg11[%c0_31, %c0_32, %c0_33] : memref<2x16x1xf32, #tpu.memory_space<vmem>>, vector<1x16x1xf32>
      %85 = vector.shape_cast %84 : vector<1x16x1xf32> to vector<16x1xf32>
      %cst_34 = arith.constant dense<0xFF800000> : vector<16xf32>
      %86 = vector.multi_reduction <maximumf>, %83, %cst_34 [1] : vector<16x16xf32> to vector<16xf32>
      %87 = vector.shape_cast %86 : vector<16xf32> to vector<16x1xf32>
      %88 = arith.maximumf %85, %87 : vector<16x1xf32>
      %89 = arith.subf %85, %88 : vector<16x1xf32>
      %90 = math.exp %89 : vector<16x1xf32>
      %91 = vector.broadcast %88 : vector<16x1xf32> to vector<16x16xf32>
      %92 = arith.subf %83, %91 : vector<16x16xf32>
      %93 = math.exp %92 : vector<16x16xf32>
      %c0_35 = arith.constant 0 : index
      %c0_36 = arith.constant 0 : index
      %c0_37 = arith.constant 0 : index
      %94 = vector.load %arg12[%c0_35, %c0_36, %c0_37] : memref<2x16x1xf32, #tpu.memory_space<vmem>>, vector<1x16x1xf32>
      %95 = vector.shape_cast %94 : vector<1x16x1xf32> to vector<16x1xf32>
      %96 = arith.mulf %90, %95 : vector<16x1xf32>
      %cst_38 = arith.constant dense<0.000000e+00> : vector<16xf32>
      %97 = vector.multi_reduction <add>, %93, %cst_38 [1] : vector<16x16xf32> to vector<16xf32>
      %98 = vector.shape_cast %97 : vector<16xf32> to vector<16x1xf32>
      %99 = arith.addf %96, %98 : vector<16x1xf32>
      %c0_39 = arith.constant 0 : index
      %c0_40 = arith.constant 0 : index
      %c0_41 = arith.constant 0 : index
      %100 = vector.load %arg12[%c0_39, %c0_40, %c0_41] : memref<2x16x1xf32, #tpu.memory_space<vmem>>, vector<1x16x1xf32>
      %101 = vector.shape_cast %100 : vector<1x16x1xf32> to vector<16x1xf32>
      %102 = vector.shape_cast %99 : vector<16x1xf32> to vector<1x16x1xf32>
      tpu.vector_store %arg12[%c0_39, %c0_40, %c0_41], %102 {strides = array<i32>} : memref<2x16x1xf32, #tpu.memory_space<vmem>>, vector<1x16x1xf32>,
      %c0_42 = arith.constant 0 : index
      %c0_43 = arith.constant 0 : index
      %c0_44 = arith.constant 0 : index
      %103 = vector.load %arg13[%c0_42, %c0_43, %c0_44] : memref<2x16x128xf32, #tpu.memory_space<vmem>>, vector<1x16x128xf32>
      %104 = vector.shape_cast %103 : vector<1x16x128xf32> to vector<16x128xf32>
      %105 = vector.broadcast %90 : vector<16x1xf32> to vector<16x128xf32>
      %106 = arith.mulf %105, %104 : vector<16x128xf32>
      %107 = arith.truncf %93 : vector<16x16xf32> to vector<16x16xbf16>
      %108 = vector.extract_strided_slice %34 {offsets = [0, 0], sizes = [16, 128], strides = [1, 1]} : vector<16x256xbf16> to vector<16x128xbf16>
      %cst_45 = arith.constant dense<0.000000e+00> : vector<16x128xf32>
      %109 = tpu.matmul %107, %108, %cst_45 {dimension_numbers = #tpu.dot_dimension_numbers<[1], [0], [0], [1], [0, 0, 1, 1], [], []>} : vector<16x16xbf16>, vector<16x128xbf16>, vector<16x128xf32> -> vector<16x128xf32>
      %110 = arith.addf %106, %109 : vector<16x128xf32>
      %c0_46 = arith.constant 0 : index
      %c0_47 = arith.constant 0 : index
      %c0_48 = arith.constant 0 : index
      %111 = vector.load %arg13[%c0_46, %c0_47, %c0_48] : memref<2x16x128xf32, #tpu.memory_space<vmem>>, vector<1x16x128xf32>
      %112 = vector.shape_cast %111 : vector<1x16x128xf32> to vector<16x128xf32>
      %113 = vector.shape_cast %110 : vector<16x128xf32> to vector<1x16x128xf32>
      tpu.vector_store %arg13[%c0_46, %c0_47, %c0_48], %113 {strides = array<i32>} : memref<2x16x128xf32, #tpu.memory_space<vmem>>, vector<1x16x128xf32>,
      %c0_49 = arith.constant 0 : index
      %c0_50 = arith.constant 0 : index
      %c0_51 = arith.constant 0 : index
      %114 = vector.load %arg11[%c0_49, %c0_50, %c0_51] : memref<2x16x1xf32, #tpu.memory_space<vmem>>, vector<1x16x1xf32>
      %115 = vector.shape_cast %114 : vector<1x16x1xf32> to vector<16x1xf32>
      %116 = vector.shape_cast %88 : vector<16x1xf32> to vector<1x16x1xf32>
      tpu.vector_store %arg11[%c0_49, %c0_50, %c0_51], %116 {strides = array<i32>} : memref<2x16x1xf32, #tpu.memory_space<vmem>>, vector<1x16x1xf32>,
      %117 = vector.extract_strided_slice %30 {offsets = [0, 128], sizes = [16, 128], strides = [1, 1]} : vector<16x256xbf16> to vector<16x128xbf16>
      %118 = arith.extf %117 : vector<16x128xbf16> to vector<16x128xf32>
      %119 = arith.mulf %118, %118 : vector<16x128xf32>
      %cst_52 = arith.constant dense<0.000000e+00> : vector<16xf32>
      %120 = vector.multi_reduction <add>, %119, %cst_52 [1] : vector<16x128xf32> to vector<16xf32>
      %121 = vector.shape_cast %120 : vector<16xf32> to vector<16x1xf32>
      %cst_53 = arith.constant 1.280000e+02 : f32
      %122 = vector.broadcast %cst_53 : f32 to vector<16x1xf32>
      %123 = arith.divf %121, %122 : vector<16x1xf32>
      %cst_54 = arith.constant 1.1920929E-7 : f32
      %124 = vector.broadcast %cst_54 : f32 to vector<16x1xf32>
      %125 = arith.addf %123, %124 : vector<16x1xf32>
      %126 = math.rsqrt %125 : vector<16x1xf32>
      %127 = vector.broadcast %126 : vector<16x1xf32> to vector<16x128xf32>
      %128 = arith.mulf %118, %127 : vector<16x128xf32>
      %129 = vector.extract_strided_slice %128 {offsets = [0, 0], sizes = [16, 64], strides = [1, 1]} : vector<16x128xf32> to vector<16x64xf32>
      %130 = vector.extract_strided_slice %128 {offsets = [0, 64], sizes = [16, 64], strides = [1, 1]} : vector<16x128xf32> to vector<16x64xf32>
      %131 = arith.mulf %129, %13 : vector<16x64xf32>
      %132 = arith.mulf %130, %15 : vector<16x64xf32>
      %133 = arith.addf %131, %132 : vector<16x64xf32>
      %134 = arith.mulf %130, %13 : vector<16x64xf32>
      %135 = arith.mulf %129, %15 : vector<16x64xf32>
      %136 = arith.subf %134, %135 : vector<16x64xf32>
      %137 = tpu.concatenate %133, %136 in 1 : vector<16x64xf32>, vector<16x64xf32> -> vector<16x128xf32>
      %cst_55 = arith.constant 0.0883883461 : f32
      %138 = vector.broadcast %cst_55 : f32 to vector<16x128xf32>
      %139 = arith.mulf %137, %138 : vector<16x128xf32>
      %140 = vector.extract_strided_slice %32 {offsets = [0, 128], sizes = [16, 128], strides = [1, 1]} : vector<16x256xbf16> to vector<16x128xbf16>
      %141 = arith.extf %140 : vector<16x128xbf16> to vector<16x128xf32>
      %142 = arith.mulf %141, %141 : vector<16x128xf32>
      %cst_56 = arith.constant dense<0.000000e+00> : vector<16xf32>
      %143 = vector.multi_reduction <add>, %142, %cst_56 [1] : vector<16x128xf32> to vector<16xf32>
      %144 = vector.shape_cast %143 : vector<16xf32> to vector<16x1xf32>
      %cst_57 = arith.constant 1.280000e+02 : f32
      %145 = vector.broadcast %cst_57 : f32 to vector<16x1xf32>
      %146 = arith.divf %144, %145 : vector<16x1xf32>
      %cst_58 = arith.constant 1.1920929E-7 : f32
      %147 = vector.broadcast %cst_58 : f32 to vector<16x1xf32>
      %148 = arith.addf %146, %147 : vector<16x1xf32>
      %149 = math.rsqrt %148 : vector<16x1xf32>
      %150 = vector.broadcast %149 : vector<16x1xf32> to vector<16x128xf32>
      %151 = arith.mulf %141, %150 : vector<16x128xf32>
      %152 = vector.extract_strided_slice %151 {offsets = [0, 0], sizes = [16, 64], strides = [1, 1]} : vector<16x128xf32> to vector<16x64xf32>
      %153 = vector.extract_strided_slice %151 {offsets = [0, 64], sizes = [16, 64], strides = [1, 1]} : vector<16x128xf32> to vector<16x64xf32>
      %154 = arith.mulf %152, %17 : vector<16x64xf32>
      %155 = arith.mulf %153, %19 : vector<16x64xf32>
      %156 = arith.addf %154, %155 : vector<16x64xf32>
      %157 = arith.mulf %153, %17 : vector<16x64xf32>
      %158 = arith.mulf %152, %19 : vector<16x64xf32>
      %159 = arith.subf %157, %158 : vector<16x64xf32>
      %160 = tpu.concatenate %156, %159 in 1 : vector<16x64xf32>, vector<16x64xf32> -> vector<16x128xf32>
      %161 = arith.truncf %139 : vector<16x128xf32> to vector<16x128xbf16>
      %162 = arith.truncf %160 : vector<16x128xf32> to vector<16x128xbf16>
      %cst_59 = arith.constant dense<0.000000e+00> : vector<16x16xf32>
      %163 = tpu.matmul %161, %162, %cst_59 {dimension_numbers = #tpu.dot_dimension_numbers<[1], [1], [0], [0], [0, 0, 1, 0], [], []>} : vector<16x128xbf16>, vector<16x128xbf16>, vector<16x16xf32> -> vector<16x16xf32>
      %cst_60 = arith.constant -1.000000e+30 : f32
      %164 = vector.broadcast %cst_60 : f32 to vector<16x16xf32>
      %165 = arith.select %28, %163, %164 : vector<16x16xi1>, vector<16x16xf32>
      %c1 = arith.constant 1 : index
      %c0_61 = arith.constant 0 : index
      %c0_62 = arith.constant 0 : index
      %166 = vector.load %arg11[%c1, %c0_61, %c0_62] : memref<2x16x1xf32, #tpu.memory_space<vmem>>, vector<1x16x1xf32>
      %167 = vector.shape_cast %166 : vector<1x16x1xf32> to vector<16x1xf32>
      %cst_63 = arith.constant dense<0xFF800000> : vector<16xf32>
      %168 = vector.multi_reduction <maximumf>, %165, %cst_63 [1] : vector<16x16xf32> to vector<16xf32>
      %169 = vector.shape_cast %168 : vector<16xf32> to vector<16x1xf32>
      %170 = arith.maximumf %167, %169 : vector<16x1xf32>
      %171 = arith.subf %167, %170 : vector<16x1xf32>
      %172 = math.exp %171 : vector<16x1xf32>
      %173 = vector.broadcast %170 : vector<16x1xf32> to vector<16x16xf32>
      %174 = arith.subf %165, %173 : vector<16x16xf32>
      %175 = math.exp %174 : vector<16x16xf32>
      %c1_64 = arith.constant 1 : index
      %c0_65 = arith.constant 0 : index
      %c0_66 = arith.constant 0 : index
      %176 = vector.load %arg12[%c1_64, %c0_65, %c0_66] : memref<2x16x1xf32, #tpu.memory_space<vmem>>, vector<1x16x1xf32>
      %177 = vector.shape_cast %176 : vector<1x16x1xf32> to vector<16x1xf32>
      %178 = arith.mulf %172, %177 : vector<16x1xf32>
      %cst_67 = arith.constant dense<0.000000e+00> : vector<16xf32>
      %179 = vector.multi_reduction <add>, %175, %cst_67 [1] : vector<16x16xf32> to vector<16xf32>
      %180 = vector.shape_cast %179 : vector<16xf32> to vector<16x1xf32>
      %181 = arith.addf %178, %180 : vector<16x1xf32>
      %c1_68 = arith.constant 1 : index
      %c0_69 = arith.constant 0 : index
      %c0_70 = arith.constant 0 : index
      %182 = vector.load %arg12[%c1_68, %c0_69, %c0_70] : memref<2x16x1xf32, #tpu.memory_space<vmem>>, vector<1x16x1xf32>
      %183 = vector.shape_cast %182 : vector<1x16x1xf32> to vector<16x1xf32>
      %184 = vector.shape_cast %181 : vector<16x1xf32> to vector<1x16x1xf32>
      tpu.vector_store %arg12[%c1_68, %c0_69, %c0_70], %184 {strides = array<i32>} : memref<2x16x1xf32, #tpu.memory_space<vmem>>, vector<1x16x1xf32>,
      %c1_71 = arith.constant 1 : index
      %c0_72 = arith.constant 0 : index
      %c0_73 = arith.constant 0 : index
      %185 = vector.load %arg13[%c1_71, %c0_72, %c0_73] : memref<2x16x128xf32, #tpu.memory_space<vmem>>, vector<1x16x128xf32>
      %186 = vector.shape_cast %185 : vector<1x16x128xf32> to vector<16x128xf32>
      %187 = vector.broadcast %172 : vector<16x1xf32> to vector<16x128xf32>
      %188 = arith.mulf %187, %186 : vector<16x128xf32>
      %189 = arith.truncf %175 : vector<16x16xf32> to vector<16x16xbf16>
      %190 = vector.extract_strided_slice %34 {offsets = [0, 128], sizes = [16, 128], strides = [1, 1]} : vector<16x256xbf16> to vector<16x128xbf16>
      %cst_74 = arith.constant dense<0.000000e+00> : vector<16x128xf32>
      %191 = tpu.matmul %189, %190, %cst_74 {dimension_numbers = #tpu.dot_dimension_numbers<[1], [0], [0], [1], [0, 0, 1, 1], [], []>} : vector<16x16xbf16>, vector<16x128xbf16>, vector<16x128xf32> -> vector<16x128xf32>
      %192 = arith.addf %188, %191 : vector<16x128xf32>
      %c1_75 = arith.constant 1 : index
      %c0_76 = arith.constant 0 : index
      %c0_77 = arith.constant 0 : index
      %193 = vector.load %arg13[%c1_75, %c0_76, %c0_77] : memref<2x16x128xf32, #tpu.memory_space<vmem>>, vector<1x16x128xf32>
      %194 = vector.shape_cast %193 : vector<1x16x128xf32> to vector<16x128xf32>
      %195 = vector.shape_cast %192 : vector<16x128xf32> to vector<1x16x128xf32>
      tpu.vector_store %arg13[%c1_75, %c0_76, %c0_77], %195 {strides = array<i32>} : memref<2x16x128xf32, #tpu.memory_space<vmem>>, vector<1x16x128xf32>,
      %c1_78 = arith.constant 1 : index
      %c0_79 = arith.constant 0 : index
      %c0_80 = arith.constant 0 : index
      %196 = vector.load %arg11[%c1_78, %c0_79, %c0_80] : memref<2x16x1xf32, #tpu.memory_space<vmem>>, vector<1x16x1xf32>
      %197 = vector.shape_cast %196 : vector<1x16x1xf32> to vector<16x1xf32>
      %198 = vector.shape_cast %170 : vector<16x1xf32> to vector<1x16x1xf32>
      tpu.vector_store %arg11[%c1_78, %c0_79, %c0_80], %198 {strides = array<i32>} : memref<2x16x1xf32, #tpu.memory_space<vmem>>, vector<1x16x1xf32>,
    } else {
    }
    %c0_i32_3 = arith.constant 0 : i32
    %9 = arith.cmpi eq, %arg2, %c0_i32_3 : i32
    %10 = arith.extui %9 : i1 to i32
    %c0_i32_4 = arith.constant 0 : i32
    %11 = arith.cmpi ne, %10, %c0_i32_4 : i32
    scf.if %11 {
      %c0 = arith.constant 0 : index
      %c0_5 = arith.constant 0 : index
      %c0_6 = arith.constant 0 : index
      %12 = vector.load %arg12[%c0, %c0_5, %c0_6] : memref<2x16x1xf32, #tpu.memory_space<vmem>>, vector<1x16x1xf32>
      %13 = vector.shape_cast %12 : vector<1x16x1xf32> to vector<16x1xf32>
      %14 = tpu.reciprocal %13 {approx = true} : vector<16x1xf32> -> vector<16x1xf32>
      %c0_7 = arith.constant 0 : index
      %c0_8 = arith.constant 0 : index
      %c0_9 = arith.constant 0 : index
      %15 = vector.load %arg13[%c0_7, %c0_8, %c0_9] : memref<2x16x128xf32, #tpu.memory_space<vmem>>, vector<1x16x128xf32>
      %16 = vector.shape_cast %15 : vector<1x16x128xf32> to vector<16x128xf32>
      %17 = vector.broadcast %14 : vector<16x1xf32> to vector<16x128xf32>
      %18 = arith.mulf %16, %17 : vector<16x128xf32>
      %19 = arith.truncf %18 : vector<16x128xf32> to vector<16x128xbf16>
      %c0_10 = arith.constant 0 : index
      %c0_11 = arith.constant 0 : index
      %c0_12 = arith.constant 0 : index
      %20 = vector.load %arg10[%c0_10, %c0_11, %c0_12] : memref<1x16x256xbf16, #tpu.memory_space<vmem>>, vector<1x16x128xbf16>
      %21 = vector.shape_cast %20 : vector<1x16x128xbf16> to vector<16x128xbf16>
      %22 = vector.shape_cast %19 : vector<16x128xbf16> to vector<1x16x128xbf16>
      tpu.vector_store %arg10[%c0_10, %c0_11, %c0_12], %22 {strides = array<i32>} : memref<1x16x256xbf16, #tpu.memory_space<vmem>>, vector<1x16x128xbf16>,
      %c1 = arith.constant 1 : index
      %c0_13 = arith.constant 0 : index
      %c0_14 = arith.constant 0 : index
      %23 = vector.load %arg12[%c1, %c0_13, %c0_14] : memref<2x16x1xf32, #tpu.memory_space<vmem>>, vector<1x16x1xf32>
      %24 = vector.shape_cast %23 : vector<1x16x1xf32> to vector<16x1xf32>
      %25 = tpu.reciprocal %24 {approx = true} : vector<16x1xf32> -> vector<16x1xf32>
      %c1_15 = arith.constant 1 : index
      %c0_16 = arith.constant 0 : index
      %c0_17 = arith.constant 0 : index
      %26 = vector.load %arg13[%c1_15, %c0_16, %c0_17] : memref<2x16x128xf32, #tpu.memory_space<vmem>>, vector<1x16x128xf32>
      %27 = vector.shape_cast %26 : vector<1x16x128xf32> to vector<16x128xf32>
      %28 = vector.broadcast %25 : vector<16x1xf32> to vector<16x128xf32>
      %29 = arith.mulf %27, %28 : vector<16x128xf32>
      %30 = arith.truncf %29 : vector<16x128xf32> to vector<16x128xbf16>
      %c0_18 = arith.constant 0 : index
      %c0_19 = arith.constant 0 : index
      %c128 = arith.constant 128 : index
      %31 = vector.load %arg10[%c0_18, %c0_19, %c128] : memref<1x16x256xbf16, #tpu.memory_space<vmem>>, vector<1x16x128xbf16>
      %32 = vector.shape_cast %31 : vector<1x16x128xbf16> to vector<16x128xbf16>
      %33 = vector.shape_cast %30 : vector<16x128xbf16> to vector<1x16x128xbf16>
      tpu.vector_store %arg10[%c0_18, %c0_19, %c128], %33 {strides = array<i32>} : memref<1x16x256xbf16, #tpu.memory_space<vmem>>, vector<1x16x128xbf16>,
    } else {
    }
    return
  }
  func.func @transform_0(%arg0: i32, %arg1: i32, %arg2: i32) -> (i32, i32, i32) {
    %c0_i32 = arith.constant 0 : i32
    %c0_i32_0 = arith.constant 0 : i32
    return %arg0, %arg1, %c0_i32 : i32, i32, i32
  }
  func.func @transform_1(%arg0: i32, %arg1: i32, %arg2: i32) -> (i32, i32, i32) {
    %c1_i32 = arith.constant 1 : i32
    %c0_i32 = arith.constant 0 : i32
    return %arg0, %arg2, %c1_i32 : i32, i32, i32
  }
  func.func @transform_2(%arg0: i32, %arg1: i32, %arg2: i32) -> (i32, i32, i32) {
    %c2_i32 = arith.constant 2 : i32
    %c0_i32 = arith.constant 0 : i32
    return %arg0, %arg2, %c2_i32 : i32, i32, i32
  }
  func.func @transform_3(%arg0: i32, %arg1: i32, %arg2: i32) -> (i32, i32) {
    %c0_i32 = arith.constant 0 : i32
    %c0_i32_0 = arith.constant 0 : i32
    return %arg1, %c0_i32 : i32, i32
  }
  func.func @transform_4(%arg0: i32, %arg1: i32, %arg2: i32) -> (i32, i32) {
    %c0_i32 = arith.constant 0 : i32
    %c0_i32_0 = arith.constant 0 : i32
    return %arg1, %c0_i32 : i32, i32
  }
  func.func @transform_5(%arg0: i32, %arg1: i32, %arg2: i32) -> (i32, i32) {
    %c0_i32 = arith.constant 0 : i32
    %c0_i32_0 = arith.constant 0 : i32
    return %arg2, %c0_i32 : i32, i32
  }
  func.func @transform_6(%arg0: i32, %arg1: i32, %arg2: i32) -> (i32, i32) {
    %c0_i32 = arith.constant 0 : i32
    %c0_i32_0 = arith.constant 0 : i32
    return %arg2, %c0_i32 : i32, i32
  }
  func.func @transform_7(%arg0: i32, %arg1: i32, %arg2: i32) -> (i32, i32, i32) {
    %c0_i32 = arith.constant 0 : i32
    %c0_i32_0 = arith.constant 0 : i32
    return %arg0, %arg1, %c0_i32 : i32, i32, i32
  }
}

module attributes {stable_mosaic.version = 11 : i64} {
  func.func @_matmul_residual_kernel(%arg0: i32, %arg1: i32, %arg2: i32, %arg3: memref<32x256xbf16, #tpu.memory_space<vmem>>, %arg4: memref<256x256xbf16, #tpu.memory_space<vmem>>, %arg5: memref<32x256xbf16, #tpu.memory_space<vmem>>, %arg6: memref<32x256xbf16, #tpu.memory_space<vmem>>, %arg7: memref<32x256xf32, #tpu.memory_space<vmem>>) attributes {dimension_semantics = [#tpu.dimension_semantics<parallel>, #tpu.dimension_semantics<parallel>, #tpu.dimension_semantics<arbitrary>], iteration_bounds = array<i64: 1, 1, 1>, scalar_prefetch = 0 : i64, scratch_operands = 1 : i64, tpu.core_type = #tpu.core_type<tc>, window_params = [{transform_indices = @transform_0, window_bounds = array<i64: 32, 256>}, {transform_indices = @transform_1, window_bounds = array<i64: 256, 256>}, {transform_indices = @transform_2, window_bounds = array<i64: 32, 256>}, {transform_indices = @transform_3, window_bounds = array<i64: 32, 256>}]} {
    %c0_i32 = arith.constant 0 : i32
    %0 = arith.cmpi eq, %arg2, %c0_i32 : i32
    %1 = arith.extui %0 : i1 to i32
    %c0_i32_0 = arith.constant 0 : i32
    %2 = arith.cmpi ne, %1, %c0_i32_0 : i32
    scf.if %2 {
      %cst_10 = arith.constant 0.000000e+00 : f32
      %12 = vector.broadcast %cst_10 : f32 to vector<32x256xf32>
      %c0_11 = arith.constant 0 : index
      %c0_12 = arith.constant 0 : index
      %13 = vector.load %arg7[%c0_11, %c0_12] : memref<32x256xf32, #tpu.memory_space<vmem>>, vector<32x256xf32>
      tpu.vector_store %arg7[%c0_11, %c0_12], %12 {strides = array<i32>} : memref<32x256xf32, #tpu.memory_space<vmem>>, vector<32x256xf32>,
    } else {
    }
    %c0 = arith.constant 0 : index
    %c0_1 = arith.constant 0 : index
    %3 = vector.load %arg7[%c0, %c0_1] : memref<32x256xf32, #tpu.memory_space<vmem>>, vector<32x256xf32>
    %c0_2 = arith.constant 0 : index
    %c0_3 = arith.constant 0 : index
    %4 = vector.load %arg3[%c0_2, %c0_3] : memref<32x256xbf16, #tpu.memory_space<vmem>>, vector<32x256xbf16>
    %c0_4 = arith.constant 0 : index
    %c0_5 = arith.constant 0 : index
    %5 = vector.load %arg4[%c0_4, %c0_5] : memref<256x256xbf16, #tpu.memory_space<vmem>>, vector<256x256xbf16>
    %cst = arith.constant dense<0.000000e+00> : vector<32x256xf32>
    %6 = tpu.matmul %4, %5, %cst {dimension_numbers = #tpu.dot_dimension_numbers<[1], [0], [0], [1], [0, 0, 1, 1], [], []>} : vector<32x256xbf16>, vector<256x256xbf16>, vector<32x256xf32> -> vector<32x256xf32>
    %7 = arith.addf %3, %6 : vector<32x256xf32>
    %c0_6 = arith.constant 0 : index
    %c0_7 = arith.constant 0 : index
    %8 = vector.load %arg7[%c0_6, %c0_7] : memref<32x256xf32, #tpu.memory_space<vmem>>, vector<32x256xf32>
    tpu.vector_store %arg7[%c0_6, %c0_7], %7 {strides = array<i32>} : memref<32x256xf32, #tpu.memory_space<vmem>>, vector<32x256xf32>,
    %c0_i32_8 = arith.constant 0 : i32
    %9 = arith.cmpi eq, %arg2, %c0_i32_8 : i32
    %10 = arith.extui %9 : i1 to i32
    %c0_i32_9 = arith.constant 0 : i32
    %11 = arith.cmpi ne, %10, %c0_i32_9 : i32
    scf.if %11 {
      %c0_10 = arith.constant 0 : index
      %c0_11 = arith.constant 0 : index
      %12 = vector.load %arg7[%c0_10, %c0_11] : memref<32x256xf32, #tpu.memory_space<vmem>>, vector<32x256xf32>
      %c0_12 = arith.constant 0 : index
      %c0_13 = arith.constant 0 : index
      %13 = vector.load %arg5[%c0_12, %c0_13] : memref<32x256xbf16, #tpu.memory_space<vmem>>, vector<32x256xbf16>
      %14 = arith.extf %13 : vector<32x256xbf16> to vector<32x256xf32>
      %15 = arith.addf %12, %14 : vector<32x256xf32>
      %16 = arith.truncf %15 : vector<32x256xf32> to vector<32x256xbf16>
      %c0_14 = arith.constant 0 : index
      %c0_15 = arith.constant 0 : index
      %17 = vector.load %arg6[%c0_14, %c0_15] : memref<32x256xbf16, #tpu.memory_space<vmem>>, vector<32x256xbf16>
      tpu.vector_store %arg6[%c0_14, %c0_15], %16 {strides = array<i32>} : memref<32x256xbf16, #tpu.memory_space<vmem>>, vector<32x256xbf16>,
    } else {
    }
    return
  }
  func.func @transform_0(%arg0: i32, %arg1: i32, %arg2: i32) -> (i32, i32) {
    %c0_i32 = arith.constant 0 : i32
    return %arg0, %arg2 : i32, i32
  }
  func.func @transform_1(%arg0: i32, %arg1: i32, %arg2: i32) -> (i32, i32) {
    %c0_i32 = arith.constant 0 : i32
    return %arg2, %arg1 : i32, i32
  }
  func.func @transform_2(%arg0: i32, %arg1: i32, %arg2: i32) -> (i32, i32) {
    %c0_i32 = arith.constant 0 : i32
    return %arg0, %arg1 : i32, i32
  }
  func.func @transform_3(%arg0: i32, %arg1: i32, %arg2: i32) -> (i32, i32) {
    %c0_i32 = arith.constant 0 : i32
    return %arg0, %arg1 : i32, i32
  }
}

module attributes {stable_mosaic.version = 11 : i64} {
  func.func @_rms_matmul_kernel(%arg0: i32, %arg1: i32, %arg2: memref<32x256xbf16, #tpu.memory_space<vmem>>, %arg3: memref<256x512xbf16, #tpu.memory_space<vmem>>, %arg4: memref<32x512xbf16, #tpu.memory_space<vmem>>) attributes {dimension_semantics = [#tpu.dimension_semantics<parallel>, #tpu.dimension_semantics<parallel>], iteration_bounds = array<i64: 1, 2>, scalar_prefetch = 0 : i64, scratch_operands = 0 : i64, tpu.core_type = #tpu.core_type<tc>, window_params = [{transform_indices = @transform_0, window_bounds = array<i64: 32, 256>}, {transform_indices = @transform_1, window_bounds = array<i64: 256, 512>}, {transform_indices = @transform_2, window_bounds = array<i64: 32, 512>}]} {
    %c0 = arith.constant 0 : index
    %c0_0 = arith.constant 0 : index
    %0 = vector.load %arg2[%c0, %c0_0] : memref<32x256xbf16, #tpu.memory_space<vmem>>, vector<32x256xbf16>
    %1 = arith.extf %0 : vector<32x256xbf16> to vector<32x256xf32>
    %2 = arith.mulf %1, %1 : vector<32x256xf32>
    %cst = arith.constant dense<0.000000e+00> : vector<32xf32>
    %3 = vector.multi_reduction <add>, %2, %cst [1] : vector<32x256xf32> to vector<32xf32>
    %4 = vector.shape_cast %3 : vector<32xf32> to vector<32x1xf32>
    %cst_1 = arith.constant 2.560000e+02 : f32
    %5 = vector.broadcast %cst_1 : f32 to vector<32x1xf32>
    %6 = arith.divf %4, %5 : vector<32x1xf32>
    %cst_2 = arith.constant 1.1920929E-7 : f32
    %7 = vector.broadcast %cst_2 : f32 to vector<32x1xf32>
    %8 = arith.addf %6, %7 : vector<32x1xf32>
    %9 = math.rsqrt %8 : vector<32x1xf32>
    %10 = vector.broadcast %9 : vector<32x1xf32> to vector<32x256xf32>
    %11 = arith.mulf %1, %10 : vector<32x256xf32>
    %12 = arith.truncf %11 : vector<32x256xf32> to vector<32x256xbf16>
    %c0_3 = arith.constant 0 : index
    %c0_4 = arith.constant 0 : index
    %13 = vector.load %arg3[%c0_3, %c0_4] : memref<256x512xbf16, #tpu.memory_space<vmem>>, vector<256x512xbf16>
    %cst_5 = arith.constant dense<0.000000e+00> : vector<32x512xf32>
    %14 = tpu.matmul %12, %13, %cst_5 {dimension_numbers = #tpu.dot_dimension_numbers<[1], [0], [0], [1], [0, 0, 1, 1], [], []>} : vector<32x256xbf16>, vector<256x512xbf16>, vector<32x512xf32> -> vector<32x512xf32>
    %cst_6 = arith.constant 0.000000e+00 : f32
    %15 = vector.broadcast %cst_6 : f32 to vector<32x512xf32>
    %16 = arith.maximumf %14, %15 : vector<32x512xf32>
    %17 = arith.mulf %16, %16 : vector<32x512xf32>
    %18 = arith.truncf %17 : vector<32x512xf32> to vector<32x512xbf16>
    %c0_7 = arith.constant 0 : index
    %c0_8 = arith.constant 0 : index
    %19 = vector.load %arg4[%c0_7, %c0_8] : memref<32x512xbf16, #tpu.memory_space<vmem>>, vector<32x512xbf16>
    tpu.vector_store %arg4[%c0_7, %c0_8], %18 {strides = array<i32>} : memref<32x512xbf16, #tpu.memory_space<vmem>>, vector<32x512xbf16>,
    return
  }
  func.func @transform_0(%arg0: i32, %arg1: i32) -> (i32, i32) {
    %c0_i32 = arith.constant 0 : i32
    %c0_i32_0 = arith.constant 0 : i32
    return %arg0, %c0_i32 : i32, i32
  }
  func.func @transform_1(%arg0: i32, %arg1: i32) -> (i32, i32) {
    %c0_i32 = arith.constant 0 : i32
    %c0_i32_0 = arith.constant 0 : i32
    return %c0_i32, %arg1 : i32, i32
  }
  func.func @transform_2(%arg0: i32, %arg1: i32) -> (i32, i32) {
    %c0_i32 = arith.constant 0 : i32
    return %arg0, %arg1 : i32, i32
  }
}

module attributes {stable_mosaic.version = 11 : i64} {
  func.func @_matmul_residual_kernel(%arg0: i32, %arg1: i32, %arg2: i32, %arg3: memref<32x512xbf16, #tpu.memory_space<vmem>>, %arg4: memref<512x256xbf16, #tpu.memory_space<vmem>>, %arg5: memref<32x256xbf16, #tpu.memory_space<vmem>>, %arg6: memref<32x256xbf16, #tpu.memory_space<vmem>>, %arg7: memref<32x256xf32, #tpu.memory_space<vmem>>) attributes {dimension_semantics = [#tpu.dimension_semantics<parallel>, #tpu.dimension_semantics<parallel>, #tpu.dimension_semantics<arbitrary>], iteration_bounds = array<i64: 1, 1, 2>, scalar_prefetch = 0 : i64, scratch_operands = 1 : i64, tpu.core_type = #tpu.core_type<tc>, window_params = [{transform_indices = @transform_0, window_bounds = array<i64: 32, 512>}, {transform_indices = @transform_1, window_bounds = array<i64: 512, 256>}, {transform_indices = @transform_2, window_bounds = array<i64: 32, 256>}, {transform_indices = @transform_3, window_bounds = array<i64: 32, 256>}]} {
    %c0_i32 = arith.constant 0 : i32
    %0 = arith.cmpi eq, %arg2, %c0_i32 : i32
    %1 = arith.extui %0 : i1 to i32
    %c0_i32_0 = arith.constant 0 : i32
    %2 = arith.cmpi ne, %1, %c0_i32_0 : i32
    scf.if %2 {
      %cst_9 = arith.constant 0.000000e+00 : f32
      %12 = vector.broadcast %cst_9 : f32 to vector<32x256xf32>
      %c0_10 = arith.constant 0 : index
      %c0_11 = arith.constant 0 : index
      %13 = vector.load %arg7[%c0_10, %c0_11] : memref<32x256xf32, #tpu.memory_space<vmem>>, vector<32x256xf32>
      tpu.vector_store %arg7[%c0_10, %c0_11], %12 {strides = array<i32>} : memref<32x256xf32, #tpu.memory_space<vmem>>, vector<32x256xf32>,
    } else {
    }
    %c0 = arith.constant 0 : index
    %c0_1 = arith.constant 0 : index
    %3 = vector.load %arg7[%c0, %c0_1] : memref<32x256xf32, #tpu.memory_space<vmem>>, vector<32x256xf32>
    %c0_2 = arith.constant 0 : index
    %c0_3 = arith.constant 0 : index
    %4 = vector.load %arg3[%c0_2, %c0_3] : memref<32x512xbf16, #tpu.memory_space<vmem>>, vector<32x512xbf16>
    %c0_4 = arith.constant 0 : index
    %c0_5 = arith.constant 0 : index
    %5 = vector.load %arg4[%c0_4, %c0_5] : memref<512x256xbf16, #tpu.memory_space<vmem>>, vector<512x256xbf16>
    %cst = arith.constant dense<0.000000e+00> : vector<32x256xf32>
    %6 = tpu.matmul %4, %5, %cst {dimension_numbers = #tpu.dot_dimension_numbers<[1], [0], [0], [1], [0, 0, 1, 1], [], []>} : vector<32x512xbf16>, vector<512x256xbf16>, vector<32x256xf32> -> vector<32x256xf32>
    %7 = arith.addf %3, %6 : vector<32x256xf32>
    %c0_6 = arith.constant 0 : index
    %c0_7 = arith.constant 0 : index
    %8 = vector.load %arg7[%c0_6, %c0_7] : memref<32x256xf32, #tpu.memory_space<vmem>>, vector<32x256xf32>
    tpu.vector_store %arg7[%c0_6, %c0_7], %7 {strides = array<i32>} : memref<32x256xf32, #tpu.memory_space<vmem>>, vector<32x256xf32>,
    %c1_i32 = arith.constant 1 : i32
    %9 = arith.cmpi eq, %arg2, %c1_i32 : i32
    %10 = arith.extui %9 : i1 to i32
    %c0_i32_8 = arith.constant 0 : i32
    %11 = arith.cmpi ne, %10, %c0_i32_8 : i32
    scf.if %11 {
      %c0_9 = arith.constant 0 : index
      %c0_10 = arith.constant 0 : index
      %12 = vector.load %arg7[%c0_9, %c0_10] : memref<32x256xf32, #tpu.memory_space<vmem>>, vector<32x256xf32>
      %c0_11 = arith.constant 0 : index
      %c0_12 = arith.constant 0 : index
      %13 = vector.load %arg5[%c0_11, %c0_12] : memref<32x256xbf16, #tpu.memory_space<vmem>>, vector<32x256xbf16>
      %14 = arith.extf %13 : vector<32x256xbf16> to vector<32x256xf32>
      %15 = arith.addf %12, %14 : vector<32x256xf32>
      %16 = arith.truncf %15 : vector<32x256xf32> to vector<32x256xbf16>
      %c0_13 = arith.constant 0 : index
      %c0_14 = arith.constant 0 : index
      %17 = vector.load %arg6[%c0_13, %c0_14] : memref<32x256xbf16, #tpu.memory_space<vmem>>, vector<32x256xbf16>
      tpu.vector_store %arg6[%c0_13, %c0_14], %16 {strides = array<i32>} : memref<32x256xbf16, #tpu.memory_space<vmem>>, vector<32x256xbf16>,
    } else {
    }
    return
  }
  func.func @transform_0(%arg0: i32, %arg1: i32, %arg2: i32) -> (i32, i32) {
    %c0_i32 = arith.constant 0 : i32
    return %arg0, %arg2 : i32, i32
  }
  func.func @transform_1(%arg0: i32, %arg1: i32, %arg2: i32) -> (i32, i32) {
    %c0_i32 = arith.constant 0 : i32
    return %arg2, %arg1 : i32, i32
  }
  func.func @transform_2(%arg0: i32, %arg1: i32, %arg2: i32) -> (i32, i32) {
    %c0_i32 = arith.constant 0 : i32
    return %arg0, %arg1 : i32, i32
  }
  func.func @transform_3(%arg0: i32, %arg1: i32, %arg2: i32) -> (i32, i32) {
    %c0_i32 = arith.constant 0 : i32
    return %arg0, %arg1 : i32, i32
  }
}

module attributes {stable_mosaic.version = 11 : i64} {
  func.func @_rms_matmul_kernel(%arg0: i32, %arg1: i32, %arg2: memref<32x256xbf16, #tpu.memory_space<vmem>>, %arg3: memref<256x384xbf16, #tpu.memory_space<vmem>>, %arg4: memref<32x384xbf16, #tpu.memory_space<vmem>>) attributes {dimension_semantics = [#tpu.dimension_semantics<parallel>, #tpu.dimension_semantics<parallel>], iteration_bounds = array<i64: 1, 2>, scalar_prefetch = 0 : i64, scratch_operands = 0 : i64, tpu.core_type = #tpu.core_type<tc>, window_params = [{transform_indices = @transform_0, window_bounds = array<i64: 32, 256>}, {transform_indices = @transform_1, window_bounds = array<i64: 256, 384>}, {transform_indices = @transform_2, window_bounds = array<i64: 32, 384>}]} {
    %c0 = arith.constant 0 : index
    %c0_0 = arith.constant 0 : index
    %0 = vector.load %arg2[%c0, %c0_0] : memref<32x256xbf16, #tpu.memory_space<vmem>>, vector<32x256xbf16>
    %1 = arith.extf %0 : vector<32x256xbf16> to vector<32x256xf32>
    %2 = arith.mulf %1, %1 : vector<32x256xf32>
    %cst = arith.constant dense<0.000000e+00> : vector<32xf32>
    %3 = vector.multi_reduction <add>, %2, %cst [1] : vector<32x256xf32> to vector<32xf32>
    %4 = vector.shape_cast %3 : vector<32xf32> to vector<32x1xf32>
    %cst_1 = arith.constant 2.560000e+02 : f32
    %5 = vector.broadcast %cst_1 : f32 to vector<32x1xf32>
    %6 = arith.divf %4, %5 : vector<32x1xf32>
    %cst_2 = arith.constant 1.1920929E-7 : f32
    %7 = vector.broadcast %cst_2 : f32 to vector<32x1xf32>
    %8 = arith.addf %6, %7 : vector<32x1xf32>
    %9 = math.rsqrt %8 : vector<32x1xf32>
    %10 = vector.broadcast %9 : vector<32x1xf32> to vector<32x256xf32>
    %11 = arith.mulf %1, %10 : vector<32x256xf32>
    %12 = arith.truncf %11 : vector<32x256xf32> to vector<32x256xbf16>
    %c0_3 = arith.constant 0 : index
    %c0_4 = arith.constant 0 : index
    %13 = vector.load %arg3[%c0_3, %c0_4] : memref<256x384xbf16, #tpu.memory_space<vmem>>, vector<256x384xbf16>
    %cst_5 = arith.constant dense<0.000000e+00> : vector<32x384xf32>
    %14 = tpu.matmul %12, %13, %cst_5 {dimension_numbers = #tpu.dot_dimension_numbers<[1], [0], [0], [1], [0, 0, 1, 1], [], []>} : vector<32x256xbf16>, vector<256x384xbf16>, vector<32x384xf32> -> vector<32x384xf32>
    %15 = arith.truncf %14 : vector<32x384xf32> to vector<32x384xbf16>
    %c0_6 = arith.constant 0 : index
    %c0_7 = arith.constant 0 : index
    %16 = vector.load %arg4[%c0_6, %c0_7] : memref<32x384xbf16, #tpu.memory_space<vmem>>, vector<32x384xbf16>
    tpu.vector_store %arg4[%c0_6, %c0_7], %15 {strides = array<i32>} : memref<32x384xbf16, #tpu.memory_space<vmem>>, vector<32x384xbf16>,
    return
  }
  func.func @transform_0(%arg0: i32, %arg1: i32) -> (i32, i32) {
    %c0_i32 = arith.constant 0 : i32
    %c0_i32_0 = arith.constant 0 : i32
    return %arg0, %c0_i32 : i32, i32
  }
  func.func @transform_1(%arg0: i32, %arg1: i32) -> (i32, i32) {
    %c0_i32 = arith.constant 0 : i32
    %c0_i32_0 = arith.constant 0 : i32
    return %c0_i32, %arg1 : i32, i32
  }
  func.func @transform_2(%arg0: i32, %arg1: i32) -> (i32, i32) {
    %c0_i32 = arith.constant 0 : i32
    return %arg0, %arg1 : i32, i32
  }
}

module attributes {stable_mosaic.version = 11 : i64} {
  func.func @_rms_matmul_kernel(%arg0: i32, %arg1: i32, %arg2: memref<32x256xbf16, #tpu.memory_space<vmem>>, %arg3: memref<256x256xbf16, #tpu.memory_space<vmem>>, %arg4: memref<32x256xf32, #tpu.memory_space<vmem>>) attributes {dimension_semantics = [#tpu.dimension_semantics<parallel>, #tpu.dimension_semantics<parallel>], iteration_bounds = array<i64: 1, 1>, scalar_prefetch = 0 : i64, scratch_operands = 0 : i64, tpu.core_type = #tpu.core_type<tc>, window_params = [{transform_indices = @transform_0, window_bounds = array<i64: 32, 256>}, {transform_indices = @transform_1, window_bounds = array<i64: 256, 256>}, {transform_indices = @transform_2, window_bounds = array<i64: 32, 256>}]} {
    %c0 = arith.constant 0 : index
    %c0_0 = arith.constant 0 : index
    %0 = vector.load %arg2[%c0, %c0_0] : memref<32x256xbf16, #tpu.memory_space<vmem>>, vector<32x256xbf16>
    %1 = arith.extf %0 : vector<32x256xbf16> to vector<32x256xf32>
    %2 = arith.mulf %1, %1 : vector<32x256xf32>
    %cst = arith.constant dense<0.000000e+00> : vector<32xf32>
    %3 = vector.multi_reduction <add>, %2, %cst [1] : vector<32x256xf32> to vector<32xf32>
    %4 = vector.shape_cast %3 : vector<32xf32> to vector<32x1xf32>
    %cst_1 = arith.constant 2.560000e+02 : f32
    %5 = vector.broadcast %cst_1 : f32 to vector<32x1xf32>
    %6 = arith.divf %4, %5 : vector<32x1xf32>
    %cst_2 = arith.constant 1.1920929E-7 : f32
    %7 = vector.broadcast %cst_2 : f32 to vector<32x1xf32>
    %8 = arith.addf %6, %7 : vector<32x1xf32>
    %9 = math.rsqrt %8 : vector<32x1xf32>
    %10 = vector.broadcast %9 : vector<32x1xf32> to vector<32x256xf32>
    %11 = arith.mulf %1, %10 : vector<32x256xf32>
    %12 = arith.truncf %11 : vector<32x256xf32> to vector<32x256xbf16>
    %c0_3 = arith.constant 0 : index
    %c0_4 = arith.constant 0 : index
    %13 = vector.load %arg3[%c0_3, %c0_4] : memref<256x256xbf16, #tpu.memory_space<vmem>>, vector<256x256xbf16>
    %cst_5 = arith.constant dense<0.000000e+00> : vector<32x256xf32>
    %14 = tpu.matmul %12, %13, %cst_5 {dimension_numbers = #tpu.dot_dimension_numbers<[1], [0], [0], [1], [0, 0, 1, 1], [], []>} : vector<32x256xbf16>, vector<256x256xbf16>, vector<32x256xf32> -> vector<32x256xf32>
    %c0_6 = arith.constant 0 : index
    %c0_7 = arith.constant 0 : index
    %15 = vector.load %arg4[%c0_6, %c0_7] : memref<32x256xf32, #tpu.memory_space<vmem>>, vector<32x256xf32>
    tpu.vector_store %arg4[%c0_6, %c0_7], %14 {strides = array<i32>} : memref<32x256xf32, #tpu.memory_space<vmem>>, vector<32x256xf32>,
    return
  }
  func.func @transform_0(%arg0: i32, %arg1: i32) -> (i32, i32) {
    %c0_i32 = arith.constant 0 : i32
    %c0_i32_0 = arith.constant 0 : i32
    return %arg0, %c0_i32 : i32, i32
  }
  func.func @transform_1(%arg0: i32, %arg1: i32) -> (i32, i32) {
    %c0_i32 = arith.constant 0 : i32
    %c0_i32_0 = arith.constant 0 : i32
    return %c0_i32, %arg1 : i32, i32
  }
  func.func @transform_2(%arg0: i32, %arg1: i32) -> (i32, i32) {
    %c0_i32 = arith.constant 0 : i32
    return %arg0, %arg1 : i32, i32
  }
}

</mosaic_0001>

<bundles_post_ra>
// kernel: gpt_forward.18
= control target key start
LH: loop header
LB: loop body
LE: loop exit
PB: predicated region body
PF: predicated region fallthrough
CT: control target
= control target key end

     0   :  { %s664_s1 = inlined_call_operand.vmem [shape: bf16[256,256], index: 1, kind: input, shape index: {}]   ;;  %s665_s0 = inlined_call_operand.vmem [shape: bf16[32,256], index: 0, kind: input, shape index: {}]   ;;  %s666_s2 = inlined_call_operand.vmem [shape: bf16[32,256], index: 2, kind: input, shape index: {}]   ;;  %s667_s3 = inlined_call_operand.vmem [shape: bf16[32,256], index: 3, kind: output, shape index: {}]  }
   0x1   :  { %v458_v0 = vld [vmem:[%s664_s1 + $0x4] ss:$8 sps:$4 sm:$0xff]   ;;  %v460_v1 = vld [vmem:[%s664_s1] ss:$8 sps:$4 sm:$0xff]   ;;  %v461_v2 = vld [vmem:[%s664_s1 + $0x14] ss:$8 sps:$4 sm:$0xff]  }
   0x2   :  { %250 = vmatprep.subr.bf16.mxu0 %v458_v0  ;;  %426 = vmatprep.subr.bf16.mxu1 %v458_v0  ;;  %v463_v3 = vld [vmem:[%s664_s1 + $0x10] ss:$8 sps:$4 sm:$0xff]   ;;  %v464_v4 = vld [vmem:[%s664_s1 + $0x24] ss:$8 sps:$4 sm:$0xff]   ;;  %v466_v5 = vld [vmem:[%s664_s1 + $0x20] ss:$8 sps:$4 sm:$0xff]  }
   0x3   :  { %251 = vmatpush1.bf16.msra.mxu0 %v460_v1  ;;  %442 = vmatpush1.bf16.msra.mxu1 %v460_v1  ;;  %v467_v6 = vld [vmem:[%s664_s1 + $0x34] ss:$8 sps:$4 sm:$0xff]   ;;  %v469_v7 = vld [vmem:[%s664_s1 + $0x30] ss:$8 sps:$4 sm:$0xff]   ;;  %v470_v8 = vld [vmem:[%s664_s1 + $0x44] ss:$8 sps:$4 sm:$0xff]  }
   0x4   :  { %252 = vmatprep.subr.bf16.mxu0 %v461_v2  ;;  %427 = vmatprep.subr.bf16.mxu1 %v461_v2  ;;  %v472_v9 = vld [vmem:[%s664_s1 + $0x40] ss:$8 sps:$4 sm:$0xff]   ;;  %v473_v10 = vld [vmem:[%s664_s1 + $0x54] ss:$8 sps:$4 sm:$0xff]   ;;  %v475_v11 = vld [vmem:[%s664_s1 + $0x50] ss:$8 sps:$4 sm:$0xff]  }
   0x5   :  { %v476_v12 = vld [vmem:[%s664_s1 + $0x64] ss:$8 sps:$4 sm:$0xff]   ;;  %v478_v14 = vld [vmem:[%s664_s1 + $0x60] ss:$8 sps:$4 sm:$0xff]   ;;  %v511_v15 = vld [vmem:[%s665_s0 + $0x14] ss:$8 sps:$4 sm:$0xff]  }
   0x6   :  { %v508_v13 = vld [vmem:[%s665_s0 + $0x4] ss:$8 sps:$4 sm:$0xff]   ;;  %v479_v16 = vld [vmem:[%s664_s1 + $0x74] ss:$8 sps:$4 sm:$0xff]   ;;  %292 = vmatprep.mubr.bf16.mxu1 %v511_v15  ;;  %v481_v17 = vld [vmem:[%s664_s1 + $0x70] ss:$8 sps:$4 sm:$0xff]  }
   0x7   :  { %253 = vmatpush1.bf16.msra.mxu0 %v463_v3  ;;  %443 = vmatpush1.bf16.msra.mxu1 %v463_v3  ;;  %v482_v18 = vld [vmem:[%s664_s1 + $0x84] ss:$8 sps:$4 sm:$0xff]   ;;  %v484_v19 = vld [vmem:[%s664_s1 + $0x80] ss:$8 sps:$4 sm:$0xff]   ;;  %v485_v20 = vld [vmem:[%s664_s1 + $0x94] ss:$8 sps:$4 sm:$0xff]  }
   0x8   :  { %254 = vmatprep.subr.bf16.mxu0 %v464_v4  ;;  %428 = vmatprep.subr.bf16.mxu1 %v464_v4  ;;  %v487_v21 = vld [vmem:[%s664_s1 + $0x90] ss:$8 sps:$4 sm:$0xff]   ;;  %v488_v22 = vld [vmem:[%s664_s1 + $0xa4] ss:$8 sps:$4 sm:$0xff]   ;;  %v490_v23 = vld [vmem:[%s664_s1 + $0xa0] ss:$8 sps:$4 sm:$0xff]  }
   0x9   :  { %282 = vmatprep.mubr.bf16.mxu0 %v508_v13  ;;  %v491_v24 = vld [vmem:[%s664_s1 + $0xb4] ss:$8 sps:$4 sm:$0xff]   ;;  %v493_v25 = vld [vmem:[%s664_s1 + $0xb0] ss:$8 sps:$4 sm:$0xff]   ;;  %v494_v26 = vld [vmem:[%s664_s1 + $0xc4] ss:$8 sps:$4 sm:$0xff]  }
   0xa   :  { %v496_v27 = vld [vmem:[%s664_s1 + $0xc0] ss:$8 sps:$4 sm:$0xff]   ;;  %v497_v28 = vld [vmem:[%s664_s1 + $0xd4] ss:$8 sps:$4 sm:$0xff]   ;;  %v499_v29 = vld [vmem:[%s664_s1 + $0xd0] ss:$8 sps:$4 sm:$0xff]  }
   0xb   :  { %255 = vmatpush1.bf16.msra.mxu0 %v466_v5  ;;  %444 = vmatpush1.bf16.msra.mxu1 %v466_v5  ;;  %v500_v30 = vld [vmem:[%s664_s1 + $0xe4] ss:$8 sps:$4 sm:$0xff]   ;;  %v502_v31 = vld [vmem:[%s664_s1 + $0xe0] ss:$8 sps:$4 sm:$0xff]   ;;  %v503_v32 = vld [vmem:[%s664_s1 + $0xf4] ss:$8 sps:$4 sm:$0xff]  }
   0xc   :  { %256 = vmatprep.subr.bf16.mxu0 %v467_v6  ;;  %429 = vmatprep.subr.bf16.mxu1 %v467_v6  ;;  %v505_v33 = vld [vmem:[%s664_s1 + $0xf0] ss:$8 sps:$4 sm:$0xff]   ;;  %v506_v34 = vld [vmem:[%s665_s0] ss:$8 sps:$4 sm:$0xff]  }
   0xd   :  { %v509_v35 = vld [vmem:[%s665_s0 + $0x10] ss:$8 sps:$4 sm:$0xff]   ;;  %v330_v36 = vld [vmem:[%s666_s2] sm:$0xff]  ;;  %v331_v38 = vld [vmem:[%s666_s2 + $0x8] sm:$0xff] }
   0xe   :  { %v332_v37 = vld [vmem:[%s666_s2 + $0x10] sm:$0xff]  ;;  %v333_v39 = vld [vmem:[%s666_s2 + $0x18] sm:$0xff]  ;;  %v334_v40 = vunpack.c.l.bf16 %v330_v36  ;;  %v335_v42 = vunpack.c.h.bf16 %v330_v36  ;;  %v336_v44 = vunpack.c.l.bf16 %v331_v38  ;;  %v337_v48 = vunpack.c.h.bf16 %v331_v38 }
   0xf   :  { %257 = vmatpush1.bf16.msra.mxu0 %v469_v7  ;;  %445 = vmatpush1.bf16.msra.mxu1 %v469_v7  ;;  %v338_v41 = vunpack.c.l.bf16 %v332_v37  ;;  %v339_v43 = vunpack.c.h.bf16 %v332_v37  ;;  %v340_v45 = vunpack.c.l.bf16 %v333_v39  ;;  %v341_v49 = vunpack.c.h.bf16 %v333_v39 }
  0x10   :  { %258 = vmatprep.subr.bf16.mxu0 %v470_v8  ;;  %430 = vmatprep.subr.bf16.mxu1 %v470_v8 }
  0x13   :  { %259 = vmatpush1.bf16.msra.mxu0 %v472_v9  ;;  %446 = vmatpush1.bf16.msra.mxu1 %v472_v9 }
  0x14   :  { %260 = vmatprep.subr.bf16.mxu0 %v473_v10  ;;  %431 = vmatprep.subr.bf16.mxu1 %v473_v10 }
  0x17   :  { %261 = vmatpush1.bf16.msra.mxu0 %v475_v11  ;;  %447 = vmatpush1.bf16.msra.mxu1 %v475_v11 }
  0x18   :  { %262 = vmatprep.subr.bf16.mxu0 %v476_v12  ;;  %432 = vmatprep.subr.bf16.mxu1 %v476_v12 }
  0x1b   :  { %263 = vmatpush1.bf16.msra.mxu0 %v478_v14  ;;  %448 = vmatpush1.bf16.msra.mxu1 %v478_v14 }
  0x1c   :  { %264 = vmatprep.subr.bf16.mxu0 %v479_v16  ;;  %433 = vmatprep.subr.bf16.mxu1 %v479_v16 }
  0x1f   :  { %265 = vmatpush1.bf16.msra.mxu0 %v481_v17  ;;  %449 = vmatpush1.bf16.msra.mxu1 %v481_v17 }
  0x20   :  { %266 = vmatprep.subr.bf16.mxu0 %v482_v18  ;;  %434 = vmatprep.subr.bf16.mxu1 %v482_v18 }
  0x23   :  { %267 = vmatpush1.bf16.msra.mxu0 %v484_v19  ;;  %450 = vmatpush1.bf16.msra.mxu1 %v484_v19 }
  0x24   :  { %268 = vmatprep.subr.bf16.mxu0 %v485_v20  ;;  %435 = vmatprep.subr.bf16.mxu1 %v485_v20 }
  0x27   :  { %269 = vmatpush1.bf16.msra.mxu0 %v487_v21  ;;  %451 = vmatpush1.bf16.msra.mxu1 %v487_v21 }
  0x28   :  { %270 = vmatprep.subr.bf16.mxu0 %v488_v22  ;;  %436 = vmatprep.subr.bf16.mxu1 %v488_v22 }
  0x2b   :  { %271 = vmatpush1.bf16.msra.mxu0 %v490_v23  ;;  %452 = vmatpush1.bf16.msra.mxu1 %v490_v23 }
  0x2c   :  { %272 = vmatprep.subr.bf16.mxu0 %v491_v24  ;;  %437 = vmatprep.subr.bf16.mxu1 %v491_v24 }
  0x2f   :  { %273 = vmatpush1.bf16.msra.mxu0 %v493_v25  ;;  %453 = vmatpush1.bf16.msra.mxu1 %v493_v25 }
  0x30   :  { %274 = vmatprep.subr.bf16.mxu0 %v494_v26  ;;  %438 = vmatprep.subr.bf16.mxu1 %v494_v26 }
  0x33   :  { %275 = vmatpush1.bf16.msra.mxu0 %v496_v27  ;;  %454 = vmatpush1.bf16.msra.mxu1 %v496_v27 }
  0x34   :  { %276 = vmatprep.subr.bf16.mxu0 %v497_v28  ;;  %439 = vmatprep.subr.bf16.mxu1 %v497_v28 }
  0x37   :  { %277 = vmatpush1.bf16.msra.mxu0 %v499_v29  ;;  %455 = vmatpush1.bf16.msra.mxu1 %v499_v29 }
  0x38   :  { %278 = vmatprep.subr.bf16.mxu0 %v500_v30  ;;  %440 = vmatprep.subr.bf16.mxu1 %v500_v30 }
  0x3b   :  { %279 = vmatpush1.bf16.msra.mxu0 %v502_v31  ;;  %456 = vmatpush1.bf16.msra.mxu1 %v502_v31 }
  0x3c   :  { %280 = vmatprep.subr.bf16.mxu0 %v503_v32  ;;  %441 = vmatprep.subr.bf16.mxu1 %v503_v32 }
  0x3f   :  { %281 = vmatpush1.bf16.msra.mxu0 %v505_v33  ;;  %457 = vmatpush1.bf16.msra.mxu1 %v505_v33 }
  0x42   :  { %283 = vmatmul.mubr.bf16.vlgmr.msra.gmra.mrb[0].mxu0 %v506_v34  ;;  %293 = vmatmul.mubr.bf16.vlgmr.msra.gmra.mrb[0].mxu1 %v509_v35 }
 0x115   :  { %v284_v46 = vpop.f32.mrb[0].mxu0  ;;  %v294_v47 = vpop.f32.mrb[0].mxu1 }
 0x116   :  { %v342_v50 = vadd.f32 %v334_v40, %v284_v46  ;;  %v346_v51 = vadd.f32 %v338_v41, %v294_v47  ;;  %v286_v52 = vpop.f32.mrb[1].mxu0  ;;  %v296_v53 = vpop.f32.mrb[1].mxu1 }
 0x117   :  { %v343_v54 = vadd.f32 %v335_v42, %v286_v52  ;;  %v347_v55 = vadd.f32 %v339_v43, %v296_v53  ;;  %v288_v56 = vpop.f32.mrb[2].mxu0  ;;  %v298_v57 = vpop.f32.mrb[2].mxu1 }
 0x118   :  { %v344_v58 = vadd.f32 %v336_v44, %v288_v56  ;;  %v348_v59 = vadd.f32 %v340_v45, %v298_v57  ;;  %v290_v60 = vpop.f32.mrb[3].mxu0  ;;  %v300_v61 = vpop.f32.mrb[3].mxu1 }
 0x119   :  { %v422_v62 = vpack.c.bf16 %v343_v54, %v342_v50  ;;  %v424_v63 = vpack.c.bf16 %v347_v55, %v346_v51  ;;  %v345_v0 = vadd.f32 %v337_v48, %v290_v60  ;;  %v349_v1 = vadd.f32 %v341_v49, %v300_v61 }
 0x11b   :  { %374 = vst [vmem:[%s667_s3] sm:$0xff] %v422_v62  ;;  %376 = vst [vmem:[%s667_s3 + $0x10] sm:$0xff] %v424_v63  ;;  %v423_v2 = vpack.c.bf16 %v345_v0, %v344_v58  ;;  %v425_v3 = vpack.c.bf16 %v349_v1, %v348_v59 }
 0x11d   :  { %375 = vst [vmem:[%s667_s3 + $0x8] sm:$0xff] %v423_v2  ;;  %377 = vst [vmem:[%s667_s3 + $0x18] sm:$0xff] %v425_v3 }

// kernel: gpt_forward.16
= control target key start
LH: loop header
LB: loop body
LE: loop exit
PB: predicated region body
PF: predicated region fallthrough
CT: control target
= control target key end

     0   :  { %7 = vsyncpa [#allocation3], 0  ;;  %s1475_s0 = inlined_call_operand.vmem [shape: bf16[32,256], index: 0, kind: input, shape index: {}]   ;;  %s1476_s1 = inlined_call_operand.hbm [shape: bf16[256,768], index: 1, kind: input, shape index: {}]   ;;  %s1477_s2 = inlined_call_operand.vmem [shape: bf16[32,768], index: 2, kind: output, shape index: {}]  }
   0x1   :  { %9 = vsyncpa [#allocation3 + $0x1], 0  ;;  %s1219_s9 = smov 0   ;;  %s1221_s10 = smov 0  }
   0x2   :  { %s1223_s11 = smov 0   ;;  %s1225_s12 = smov 0  }
   0x3   :  { %s1227_s13 = smov 0   ;;  %s1229_s14 = smov 0  }
   0x4 LB: > { %s873_s15 = sadd.s32 4294967295, %s1198_s14   ;;  %s24_s16 = sadd.s32 1, %s1194_s13  ;;  %s1198_s14 = sphi %s1229_s14, %s15_s14   ;;  %s1194_s13 = sphi %s1227_s13, %s1488_s13   ;;  %s1190_s12 = sphi %s1225_s12, %s1487_s12   ;;  %s1186_s11 = sphi %s1223_s11, %s1486_s11   ;;  %s1182_s10 = sphi %s1221_s10, %s1485_s10   ;;  %s1178_s9 = sphi %s1219_s9, %s1484_s9  }
   0x5   : > { %p25_p0 = scmp.ge.s32.totalorder %s24_s16, 2  ;;  %s60_s17 = sadd.s32 1, %s1186_s11 }
   0x6   : > { %p67_p1 = scmp.ne.s32.totalorder %s1186_s11, %s1182_s10  ;;  %p68_p2 = scmp.eq.s32.totalorder %s1198_s14, 0 }
   0x7   : > { %s1490_s16 = smov (%p25_p0, %s24_s16), 0  ;;  %p73_p4 = scmp.ne.s32.totalorder %s1182_s10, %s1178_s9 }
   0x8   : > { %p1255_p3 = por %p68_p2, %p67_p1  ;;  %s57_s19 = ssub.s32 %s1194_s13, %s1490_s16 }
   0x9   : > { %p74_p5 = scmp.eq.s32.totalorder %s873_s15, 0  ;;  %p58_p6 = scmp.eq.s32.totalorder %s57_s19, 0 }
   0xa   : > { %p99_p7 = scmp.eq.s32.totalorder %s873_s15, 1  ;;  %p994_p10 = scmp.lt.s32.totalorder %s1198_s14, 2 }
   0xb   : > { %p1262_p8 = por %p74_p5, %p73_p4  ;;  %s135_s23 = sand.u32 1, %s1186_s11  }
   0xc   : > { %s1267_s21 = scalar_select %p58_p6, %s1186_s11, %s60_s17  }
   0xd   : > { %p1269_p9 = por %p99_p7, %p67_p1  ;;  %s947_s24 = smul.u32 192, %s1194_s13 }
   0xe   : > { %s985_s25 = smul.u32 384, %s135_s23  ;;  %p1283_p11 = pnand %p994_p10, %p1255_p3 }
   0xf   : > { %s1480_s22 = scalar_select %p1269_p9, 1, 0 }
  0x10   : > { %s1279_s28 = scalar_lea.hbm %s1476_s1, %s947_s24  ;;  %s139_s30 = scalar_lea.vmem [#allocation2], %s985_s25 }
  0x11   : > { %s146_s3 = sshll.u32 %s139_s30, 4  ;;  %s1290_s4 = scalar_lea.sflag [#allocation3], %s135_s23  ;;  %s1287_s3 = int_to_ptr.vmem [resolvable:$true] %s146_s3 }
  0x12   : > { %s1118_s5 = scalar_lea.hbm %s1279_s28, 6144  ;;  %p1120_p0 = pneg %p1283_p11 }
  0x13   : > { %p1119_p13 = scmp.ne.s32.totalorder %s1279_s28, %s1118_s5  ;;  %s1123_s8 = scalar_lea.hbm %s1476_s1, 12288 }
  0x14   : > { %p1124_p3 = scmp.lt.u32.totalorder %s1279_s28, %s1476_s1  ;;  %p1125_p4 = scmp.lt.u32.totalorder %s1123_s8, %s1118_s5 }
  0x15   : > { %p1121_p1 = pnand %p1120_p0, %p1119_p13  ;;  %p1127_p6 = scmp.lt.u32.totalorder %s1118_s5, %s1279_s28 }
  0x16   : > { %p1126_p5 = por %p1125_p4, %p1124_p3 }
  0x17   : > { %p1122_p2 = pneg %p1121_p1 }
  0x18   : > { %p1128_p7 = por %p1127_p6, %p1126_p5 }
  0x1a   : > { %p1129_p10 = pnand %p1128_p7, %p1122_p2 }
  0x1c   : > { %1132 = shalt.err (!%p1129_p10)
}
  0x1d   : > { %s1133_s17 = scalar_lea.vmem %s1287_s3, 6144  ;;  %s1200_s18 = smov [#allocation2]  }
  0x1e   : > { %p1134_p13 = scmp.ne.s32.totalorder %s1287_s3, %s1133_s17  ;;  %s1138_s19 = sshll.u32 %s1200_s18, 4  ;;  %s1139_s19 = int_to_ptr.vmem [resolvable:$false] %s1138_s19 }
  0x1f   : > { %s1140_s23 = scalar_lea.vmem %s1139_s19, 12288  ;;  %p1141_p9 = scmp.lt.s32.totalorder %s1287_s3, %s1139_s19 }
  0x20   : > { %p1136_p1 = pnand %p1134_p13, %p1120_p0  ;;  %p1142_p3 = scmp.lt.s32.totalorder %s1140_s23, %s1133_s17 }
  0x22   : > { %p1137_p12 = pneg %p1136_p1  ;;  %p1143_p4 = por %p1142_p3, %p1141_p9 }
  0x24   : > { %p1144_p5 = pnand %p1143_p4, %p1137_p12 }
  0x26   : > { %1147 = shalt.err (!%p1144_p5)
}
  0x27   : > { %s1201_s24 = smov 384   ;;  %s1202_s25 = smov 192  }
  0x28   : > { %s1203_s26 = smov 12   ;;  %p154_p0 = scmp.lt.s32.totalorder %s1198_s14, 3 }
  0x29   : > { %993 = dma.hbm_to_vmem [thread:$0]  (!%p1283_p11), %s1279_s28, 6144, %s1287_s3, %s1290_s4, %s1201_s24, %s1202_s25, %s1203_s26  }
  0x2a   : > { %p1482_p2 = scmp.ge.s32.totalorder %s1198_s14, 1 }
  0x2c   : > { %p155_p6 = pnand %p1482_p2, %p154_p0 }
  0x2d   : > { %s1322_s27 = sand.u32 (!%p155_p6), 1, %s1182_s10  }
  0x2e   : > { %158 = sbr.rel (%p155_p6) target bundleno = 463 (0x1cf), region = 28  ;;  %s161_s5 = scalar_lea.sflag (!%p155_p6), [#allocation3], %s1322_s27 }
  0x2f   : > { %s986_s30 = smul.u32 (!%p155_p6), 384, %s1322_s27 }
  0x31   : > { %s1326_s6 = scalar_lea.vmem (!%p155_p6), [#allocation2], %s986_s30 }
  0x35   : > { %1173 = dma.done.wait (%p1262_p8), %s161_s5, 6144  }
  0x36   : > { %1175 = vsyncadd (%p1262_p8), %s161_s5, 4294961152  ;;  %v201_v0 = vld [vmem:[%s1475_s0] sm:$0xff]  ;;  %v203_v1 = vld [vmem:[%s1475_s0 + $0x10] sm:$0xff]  ;;  %s987_s15 = smul.u32 48, %s1322_s27  ;;  %p1483_p8 = scmp.ne.s32.totalorder %s1480_s22, 0 }
  0x37   : > { %v202_v2 = vld [vmem:[%s1475_s0 + $0x8] sm:$0xff]  ;;  %v1341_v3 = vunpack.c.l.bf16 %v201_v0  ;;  %v1343_v4 = vunpack.c.h.bf16 %v201_v0  ;;  %v1345_v5 = vunpack.c.l.bf16 %v203_v1  ;;  %v1347_v6 = vunpack.c.h.bf16 %v203_v1  ;;  %v204_v7 = vld [vmem:[%s1475_s0 + $0x18] sm:$0xff]  ;;  %v1046_v12 = vld [vmem:[%s1326_s6 + $0x4] ss:$12 sps:$4 sm:$0xff]   ;;  %s956_s18 = smul.u32 (%p1483_p8), 12, %s1190_s12 }
  0x38   : > { %v1352_v8 = vunpack.c.l.bf16 %v202_v2  ;;  %v1354_v9 = vunpack.c.h.bf16 %v202_v2  ;;  %v1356_v10 = vunpack.c.l.bf16 %v204_v7  ;;  %v1358_v11 = vunpack.c.h.bf16 %v204_v7  ;;  %v1048_v13 = vld [vmem:[%s1326_s6] ss:$12 sps:$4 sm:$0xff]   ;;  %v1049_v18 = vld [vmem:[%s1326_s6 + $0x1c] ss:$12 sps:$4 sm:$0xff]   ;;  %578 = vmatprep.subr.bf16.mxu0 %v1046_v12  ;;  %v1051_v25 = vld [vmem:[%s1326_s6 + $0x18] ss:$12 sps:$4 sm:$0xff]  }
  0x39   : > { %v213_v14 = vmul.f32 %v1341_v3, %v1341_v3  ;;  %v214_v15 = vmul.f32 %v1343_v4, %v1343_v4  ;;  %v217_v16 = vmul.f32 %v1345_v5, %v1345_v5  ;;  %v218_v17 = vmul.f32 %v1347_v6, %v1347_v6  ;;  %579 = vmatpush1.bf16.msra.mxu0 %v1048_v13  ;;  %v1052_v26 = vld [vmem:[%s1326_s6 + $0x34] ss:$12 sps:$4 sm:$0xff]   ;;  %v1054_v29 = vld [vmem:[%s1326_s6 + $0x30] ss:$12 sps:$4 sm:$0xff]   ;;  %v1055_v30 = vld [vmem:[%s1326_s6 + $0x4c] ss:$12 sps:$4 sm:$0xff]   ;;  %s740_s22 = scalar_lea.vmem (%p1483_p8), %s1477_s2, %s956_s18 }
  0x3a   : > { %v215_v19 = vmul.f32 %v1352_v8, %v1352_v8  ;;  %v216_v20 = vmul.f32 %v1354_v9, %v1354_v9  ;;  %v219_v21 = vmul.f32 %v1356_v10, %v1356_v10  ;;  %v220_v22 = vmul.f32 %v1358_v11, %v1358_v11  ;;  %580 = vmatprep.subr.bf16.mxu0 %v1049_v18  ;;  %v1057_v31 = vld [vmem:[%s1326_s6 + $0x48] ss:$12 sps:$4 sm:$0xff]   ;;  %v1058_v33 = vld [vmem:[%s1326_s6 + $0x64] ss:$12 sps:$4 sm:$0xff]   ;;  %v1060_v35 = vld [vmem:[%s1326_s6 + $0x60] ss:$12 sps:$4 sm:$0xff]  }
  0x3b   : > { %v221_v23 = vadd.f32 %v214_v15, %v213_v14  ;;  %v227_v24 = vadd.f32 %v218_v17, %v217_v16  ;;  %v1072_v32 = vld [vmem:[%s1326_s6 + $0xc8] ss:$12 sps:$4 sm:$0xff]   ;;  %v1077_v37 = vld [vmem:[%s1326_s6 + $0xe0] ss:$12 sps:$4 sm:$0xff]   ;;  %v1063_v39 = vld [vmem:[%s1326_s6 + $0x78] ss:$12 sps:$4 sm:$0xff]  }
  0x3c   : > { %v224_v27 = vadd.f32 %v216_v20, %v215_v19  ;;  %v230_v28 = vadd.f32 %v220_v22, %v219_v21  ;;  %957 = vmatprep.subr.bf16.mxu1 %v1072_v32  ;;  %v1074_v34 = vld [vmem:[%s1326_s6 + $0x8] ss:$12 sps:$4 sm:$0xff]   ;;  %v1079_v38 = vld [vmem:[%s1326_s6 + $0x20] ss:$12 sps:$4 sm:$0xff]   ;;  %v1082_v41 = vld [vmem:[%s1326_s6 + $0xf8] ss:$12 sps:$4 sm:$0xff]  }
  0x3d   : > { %222 = vadd.xlane.f32.xlu0 %v221_v23  ;;  %228 = vadd.xlane.f32.xlu1 %v227_v24  ;;  %v1061_v36 = vld [vmem:[%s1326_s6 + $0x7c] ss:$12 sps:$4 sm:$0xff]   ;;  %v1064_v40 = vld [vmem:[%s1326_s6 + $0x94] ss:$12 sps:$4 sm:$0xff]   ;;  %v1084_v42 = vld [vmem:[%s1326_s6 + $0x38] ss:$12 sps:$4 sm:$0xff]  }
  0x3e   : > { %581 = vmatpush1.bf16.msra.mxu0 %v1051_v25  ;;  %958 = vmatpush3.bf16.msra.mxu1 %v1074_v34  ;;  %v1066_v43 = vld [vmem:[%s1326_s6 + $0x90] ss:$12 sps:$4 sm:$0xff]   ;;  %v1067_v45 = vld [vmem:[%s1326_s6 + $0xac] ss:$12 sps:$4 sm:$0xff]   ;;  %v1092_v47 = vld [vmem:[%s1326_s6 + $0x128] ss:$12 sps:$4 sm:$0xff]  }
  0x3f   : > { %582 = vmatprep.subr.bf16.mxu0 %v1052_v26  ;;  %959 = vmatprep.subr.bf16.mxu1 %v1077_v37  ;;  %v1087_v44 = vld [vmem:[%s1326_s6 + $0x110] ss:$12 sps:$4 sm:$0xff]   ;;  %v1069_v48 = vld [vmem:[%s1326_s6 + $0xa8] ss:$12 sps:$4 sm:$0xff]   ;;  %v1097_v51 = vld [vmem:[%s1326_s6 + $0x140] ss:$12 sps:$4 sm:$0xff]  }
  0x40   : > { %v1089_v46 = vld [vmem:[%s1326_s6 + $0x50] ss:$12 sps:$4 sm:$0xff]   ;;  %v1094_v49 = vld [vmem:[%s1326_s6 + $0x68] ss:$12 sps:$4 sm:$0xff]   ;;  %v1073_v52 = vld [vmem:[%s1326_s6 + $0xc0] ss:$12 sps:$4 sm:$0xff]  }
  0x41   : > { %225 = vadd.xlane.f32.xlu0 %v224_v27  ;;  %231 = vadd.xlane.f32.xlu1 %v230_v28  ;;  %v1070_v50 = vld [vmem:[%s1326_s6 + $0xc4] ss:$12 sps:$4 sm:$0xff]   ;;  %v1075_v53 = vld [vmem:[%s1326_s6 + $0xdc] ss:$12 sps:$4 sm:$0xff]   ;;  %v1099_v54 = vld [vmem:[%s1326_s6 + $0x80] ss:$12 sps:$4 sm:$0xff]  }
  0x42   : > { %583 = vmatpush1.bf16.msra.mxu0 %v1054_v29  ;;  %960 = vmatpush3.bf16.msra.mxu1 %v1079_v38  ;;  %v1102_v55 = vld [vmem:[%s1326_s6 + $0x158] ss:$12 sps:$4 sm:$0xff]   ;;  %v1080_v58 = vld [vmem:[%s1326_s6 + $0xf4] ss:$12 sps:$4 sm:$0xff]   ;;  %v1107_v59 = vld [vmem:[%s1326_s6 + $0x170] ss:$12 sps:$4 sm:$0xff]  }
  0x43   : > { %584 = vmatprep.subr.bf16.mxu0 %v1055_v30  ;;  %961 = vmatprep.subr.bf16.mxu1 %v1082_v41  ;;  %v1078_v56 = vld [vmem:[%s1326_s6 + $0xd8] ss:$12 sps:$4 sm:$0xff]   ;;  %v1083_v60 = vld [vmem:[%s1326_s6 + $0xf0] ss:$12 sps:$4 sm:$0xff]   ;;  %v1088_v63 = vld [vmem:[%s1326_s6 + $0x108] ss:$12 sps:$4 sm:$0xff]  }
  0x44   : > { %v1104_v57 = vld [vmem:[%s1326_s6 + $0x98] ss:$12 sps:$4 sm:$0xff]   ;;  %v1109_v61 = vld [vmem:[%s1326_s6 + $0xb0] ss:$12 sps:$4 sm:$0xff]   ;;  %v1093_v1 = vld [vmem:[%s1326_s6 + $0x120] ss:$12 sps:$4 sm:$0xff]  }
  0x45   : > { %v1085_v62 = vld [vmem:[%s1326_s6 + $0x10c] ss:$12 sps:$4 sm:$0xff]   ;;  %v1090_v0 = vld [vmem:[%s1326_s6 + $0x124] ss:$12 sps:$4 sm:$0xff]   ;;  %v1095_v2 = vld [vmem:[%s1326_s6 + $0x13c] ss:$12 sps:$4 sm:$0xff]  }
  0x46   : > { %585 = vmatpush1.bf16.msra.mxu0 %v1057_v31  ;;  %962 = vmatpush3.bf16.msra.mxu1 %v1084_v42  ;;  %v1098_v7 = vld [vmem:[%s1326_s6 + $0x138] ss:$12 sps:$4 sm:$0xff]   ;;  %v1100_v12 = vld [vmem:[%s1326_s6 + $0x154] ss:$12 sps:$4 sm:$0xff]   ;;  %v1103_v13 = vld [vmem:[%s1326_s6 + $0x150] ss:$12 sps:$4 sm:$0xff]  }
  0x47   : > { %586 = vmatprep.subr.bf16.mxu0 %v1058_v33  ;;  %963 = vmatprep.subr.bf16.mxu1 %v1087_v44  ;;  %v1105_v14 = vld [vmem:[%s1326_s6 + $0x16c] ss:$12 sps:$4 sm:$0xff]   ;;  %v1108_v15 = vld [vmem:[%s1326_s6 + $0x168] ss:$12 sps:$4 sm:$0xff]   ;;  %s1433_s17 = scalar_lea.vmem [#allocation4], %s987_s15 }
  0x4a   : > { %587 = vmatpush1.bf16.msra.mxu0 %v1060_v35  ;;  %964 = vmatpush3.bf16.msra.mxu1 %v1089_v46 }
  0x4b   : > { %588 = vmatprep.subr.bf16.mxu0 %v1061_v36  ;;  %965 = vmatprep.subr.bf16.mxu1 %v1092_v47 }
  0x4e   : > { %589 = vmatpush1.bf16.msra.mxu0 %v1063_v39  ;;  %966 = vmatpush3.bf16.msra.mxu1 %v1094_v49 }
  0x4f   : > { %590 = vmatprep.subr.bf16.mxu0 %v1064_v40  ;;  %967 = vmatprep.subr.bf16.mxu1 %v1097_v51 }
  0x52   : > { %591 = vmatpush1.bf16.msra.mxu0 %v1066_v43  ;;  %968 = vmatpush3.bf16.msra.mxu1 %v1099_v54 }
  0x53   : > { %592 = vmatprep.subr.bf16.mxu0 %v1067_v45  ;;  %969 = vmatprep.subr.bf16.mxu1 %v1102_v55 }
  0x56   : > { %593 = vmatpush1.bf16.msra.mxu0 %v1069_v48  ;;  %970 = vmatpush3.bf16.msra.mxu1 %v1104_v57 }
  0x57   : > { %594 = vmatprep.subr.bf16.mxu0 %v1070_v50  ;;  %971 = vmatprep.subr.bf16.mxu1 %v1107_v59 }
  0x5a   : > { %595 = vmatpush1.bf16.msra.mxu0 %v1073_v52  ;;  %972 = vmatpush3.bf16.msra.mxu1 %v1109_v61 }
  0x5b   : > { %596 = vmatprep.subr.bf16.mxu0 %v1075_v53 }
  0x5e   : > { %597 = vmatpush1.bf16.msra.mxu0 %v1078_v56 }
  0x5f   : > { %598 = vmatprep.subr.bf16.mxu0 %v1080_v58 }
  0x62   : > { %599 = vmatpush1.bf16.msra.mxu0 %v1083_v60 }
  0x63   : > { %600 = vmatprep.subr.bf16.mxu0 %v1085_v62 }
  0x66   : > { %601 = vmatpush1.bf16.msra.mxu0 %v1088_v63 }
  0x67   : > { %602 = vmatprep.subr.bf16.mxu0 %v1090_v0 }
  0x6a   : > { %603 = vmatpush1.bf16.msra.mxu0 %v1093_v1 }
  0x6b   : > { %604 = vmatprep.subr.bf16.mxu0 %v1095_v2 }
  0x6e   : > { %605 = vmatpush1.bf16.msra.mxu0 %v1098_v7 }
  0x6f   : > { %606 = vmatprep.subr.bf16.mxu0 %v1100_v12 }
  0x72   : > { %607 = vmatpush1.bf16.msra.mxu0 %v1103_v13 }
  0x73   : > { %608 = vmatprep.subr.bf16.mxu0 %v1105_v14 }
  0x76   : > { %609 = vmatpush1.bf16.msra.mxu0 %v1108_v15 }
  0xca   : > { %v223_v16 = vpop.xlane.xlu0 %222  ;;  %v229_v17 = vpop.xlane.xlu1 %228 }
  0xcb   : > { %v234_v18 = vmul.f32 0.00390625, %v223_v16  ;;  %v236_v19 = vmul.f32 0.00390625, %v229_v17 }
  0xcd   : > { %v238_v20 = vadd.f32 1.1920929e-07, %v234_v18  ;;  %v240_v21 = vadd.f32 1.1920929e-07, %v236_v19 }
  0xce   : > { %v226_v22 = vpop.xlane.xlu0 %225  ;;  %v232_v23 = vpop.xlane.xlu1 %231 }
  0xcf   : > { %v235_v24 = vmul.f32 0.00390625, %v226_v22  ;;  %v237_v25 = vmul.f32 0.00390625, %v232_v23  ;;  %1110 = vrsqrt.f32 %v240_v21 }
  0xd0   : > { %1112 = vrsqrt.f32 %v238_v20 }
  0xd1   : > { %v239_v26 = vadd.f32 1.1920929e-07, %v235_v24  ;;  %v241_v27 = vadd.f32 1.1920929e-07, %v237_v25 }
  0xd3   : > { %1114 = vrsqrt.f32 %v239_v26 }
  0xd4   : > { %1116 = vrsqrt.f32 %v241_v27 }
  0xd9   : > { %v1111_v28 = vpop.eup %1110 }
  0xda   : > { %v1113_v29 = vpop.eup %1112  ;;  %v251_v31 = vmul.f32 %v1111_v28, %v1347_v6 }
  0xdb   : > { %v247_v33 = vmul.f32 %v1113_v29, %v1343_v4  ;;  %v246_v35 = vmul.f32 %v1113_v29, %v1341_v3  ;;  %v250_v4 = vmul.f32 %v1111_v28, %v1345_v5 }
  0xdd   : > { %v1115_v30 = vpop.eup %1114 }
  0xde   : > { %v1117_v32 = vpop.eup %1116  ;;  %v249_v34 = vmul.f32 %v1115_v30, %v1354_v9  ;;  %v248_v36 = vmul.f32 %v1115_v30, %v1352_v8 }
  0xdf   : > { %v253_v37 = vmul.f32 %v1117_v32, %v1358_v11  ;;  %v252_v6 = vmul.f32 %v1117_v32, %v1356_v10 }
  0xe0   : > { %v255_v38 = vpack.c.bf16 %v249_v34, %v247_v33  ;;  %v254_v39 = vpack.c.bf16 %v248_v36, %v246_v35 }
  0xe1   : > { %v257_v40 = vpack.c.bf16 %v253_v37, %v251_v31  ;;  %v256_v9 = vpack.c.bf16 %v252_v6, %v250_v4 }
  0xe2   : > { %610 = vmatprep.mubr.bf16.mxu0 %v255_v38  ;;  %663 = vmatprep.mubr.bf16.mxu1 %v255_v38 }
  0xe3   : > { %611 = vmatmul.mubr.bf16.vlgmr.msra.gmra.mrb[0].mxu0 %v254_v39  ;;  %664 = vmatmul.mubr.bf16.vlgmr.msra.gmra.mrb[0].mxu1 %v254_v39 }
  0xe4   : > { %620 = vmatprep.mubr.bf16.mxu0 %v257_v40  ;;  %671 = vmatprep.mubr.bf16.mxu1 %v257_v40 }
  0xeb   : > { %621 = vmatmul.mubr.bf16.gmra.mrb[4].mxu0 %v256_v9  ;;  %672 = vmatmul.mubr.bf16.gmra.mrb[4].mxu1 %v256_v9 }
 0x1b6   : > { %v612_v3 = vpop.f32.mrb[0].mxu0  ;;  %v973_v8 = vpop.f32.mrb[0].mxu1 }
 0x1b7   : > { %v614_v11 = vpop.f32.mrb[1].mxu0  ;;  %v974_v41 = vpop.f32.mrb[1].mxu1 }
 0x1b8   : > { %v948_v42 = vpack.c.bf16 %v614_v11, %v612_v3  ;;  %v975_v43 = vadd.f32 %v974_v41, %v973_v8  ;;  %v616_v44 = vpop.f32.mrb[2].mxu0  ;;  %v976_v45 = vpop.f32.mrb[2].mxu1 }
 0x1b9   : > { %v618_v46 = vpop.f32.mrb[3].mxu0  ;;  %v977_v47 = vpop.f32.mrb[3].mxu1 }
 0x1ba   : > { %720 = vst [vmem:[%s1433_s17] sm:$0xff] %v948_v42  ;;  %v949_v5 = vpack.c.bf16 %v975_v43, %v975_v43  ;;  %v950_v10 = vpack.c.bf16 %v618_v46, %v616_v44  ;;  %v978_v48 = vadd.f32 %v977_v47, %v976_v45 }
 0x1bc   : > { %721 = vst [vmem:[%s1433_s17 + $0x8] sm:$0xf] %v949_v5  ;;  %722 = vst [vmem:[%s1433_s17 + $0xc] sm:$0xff] %v950_v10  ;;  %v951_v49 = vpack.c.bf16 %v978_v48, %v978_v48 }
 0x1be   : > { %723 = vst [vmem:[%s1433_s17 + $0x14] sm:$0xf] %v951_v49  ;;  %v622_v50 = vpop.f32.mrb[4].mxu0  ;;  %v979_v51 = vpop.f32.mrb[4].mxu1 }
 0x1bf   : > { %v624_v52 = vpop.f32.mrb[5].mxu0  ;;  %v980_v53 = vpop.f32.mrb[5].mxu1 }
 0x1c0   : > { %v952_v54 = vpack.c.bf16 %v624_v52, %v622_v50  ;;  %v981_v55 = vadd.f32 %v980_v53, %v979_v51  ;;  %v626_v56 = vpop.f32.mrb[6].mxu0  ;;  %v982_v57 = vpop.f32.mrb[6].mxu1  ;;  %734 = sbr.rel (!%p1483_p8) target bundleno = 463 (0x1cf), region = 36 }
 0x1c1   : > { %v628_v58 = vpop.f32.mrb[7].mxu0  ;;  %v983_v59 = vpop.f32.mrb[7].mxu1  ;;  %v755_v0 = vld [vmem:[%s1433_s17] sm:$0xff] (%p1483_p8) }
 0x1c2   : > { %724 = vst [vmem:[%s1433_s17 + $0x18] sm:$0xff] %v952_v54  ;;  %v953_v60 = vpack.c.bf16 %v981_v55, %v981_v55  ;;  %v954_v61 = vpack.c.bf16 %v628_v58, %v626_v56  ;;  %v984_v62 = vadd.f32 %v983_v59, %v982_v57  ;;  %756 = vst [vmem:[%s740_s22] sm:$0xff] (%p1483_p8), %v755_v0 }
 0x1c3   : > { %v757_v1 = vld [vmem:[%s1433_s17 + $0xc] sm:$0xff] (%p1483_p8)  ;;  %v937_v12 = vld [vmem:[%s1433_s17 + $0x8] sm:$0xf] (%p1483_p8) }
 0x1c4   : > { %725 = vst [vmem:[%s1433_s17 + $0x20] sm:$0xf] %v953_v60  ;;  %726 = vst [vmem:[%s1433_s17 + $0x24] sm:$0xff] %v954_v61  ;;  %v955_v63 = vpack.c.bf16 %v984_v62, %v984_v62 }
 0x1c5   : > { %v939_v13 = vld [vmem:[%s1433_s17 + $0x14] sm:$0xf] (%p1483_p8)  ;;  %758 = vst [vmem:[%s740_s22 + $0x18] sm:$0xff] (%p1483_p8), %v757_v1  ;;  %938 = vst [vmem:[%s740_s22 + $0x8] sm:$0xf] (%p1483_p8), %v937_v12 }
 0x1c6   : > { %727 = vst [vmem:[%s1433_s17 + $0x2c] sm:$0xf] %v955_v63  ;;  %940 = vst [vmem:[%s740_s22 + $0x20] sm:$0xf] (%p1483_p8), %v939_v13 }
 0x1c9   : > { %v759_v2 = vld [vmem:[%s1433_s17 + $0x18] sm:$0xff] }
 0x1ca   : > { %760 = vst [vmem:[%s740_s22 + $0x30] sm:$0xff] %v759_v2 }
 0x1cb   : > { %v761_v7 = vld [vmem:[%s1433_s17 + $0x24] sm:$0xff]  ;;  %v941_v14 = vld [vmem:[%s1433_s17 + $0x20] sm:$0xf] }
 0x1cc   : > { %762 = vst [vmem:[%s740_s22 + $0x48] sm:$0xff] %v761_v7  ;;  %942 = vst [vmem:[%s740_s22 + $0x38] sm:$0xf] %v941_v14 }
 0x1cd   : > { %v943_v15 = vld [vmem:[%s1433_s17 + $0x2c] sm:$0xf] }
 0x1ce   : > { %944 = vst [vmem:[%s740_s22 + $0x50] sm:$0xf] %v943_v15 }
 0x1cf PF: > { %s15_s14 = sadd.s32 1, %s1198_s14   ;;  %s1484_s9 = smov %s1182_s10 }
 0x1d0   : > { %p12_p9 = scmp.ge.s32.totalorder %s15_s14, 4   ;;  %s1485_s10 = smov %s1186_s11 }
 0x1d1   : > { %s1486_s11 = smov %s1267_s21  ;;  %s1487_s12 = smov %s1194_s13 }
 0x1d2   : > { %s1488_s13 = smov %s1490_s16  ;;  %14 = sbr.rel (!%p12_p9) target bundleno = 4 (0x4), region = 103 }
 0x1d9   :  { %793 = vsyncpa [#allocation3], 1 }
 0x1da   :  { %795 = vsyncpa [#allocation3 + $0x1], 1 }

// kernel: gpt_forward.19
= control target key start
LH: loop header
LB: loop body
LE: loop exit
PB: predicated region body
PF: predicated region fallthrough
CT: control target
= control target key end

     0   :  { %s1385_s9 = smov 0   ;;  %s1387_s10 = smov 0   ;;  %s1729_s0 = inlined_call_operand.vmem [shape: bf16[32,256], index: 0, kind: input, shape index: {}]   ;;  %s1730_s1 = inlined_call_operand.vmem [shape: bf16[256,1024], index: 1, kind: input, shape index: {}]   ;;  %s1731_s2 = inlined_call_operand.vmem [shape: bf16[32,1024], index: 2, kind: output, shape index: {}]  }
   0x1   :  { %s1389_s11 = smov 0   ;;  %s1391_s12 = smov 0  }
   0x2   :  { %s1393_s13 = smov 0  }
   0x3 LB: > { %s21_s14 = sadd.s32 1, %s1364_s12  ;;  %s1088_s15 = sadd.s32 4294967295, %s1368_s13   ;;  %s1368_s13 = sphi %s1393_s13, %s12_s13   ;;  %s1364_s12 = sphi %s1391_s12, %s1736_s12   ;;  %s1360_s11 = sphi %s1389_s11, %s1735_s11   ;;  %s1356_s10 = sphi %s1387_s10, %s1734_s10   ;;  %s1352_s9 = sphi %s1385_s9, %s1733_s9  }
   0x4   : > { %p22_p0 = scmp.ge.s32.totalorder %s21_s14, 2  ;;  %p64_p1 = scmp.ne.s32.totalorder %s1356_s10, %s1352_s9 }
   0x5   : > { %p65_p2 = scmp.eq.s32.totalorder %s1368_s13, 0  ;;  %p96_p4 = scmp.eq.s32.totalorder %s1088_s15, 1 }
   0x6   : > { %s1738_s14 = smov (%p22_p0, %s21_s14), 0  ;;  %s57_s17 = sadd.s32 1, %s1356_s10 }
   0x7   : > { %p66_p3 = por %p65_p2, %p64_p1  ;;  %s54_s16 = ssub.s32 %s1364_s12, %s1738_s14 }
   0x8   : > { %p55_p5 = scmp.eq.s32.totalorder %s54_s16, 0  ;;  %p1420_p6 = por %p96_p4, %p64_p1 }
   0x9   : > { %p1092_p7 = scmp.ge.s32.totalorder %s1368_s13, 2 }
   0xa   : > { %s1425_s19 = scalar_select %p55_p5, %s1356_s10, %s57_s17  }
   0xb   : > { %128 = sbr.rel (%p1092_p7) target bundleno = 54 (0x36), region = 20 }
  0x12   : > { %131 = sbr.rel (!%p66_p3) target bundleno = 54 (0x36), region = 24  ;;  %s133_s20 = sand.u32 (%p66_p3), 1, %s1356_s10  }
  0x13   : > { %s1176_s21 = sshll.u32 (%p66_p3), %s1364_s12, 4  ;;  %s1093_s22 = sshll.u32 (%p66_p3), %s133_s20, 9 }
  0x14   : > { %s1433_s25 = scalar_lea.vmem (%p66_p3), %s1730_s1, %s1176_s21  ;;  %s1438_s26 = scalar_lea.vmem (%p66_p3), [#allocation2], %s1093_s22 }
  0x15   : > { %v151_v0 = vld [vmem:[%s1433_s25] sm:$0xff] (%p66_p3)  ;;  %v153_v1 = vld [vmem:[%s1433_s25 + $0x8] sm:$0xff] (%p66_p3) }
  0x16   : > { %v155_v2 = vld [vmem:[%s1433_s25 + $0x20] sm:$0xff] (%p66_p3)  ;;  %152 = vst [vmem:[%s1438_s26] sm:$0xff] (%p66_p3), %v151_v0  ;;  %154 = vst [vmem:[%s1438_s26 + $0x8] sm:$0xff] (%p66_p3), %v153_v1  ;;  %v157_v3 = vld [vmem:[%s1433_s25 + $0x28] sm:$0xff] (%p66_p3) }
  0x17   : > { %156 = vst [vmem:[%s1438_s26 + $0x10] sm:$0xff] (%p66_p3), %v155_v2  ;;  %v159_v4 = vld [vmem:[%s1433_s25 + $0x40] sm:$0xff] (%p66_p3)  ;;  %v161_v5 = vld [vmem:[%s1433_s25 + $0x48] sm:$0xff] (%p66_p3)  ;;  %158 = vst [vmem:[%s1438_s26 + $0x18] sm:$0xff] (%p66_p3), %v157_v3 }
  0x18   : > { %160 = vst [vmem:[%s1438_s26 + $0x20] sm:$0xff] (%p66_p3), %v159_v4  ;;  %162 = vst [vmem:[%s1438_s26 + $0x28] sm:$0xff] (%p66_p3), %v161_v5  ;;  %v163_v6 = vld [vmem:[%s1433_s25 + $0x60] sm:$0xff] (%p66_p3)  ;;  %v165_v7 = vld [vmem:[%s1433_s25 + $0x68] sm:$0xff] (%p66_p3) }
  0x19   : > { %v167_v8 = vld [vmem:[%s1433_s25 + $0x80] sm:$0xff]  ;;  %164 = vst [vmem:[%s1438_s26 + $0x30] sm:$0xff] %v163_v6  ;;  %166 = vst [vmem:[%s1438_s26 + $0x38] sm:$0xff] %v165_v7  ;;  %v169_v9 = vld [vmem:[%s1433_s25 + $0x88] sm:$0xff] }
  0x1a   : > { %168 = vst [vmem:[%s1438_s26 + $0x40] sm:$0xff] %v167_v8  ;;  %v171_v10 = vld [vmem:[%s1433_s25 + $0xa0] sm:$0xff]  ;;  %v173_v11 = vld [vmem:[%s1433_s25 + $0xa8] sm:$0xff]  ;;  %170 = vst [vmem:[%s1438_s26 + $0x48] sm:$0xff] %v169_v9 }
  0x1b   : > { %172 = vst [vmem:[%s1438_s26 + $0x50] sm:$0xff] %v171_v10  ;;  %174 = vst [vmem:[%s1438_s26 + $0x58] sm:$0xff] %v173_v11  ;;  %v175_v12 = vld [vmem:[%s1433_s25 + $0xc0] sm:$0xff]  ;;  %v177_v13 = vld [vmem:[%s1433_s25 + $0xc8] sm:$0xff] }
  0x1c   : > { %v179_v14 = vld [vmem:[%s1433_s25 + $0xe0] sm:$0xff]  ;;  %176 = vst [vmem:[%s1438_s26 + $0x60] sm:$0xff] %v175_v12  ;;  %178 = vst [vmem:[%s1438_s26 + $0x68] sm:$0xff] %v177_v13  ;;  %v181_v15 = vld [vmem:[%s1433_s25 + $0xe8] sm:$0xff] }
  0x1d   : > { %180 = vst [vmem:[%s1438_s26 + $0x70] sm:$0xff] %v179_v14  ;;  %v183_v16 = vld [vmem:[%s1433_s25 + $0x100] sm:$0xff]  ;;  %v185_v17 = vld [vmem:[%s1433_s25 + $0x108] sm:$0xff]  ;;  %182 = vst [vmem:[%s1438_s26 + $0x78] sm:$0xff] %v181_v15 }
  0x1e   : > { %184 = vst [vmem:[%s1438_s26 + $0x80] sm:$0xff] %v183_v16  ;;  %186 = vst [vmem:[%s1438_s26 + $0x88] sm:$0xff] %v185_v17  ;;  %v187_v18 = vld [vmem:[%s1433_s25 + $0x120] sm:$0xff]  ;;  %v189_v19 = vld [vmem:[%s1433_s25 + $0x128] sm:$0xff] }
  0x1f   : > { %v191_v20 = vld [vmem:[%s1433_s25 + $0x140] sm:$0xff]  ;;  %188 = vst [vmem:[%s1438_s26 + $0x90] sm:$0xff] %v187_v18  ;;  %190 = vst [vmem:[%s1438_s26 + $0x98] sm:$0xff] %v189_v19  ;;  %v193_v21 = vld [vmem:[%s1433_s25 + $0x148] sm:$0xff] }
  0x20   : > { %192 = vst [vmem:[%s1438_s26 + $0xa0] sm:$0xff] %v191_v20  ;;  %v195_v22 = vld [vmem:[%s1433_s25 + $0x160] sm:$0xff]  ;;  %v197_v23 = vld [vmem:[%s1433_s25 + $0x168] sm:$0xff]  ;;  %194 = vst [vmem:[%s1438_s26 + $0xa8] sm:$0xff] %v193_v21 }
  0x21   : > { %196 = vst [vmem:[%s1438_s26 + $0xb0] sm:$0xff] %v195_v22  ;;  %198 = vst [vmem:[%s1438_s26 + $0xb8] sm:$0xff] %v197_v23  ;;  %v199_v24 = vld [vmem:[%s1433_s25 + $0x180] sm:$0xff]  ;;  %v201_v25 = vld [vmem:[%s1433_s25 + $0x188] sm:$0xff] }
  0x22   : > { %v203_v26 = vld [vmem:[%s1433_s25 + $0x1a0] sm:$0xff]  ;;  %200 = vst [vmem:[%s1438_s26 + $0xc0] sm:$0xff] %v199_v24  ;;  %202 = vst [vmem:[%s1438_s26 + $0xc8] sm:$0xff] %v201_v25  ;;  %v205_v27 = vld [vmem:[%s1433_s25 + $0x1a8] sm:$0xff] }
  0x23   : > { %204 = vst [vmem:[%s1438_s26 + $0xd0] sm:$0xff] %v203_v26  ;;  %v207_v28 = vld [vmem:[%s1433_s25 + $0x1c0] sm:$0xff]  ;;  %v209_v29 = vld [vmem:[%s1433_s25 + $0x1c8] sm:$0xff]  ;;  %206 = vst [vmem:[%s1438_s26 + $0xd8] sm:$0xff] %v205_v27 }
  0x24   : > { %208 = vst [vmem:[%s1438_s26 + $0xe0] sm:$0xff] %v207_v28  ;;  %210 = vst [vmem:[%s1438_s26 + $0xe8] sm:$0xff] %v209_v29  ;;  %v211_v30 = vld [vmem:[%s1433_s25 + $0x1e0] sm:$0xff]  ;;  %v213_v31 = vld [vmem:[%s1433_s25 + $0x1e8] sm:$0xff] }
  0x25   : > { %v215_v32 = vld [vmem:[%s1433_s25 + $0x200] sm:$0xff]  ;;  %212 = vst [vmem:[%s1438_s26 + $0xf0] sm:$0xff] %v211_v30  ;;  %214 = vst [vmem:[%s1438_s26 + $0xf8] sm:$0xff] %v213_v31  ;;  %v217_v33 = vld [vmem:[%s1433_s25 + $0x208] sm:$0xff] }
  0x26   : > { %216 = vst [vmem:[%s1438_s26 + $0x100] sm:$0xff] %v215_v32  ;;  %v219_v34 = vld [vmem:[%s1433_s25 + $0x220] sm:$0xff]  ;;  %v221_v35 = vld [vmem:[%s1433_s25 + $0x228] sm:$0xff]  ;;  %218 = vst [vmem:[%s1438_s26 + $0x108] sm:$0xff] %v217_v33 }
  0x27   : > { %220 = vst [vmem:[%s1438_s26 + $0x110] sm:$0xff] %v219_v34  ;;  %222 = vst [vmem:[%s1438_s26 + $0x118] sm:$0xff] %v221_v35  ;;  %v223_v36 = vld [vmem:[%s1433_s25 + $0x240] sm:$0xff]  ;;  %v225_v37 = vld [vmem:[%s1433_s25 + $0x248] sm:$0xff] }
  0x28   : > { %v227_v38 = vld [vmem:[%s1433_s25 + $0x260] sm:$0xff]  ;;  %224 = vst [vmem:[%s1438_s26 + $0x120] sm:$0xff] %v223_v36  ;;  %226 = vst [vmem:[%s1438_s26 + $0x128] sm:$0xff] %v225_v37  ;;  %v229_v39 = vld [vmem:[%s1433_s25 + $0x268] sm:$0xff] }
  0x29   : > { %228 = vst [vmem:[%s1438_s26 + $0x130] sm:$0xff] %v227_v38  ;;  %v231_v40 = vld [vmem:[%s1433_s25 + $0x280] sm:$0xff]  ;;  %v233_v41 = vld [vmem:[%s1433_s25 + $0x288] sm:$0xff]  ;;  %230 = vst [vmem:[%s1438_s26 + $0x138] sm:$0xff] %v229_v39 }
  0x2a   : > { %232 = vst [vmem:[%s1438_s26 + $0x140] sm:$0xff] %v231_v40  ;;  %234 = vst [vmem:[%s1438_s26 + $0x148] sm:$0xff] %v233_v41  ;;  %v235_v42 = vld [vmem:[%s1433_s25 + $0x2a0] sm:$0xff]  ;;  %v237_v43 = vld [vmem:[%s1433_s25 + $0x2a8] sm:$0xff] }
  0x2b   : > { %v239_v44 = vld [vmem:[%s1433_s25 + $0x2c0] sm:$0xff]  ;;  %236 = vst [vmem:[%s1438_s26 + $0x150] sm:$0xff] %v235_v42  ;;  %238 = vst [vmem:[%s1438_s26 + $0x158] sm:$0xff] %v237_v43  ;;  %v241_v45 = vld [vmem:[%s1433_s25 + $0x2c8] sm:$0xff] }
  0x2c   : > { %240 = vst [vmem:[%s1438_s26 + $0x160] sm:$0xff] %v239_v44  ;;  %v243_v46 = vld [vmem:[%s1433_s25 + $0x2e0] sm:$0xff]  ;;  %v245_v47 = vld [vmem:[%s1433_s25 + $0x2e8] sm:$0xff]  ;;  %242 = vst [vmem:[%s1438_s26 + $0x168] sm:$0xff] %v241_v45 }
  0x2d   : > { %244 = vst [vmem:[%s1438_s26 + $0x170] sm:$0xff] %v243_v46  ;;  %246 = vst [vmem:[%s1438_s26 + $0x178] sm:$0xff] %v245_v47  ;;  %v247_v48 = vld [vmem:[%s1433_s25 + $0x300] sm:$0xff]  ;;  %v249_v49 = vld [vmem:[%s1433_s25 + $0x308] sm:$0xff] }
  0x2e   : > { %v251_v50 = vld [vmem:[%s1433_s25 + $0x320] sm:$0xff]  ;;  %248 = vst [vmem:[%s1438_s26 + $0x180] sm:$0xff] %v247_v48  ;;  %250 = vst [vmem:[%s1438_s26 + $0x188] sm:$0xff] %v249_v49  ;;  %v253_v51 = vld [vmem:[%s1433_s25 + $0x328] sm:$0xff] }
  0x2f   : > { %252 = vst [vmem:[%s1438_s26 + $0x190] sm:$0xff] %v251_v50  ;;  %v255_v52 = vld [vmem:[%s1433_s25 + $0x340] sm:$0xff]  ;;  %v257_v53 = vld [vmem:[%s1433_s25 + $0x348] sm:$0xff]  ;;  %254 = vst [vmem:[%s1438_s26 + $0x198] sm:$0xff] %v253_v51 }
  0x30   : > { %256 = vst [vmem:[%s1438_s26 + $0x1a0] sm:$0xff] %v255_v52  ;;  %258 = vst [vmem:[%s1438_s26 + $0x1a8] sm:$0xff] %v257_v53  ;;  %v259_v54 = vld [vmem:[%s1433_s25 + $0x360] sm:$0xff]  ;;  %v261_v55 = vld [vmem:[%s1433_s25 + $0x368] sm:$0xff] }
  0x31   : > { %v263_v56 = vld [vmem:[%s1433_s25 + $0x380] sm:$0xff]  ;;  %260 = vst [vmem:[%s1438_s26 + $0x1b0] sm:$0xff] %v259_v54  ;;  %262 = vst [vmem:[%s1438_s26 + $0x1b8] sm:$0xff] %v261_v55  ;;  %v265_v57 = vld [vmem:[%s1433_s25 + $0x388] sm:$0xff] }
  0x32   : > { %264 = vst [vmem:[%s1438_s26 + $0x1c0] sm:$0xff] %v263_v56  ;;  %v267_v58 = vld [vmem:[%s1433_s25 + $0x3a0] sm:$0xff]  ;;  %v269_v59 = vld [vmem:[%s1433_s25 + $0x3a8] sm:$0xff]  ;;  %266 = vst [vmem:[%s1438_s26 + $0x1c8] sm:$0xff] %v265_v57 }
  0x33   : > { %268 = vst [vmem:[%s1438_s26 + $0x1d0] sm:$0xff] %v267_v58  ;;  %270 = vst [vmem:[%s1438_s26 + $0x1d8] sm:$0xff] %v269_v59  ;;  %v271_v60 = vld [vmem:[%s1433_s25 + $0x3c0] sm:$0xff]  ;;  %v273_v61 = vld [vmem:[%s1433_s25 + $0x3c8] sm:$0xff] }
  0x34   : > { %v275_v62 = vld [vmem:[%s1433_s25 + $0x3e0] sm:$0xff]  ;;  %272 = vst [vmem:[%s1438_s26 + $0x1e0] sm:$0xff] %v271_v60  ;;  %274 = vst [vmem:[%s1438_s26 + $0x1e8] sm:$0xff] %v273_v61  ;;  %v277_v63 = vld [vmem:[%s1433_s25 + $0x3e8] sm:$0xff] }
  0x35   : > { %276 = vst [vmem:[%s1438_s26 + $0x1f0] sm:$0xff] %v275_v62  ;;  %278 = vst [vmem:[%s1438_s26 + $0x1f8] sm:$0xff] %v277_v63 }
  0x36 PF: > { %p1096_p8 = scmp.ge.s32.totalorder %s1368_s13, 1  ;;  %p283_p9 = scmp.lt.s32.totalorder %s1368_s13, 3 }
  0x38   : > { %p284_p10 = pnand %p1096_p8, %p283_p9 }
  0x39   : > { %v326_v0 = vld [vmem:[%s1729_s0] sm:$0xff] (!%p284_p10)  ;;  %v328_v1 = vld [vmem:[%s1729_s0 + $0x10] sm:$0xff] (!%p284_p10)  ;;  %v327_v2 = vld [vmem:[%s1729_s0 + $0x8] sm:$0xff] (!%p284_p10)  ;;  %s290_s5 = sand.u32 (!%p284_p10), 1, %s1352_s9  }
  0x3a   : > { %287 = sbr.rel (%p284_p10) target bundleno = 468 (0x1d4), region = 47  ;;  %v1577_v3 = vunpack.c.l.bf16 (!%p284_p10), %v326_v0  ;;  %v1579_v4 = vunpack.c.h.bf16 (!%p284_p10), %v326_v0  ;;  %v1581_v5 = vunpack.c.l.bf16 (!%p284_p10), %v328_v1  ;;  %v1583_v6 = vunpack.c.h.bf16 (!%p284_p10), %v328_v1  ;;  %v329_v7 = vld [vmem:[%s1729_s0 + $0x18] sm:$0xff] (!%p284_p10)  ;;  %s1097_s8 = sshll.u32 (!%p284_p10), %s290_s5, 9 }
  0x3b   : > { %v1590_v8 = vunpack.c.l.bf16 (!%p284_p10), %v327_v2  ;;  %v1592_v9 = vunpack.c.h.bf16 (!%p284_p10), %v327_v2  ;;  %v1594_v10 = vunpack.c.l.bf16 (!%p284_p10), %v329_v7  ;;  %v1596_v11 = vunpack.c.h.bf16 (!%p284_p10), %v329_v7  ;;  %s1606_s15 = scalar_lea.vmem (!%p284_p10), [#allocation2], %s1097_s8  ;;  %s1098_s16 = sshll.u32 (!%p284_p10), %s290_s5, 6 }
  0x3c   : > { %v338_v12 = vmul.f32 (!%p284_p10), %v1577_v3, %v1577_v3  ;;  %v339_v13 = vmul.f32 (!%p284_p10), %v1579_v4, %v1579_v4  ;;  %v342_v14 = vmul.f32 (!%p284_p10), %v1581_v5, %v1581_v5  ;;  %v343_v15 = vmul.f32 (!%p284_p10), %v1583_v6, %v1583_v6  ;;  %v1226_v16 = vld [vmem:[%s1606_s15 + $0x4] ss:$16 sps:$4 sm:$0xff] (!%p284_p10)   ;;  %v1228_v21 = vld [vmem:[%s1606_s15 + $0xc] ss:$16 sps:$4 sm:$0xff] (!%p284_p10)   ;;  %v1230_v24 = vld [vmem:[%s1606_s15] ss:$16 sps:$4 sm:$0xff] (!%p284_p10)  }
  0x3d   : > { %v340_v17 = vmul.f32 (!%p284_p10), %v1590_v8, %v1590_v8  ;;  %v341_v18 = vmul.f32 (!%p284_p10), %v1592_v9, %v1592_v9  ;;  %v344_v19 = vmul.f32 (!%p284_p10), %v1594_v10, %v1594_v10  ;;  %v345_v20 = vmul.f32 (!%p284_p10), %v1596_v11, %v1596_v11  ;;  %767 = vmatprep.subr.bf16.mxu0 (!%p284_p10), %v1226_v16  ;;  %v1231_v25 = vld [vmem:[%s1606_s15 + $0x8] ss:$16 sps:$4 sm:$0xff] (!%p284_p10)   ;;  %v1232_v26 = vld [vmem:[%s1606_s15 + $0x24] ss:$16 sps:$4 sm:$0xff] (!%p284_p10)   ;;  %v1234_v29 = vld [vmem:[%s1606_s15 + $0x2c] ss:$16 sps:$4 sm:$0xff] (!%p284_p10)  }
  0x3e   : > { %v346_v22 = vadd.f32 (!%p284_p10), %v339_v13, %v338_v12  ;;  %v352_v23 = vadd.f32 (!%p284_p10), %v343_v15, %v342_v14  ;;  %820 = vmatprep.subr.bf16.mxu1 (!%p284_p10), %v1228_v21  ;;  %v1236_v30 = vld [vmem:[%s1606_s15 + $0x20] ss:$16 sps:$4 sm:$0xff] (!%p284_p10)   ;;  %768 = vmatpush1.bf16.msra.mxu0 (!%p284_p10), %v1230_v24  ;;  %v1237_v31 = vld [vmem:[%s1606_s15 + $0x28] ss:$16 sps:$4 sm:$0xff] (!%p284_p10)   ;;  %v1238_v32 = vld [vmem:[%s1606_s15 + $0x44] ss:$16 sps:$4 sm:$0xff] (!%p284_p10)  }
  0x3f   : > { %v349_v27 = vadd.f32 (!%p284_p10), %v341_v18, %v340_v17  ;;  %v355_v28 = vadd.f32 (!%p284_p10), %v345_v20, %v344_v19  ;;  %821 = vmatpush1.bf16.msra.mxu1 (!%p284_p10), %v1231_v25  ;;  %769 = vmatprep.subr.bf16.mxu0 (!%p284_p10), %v1232_v26  ;;  %v1240_v33 = vld [vmem:[%s1606_s15 + $0x4c] ss:$16 sps:$4 sm:$0xff] (!%p284_p10)   ;;  %v1242_v34 = vld [vmem:[%s1606_s15 + $0x40] ss:$16 sps:$4 sm:$0xff] (!%p284_p10)   ;;  %v1243_v35 = vld [vmem:[%s1606_s15 + $0x48] ss:$16 sps:$4 sm:$0xff] (!%p284_p10)  }
  0x40   : > { %347 = vadd.xlane.f32.xlu0 (!%p284_p10), %v346_v22  ;;  %353 = vadd.xlane.f32.xlu1 (!%p284_p10), %v352_v23  ;;  %v1244_v36 = vld [vmem:[%s1606_s15 + $0x64] ss:$16 sps:$4 sm:$0xff] (!%p284_p10)   ;;  %v1246_v37 = vld [vmem:[%s1606_s15 + $0x6c] ss:$16 sps:$4 sm:$0xff] (!%p284_p10)   ;;  %v1248_v38 = vld [vmem:[%s1606_s15 + $0x60] ss:$16 sps:$4 sm:$0xff] (!%p284_p10)  }
  0x41   : > { %822 = vmatprep.subr.bf16.mxu1 %v1234_v29  ;;  %v1249_v39 = vld [vmem:[%s1606_s15 + $0x68] ss:$16 sps:$4 sm:$0xff]   ;;  %v1250_v40 = vld [vmem:[%s1606_s15 + $0x84] ss:$16 sps:$4 sm:$0xff]   ;;  %v1252_v41 = vld [vmem:[%s1606_s15 + $0x8c] ss:$16 sps:$4 sm:$0xff]  }
  0x42   : > { %770 = vmatpush1.bf16.msra.mxu0 %v1236_v30  ;;  %v1254_v42 = vld [vmem:[%s1606_s15 + $0x80] ss:$16 sps:$4 sm:$0xff]   ;;  %v1255_v43 = vld [vmem:[%s1606_s15 + $0x88] ss:$16 sps:$4 sm:$0xff]   ;;  %v1256_v44 = vld [vmem:[%s1606_s15 + $0xa4] ss:$16 sps:$4 sm:$0xff]  }
  0x43   : > { %823 = vmatpush1.bf16.msra.mxu1 %v1237_v31  ;;  %771 = vmatprep.subr.bf16.mxu0 %v1238_v32  ;;  %v1258_v45 = vld [vmem:[%s1606_s15 + $0xac] ss:$16 sps:$4 sm:$0xff]   ;;  %v1260_v46 = vld [vmem:[%s1606_s15 + $0xa0] ss:$16 sps:$4 sm:$0xff]   ;;  %v1261_v47 = vld [vmem:[%s1606_s15 + $0xa8] ss:$16 sps:$4 sm:$0xff]  }
  0x44   : > { %350 = vadd.xlane.f32.xlu0 %v349_v27  ;;  %356 = vadd.xlane.f32.xlu1 %v355_v28  ;;  %v1262_v48 = vld [vmem:[%s1606_s15 + $0xc4] ss:$16 sps:$4 sm:$0xff]   ;;  %v1264_v49 = vld [vmem:[%s1606_s15 + $0xcc] ss:$16 sps:$4 sm:$0xff]   ;;  %v1266_v50 = vld [vmem:[%s1606_s15 + $0xc0] ss:$16 sps:$4 sm:$0xff]  }
  0x45   : > { %824 = vmatprep.subr.bf16.mxu1 %v1240_v33  ;;  %v1267_v51 = vld [vmem:[%s1606_s15 + $0xc8] ss:$16 sps:$4 sm:$0xff]   ;;  %v1268_v52 = vld [vmem:[%s1606_s15 + $0xe4] ss:$16 sps:$4 sm:$0xff]   ;;  %v1270_v53 = vld [vmem:[%s1606_s15 + $0xec] ss:$16 sps:$4 sm:$0xff]  }
  0x46   : > { %772 = vmatpush1.bf16.msra.mxu0 %v1242_v34  ;;  %v1272_v54 = vld [vmem:[%s1606_s15 + $0xe0] ss:$16 sps:$4 sm:$0xff]   ;;  %v1273_v55 = vld [vmem:[%s1606_s15 + $0xe8] ss:$16 sps:$4 sm:$0xff]   ;;  %v1274_v56 = vld [vmem:[%s1606_s15 + $0x104] ss:$16 sps:$4 sm:$0xff]  }
  0x47   : > { %825 = vmatpush1.bf16.msra.mxu1 %v1243_v35  ;;  %773 = vmatprep.subr.bf16.mxu0 %v1244_v36  ;;  %v1276_v57 = vld [vmem:[%s1606_s15 + $0x10c] ss:$16 sps:$4 sm:$0xff]   ;;  %v1278_v58 = vld [vmem:[%s1606_s15 + $0x100] ss:$16 sps:$4 sm:$0xff]   ;;  %v1279_v59 = vld [vmem:[%s1606_s15 + $0x108] ss:$16 sps:$4 sm:$0xff]  }
  0x48   : > { %826 = vmatprep.subr.bf16.mxu1 %v1246_v37  ;;  %v1280_v60 = vld [vmem:[%s1606_s15 + $0x124] ss:$16 sps:$4 sm:$0xff]   ;;  %v1282_v61 = vld [vmem:[%s1606_s15 + $0x12c] ss:$16 sps:$4 sm:$0xff]   ;;  %v1284_v62 = vld [vmem:[%s1606_s15 + $0x120] ss:$16 sps:$4 sm:$0xff]  }
  0x49   : > { %v1285_v63 = vld [vmem:[%s1606_s15 + $0x128] ss:$16 sps:$4 sm:$0xff]   ;;  %v1286_v0 = vld [vmem:[%s1606_s15 + $0x144] ss:$16 sps:$4 sm:$0xff]   ;;  %v1288_v1 = vld [vmem:[%s1606_s15 + $0x14c] ss:$16 sps:$4 sm:$0xff]  }
  0x4a   : > { %774 = vmatpush1.bf16.msra.mxu0 %v1248_v38  ;;  %v1290_v2 = vld [vmem:[%s1606_s15 + $0x140] ss:$16 sps:$4 sm:$0xff]   ;;  %v1291_v7 = vld [vmem:[%s1606_s15 + $0x148] ss:$16 sps:$4 sm:$0xff]   ;;  %v1292_v12 = vld [vmem:[%s1606_s15 + $0x164] ss:$16 sps:$4 sm:$0xff]  }
  0x4b   : > { %827 = vmatpush1.bf16.msra.mxu1 %v1249_v39  ;;  %775 = vmatprep.subr.bf16.mxu0 %v1250_v40  ;;  %v1294_v13 = vld [vmem:[%s1606_s15 + $0x16c] ss:$16 sps:$4 sm:$0xff]   ;;  %v1296_v14 = vld [vmem:[%s1606_s15 + $0x160] ss:$16 sps:$4 sm:$0xff]   ;;  %v1297_v15 = vld [vmem:[%s1606_s15 + $0x168] ss:$16 sps:$4 sm:$0xff]  }
  0x4c   : > { %828 = vmatprep.subr.bf16.mxu1 %v1252_v41  ;;  %v1298_v16 = vld [vmem:[%s1606_s15 + $0x184] ss:$16 sps:$4 sm:$0xff]   ;;  %v1300_v17 = vld [vmem:[%s1606_s15 + $0x18c] ss:$16 sps:$4 sm:$0xff]   ;;  %v1302_v18 = vld [vmem:[%s1606_s15 + $0x180] ss:$16 sps:$4 sm:$0xff]  }
  0x4d   : > { %v1303_v19 = vld [vmem:[%s1606_s15 + $0x188] ss:$16 sps:$4 sm:$0xff]   ;;  %v1304_v20 = vld [vmem:[%s1606_s15 + $0x1a4] ss:$16 sps:$4 sm:$0xff]   ;;  %v1306_v21 = vld [vmem:[%s1606_s15 + $0x1ac] ss:$16 sps:$4 sm:$0xff]  }
  0x4e   : > { %776 = vmatpush1.bf16.msra.mxu0 %v1254_v42  ;;  %v1308_v22 = vld [vmem:[%s1606_s15 + $0x1a0] ss:$16 sps:$4 sm:$0xff]   ;;  %v1309_v23 = vld [vmem:[%s1606_s15 + $0x1a8] ss:$16 sps:$4 sm:$0xff]   ;;  %v1310_v24 = vld [vmem:[%s1606_s15 + $0x1c4] ss:$16 sps:$4 sm:$0xff]  }
  0x4f   : > { %829 = vmatpush1.bf16.msra.mxu1 %v1255_v43  ;;  %777 = vmatprep.subr.bf16.mxu0 %v1256_v44  ;;  %v1312_v25 = vld [vmem:[%s1606_s15 + $0x1cc] ss:$16 sps:$4 sm:$0xff]   ;;  %v1314_v26 = vld [vmem:[%s1606_s15 + $0x1c0] ss:$16 sps:$4 sm:$0xff]   ;;  %v1315_v27 = vld [vmem:[%s1606_s15 + $0x1c8] ss:$16 sps:$4 sm:$0xff]  }
  0x50   : > { %830 = vmatprep.subr.bf16.mxu1 %v1258_v45  ;;  %v1316_v28 = vld [vmem:[%s1606_s15 + $0x1e4] ss:$16 sps:$4 sm:$0xff]   ;;  %v1318_v29 = vld [vmem:[%s1606_s15 + $0x1ec] ss:$16 sps:$4 sm:$0xff]   ;;  %v1320_v30 = vld [vmem:[%s1606_s15 + $0x1e0] ss:$16 sps:$4 sm:$0xff]  }
  0x51   : > { %v1321_v31 = vld [vmem:[%s1606_s15 + $0x1e8] ss:$16 sps:$4 sm:$0xff]   ;;  %s1690_s9 = scalar_lea.vmem [#allocation3], %s1098_s16  ;;  %s1185_s17 = sshll.u32 (%p1420_p6), %s1360_s11, 4 }
  0x52   : > { %778 = vmatpush1.bf16.msra.mxu0 %v1260_v46  ;;  %s973_s22 = scalar_lea.vmem (%p1420_p6), %s1731_s2, %s1185_s17 }
  0x53   : > { %831 = vmatpush1.bf16.msra.mxu1 %v1261_v47  ;;  %779 = vmatprep.subr.bf16.mxu0 %v1262_v48 }
  0x54   : > { %832 = vmatprep.subr.bf16.mxu1 %v1264_v49 }
  0x56   : > { %780 = vmatpush1.bf16.msra.mxu0 %v1266_v50 }
  0x57   : > { %833 = vmatpush1.bf16.msra.mxu1 %v1267_v51  ;;  %781 = vmatprep.subr.bf16.mxu0 %v1268_v52 }
  0x58   : > { %834 = vmatprep.subr.bf16.mxu1 %v1270_v53 }
  0x5a   : > { %782 = vmatpush1.bf16.msra.mxu0 %v1272_v54 }
  0x5b   : > { %835 = vmatpush1.bf16.msra.mxu1 %v1273_v55  ;;  %783 = vmatprep.subr.bf16.mxu0 %v1274_v56 }
  0x5c   : > { %836 = vmatprep.subr.bf16.mxu1 %v1276_v57 }
  0x5e   : > { %784 = vmatpush1.bf16.msra.mxu0 %v1278_v58 }
  0x5f   : > { %837 = vmatpush1.bf16.msra.mxu1 %v1279_v59  ;;  %785 = vmatprep.subr.bf16.mxu0 %v1280_v60 }
  0x60   : > { %838 = vmatprep.subr.bf16.mxu1 %v1282_v61 }
  0x62   : > { %786 = vmatpush1.bf16.msra.mxu0 %v1284_v62 }
  0x63   : > { %839 = vmatpush1.bf16.msra.mxu1 %v1285_v63  ;;  %787 = vmatprep.subr.bf16.mxu0 %v1286_v0 }
  0x64   : > { %840 = vmatprep.subr.bf16.mxu1 %v1288_v1 }
  0x66   : > { %788 = vmatpush1.bf16.msra.mxu0 %v1290_v2 }
  0x67   : > { %841 = vmatpush1.bf16.msra.mxu1 %v1291_v7  ;;  %789 = vmatprep.subr.bf16.mxu0 %v1292_v12 }
  0x68   : > { %842 = vmatprep.subr.bf16.mxu1 %v1294_v13 }
  0x6a   : > { %790 = vmatpush1.bf16.msra.mxu0 %v1296_v14 }
  0x6b   : > { %843 = vmatpush1.bf16.msra.mxu1 %v1297_v15  ;;  %791 = vmatprep.subr.bf16.mxu0 %v1298_v16 }
  0x6c   : > { %844 = vmatprep.subr.bf16.mxu1 %v1300_v17 }
  0x6e   : > { %792 = vmatpush1.bf16.msra.mxu0 %v1302_v18 }
  0x6f   : > { %845 = vmatpush1.bf16.msra.mxu1 %v1303_v19  ;;  %793 = vmatprep.subr.bf16.mxu0 %v1304_v20 }
  0x70   : > { %846 = vmatprep.subr.bf16.mxu1 %v1306_v21 }
  0x72   : > { %794 = vmatpush1.bf16.msra.mxu0 %v1308_v22 }
  0x73   : > { %847 = vmatpush1.bf16.msra.mxu1 %v1309_v23  ;;  %795 = vmatprep.subr.bf16.mxu0 %v1310_v24 }
  0x74   : > { %848 = vmatprep.subr.bf16.mxu1 %v1312_v25 }
  0x76   : > { %796 = vmatpush1.bf16.msra.mxu0 %v1314_v26 }
  0x77   : > { %849 = vmatpush1.bf16.msra.mxu1 %v1315_v27  ;;  %797 = vmatprep.subr.bf16.mxu0 %v1316_v28 }
  0x78   : > { %850 = vmatprep.subr.bf16.mxu1 %v1318_v29 }
  0x7a   : > { %798 = vmatpush1.bf16.msra.mxu0 %v1320_v30 }
  0x7b   : > { %851 = vmatpush1.bf16.msra.mxu1 %v1321_v31 }
  0xcd   : > { %v348_v32 = vpop.xlane.xlu0 %347  ;;  %v354_v33 = vpop.xlane.xlu1 %353 }
  0xce   : > { %v359_v34 = vmul.f32 0.00390625, %v348_v32  ;;  %v361_v35 = vmul.f32 0.00390625, %v354_v33 }
  0xd0   : > { %v363_v36 = vadd.f32 1.1920929e-07, %v359_v34  ;;  %v365_v37 = vadd.f32 1.1920929e-07, %v361_v35 }
  0xd1   : > { %v351_v38 = vpop.xlane.xlu0 %350  ;;  %v357_v39 = vpop.xlane.xlu1 %356 }
  0xd2   : > { %v360_v40 = vmul.f32 0.00390625, %v351_v38  ;;  %v362_v41 = vmul.f32 0.00390625, %v357_v39  ;;  %1322 = vrsqrt.f32 %v365_v37 }
  0xd3   : > { %1324 = vrsqrt.f32 %v363_v36 }
  0xd4   : > { %v364_v42 = vadd.f32 1.1920929e-07, %v360_v40  ;;  %v366_v43 = vadd.f32 1.1920929e-07, %v362_v41 }
  0xd6   : > { %1326 = vrsqrt.f32 %v364_v42 }
  0xd7   : > { %1328 = vrsqrt.f32 %v366_v43 }
  0xdc   : > { %v1323_v44 = vpop.eup %1322 }
  0xdd   : > { %v1325_v45 = vpop.eup %1324  ;;  %v376_v47 = vmul.f32 %v1323_v44, %v1583_v6 }
  0xde   : > { %v372_v49 = vmul.f32 %v1325_v45, %v1579_v4  ;;  %v371_v51 = vmul.f32 %v1325_v45, %v1577_v3  ;;  %v375_v4 = vmul.f32 %v1323_v44, %v1581_v5 }
  0xe0   : > { %v1327_v46 = vpop.eup %1326 }
  0xe1   : > { %v1329_v48 = vpop.eup %1328  ;;  %v374_v50 = vmul.f32 %v1327_v46, %v1592_v9  ;;  %v373_v52 = vmul.f32 %v1327_v46, %v1590_v8 }
  0xe2   : > { %v378_v53 = vmul.f32 %v1329_v48, %v1596_v11  ;;  %v377_v6 = vmul.f32 %v1329_v48, %v1594_v10 }
  0xe3   : > { %v380_v54 = vpack.c.bf16 %v374_v50, %v372_v49  ;;  %v379_v55 = vpack.c.bf16 %v373_v52, %v371_v51 }
  0xe4   : > { %v382_v56 = vpack.c.bf16 %v378_v53, %v376_v47  ;;  %v381_v9 = vpack.c.bf16 %v377_v6, %v375_v4 }
  0xe5   : > { %799 = vmatprep.mubr.bf16.mxu0 %v380_v54  ;;  %852 = vmatprep.mubr.bf16.mxu1 %v380_v54 }
  0xe6   : > { %800 = vmatmul.mubr.bf16.vlgmr.msra.gmra.mrb[0].mxu0 %v379_v55  ;;  %853 = vmatmul.mubr.bf16.vlgmr.msra.gmra.mrb[0].mxu1 %v379_v55 }
  0xe7   : > { %809 = vmatprep.mubr.bf16.mxu0 %v382_v56  ;;  %862 = vmatprep.mubr.bf16.mxu1 %v382_v56 }
  0xee   : > { %810 = vmatmul.mubr.bf16.gmra.mrb[4].mxu0 %v381_v9  ;;  %863 = vmatmul.mubr.bf16.gmra.mrb[4].mxu1 %v381_v9 }
 0x1b9   : > { %v801_v3 = vpop.f32.mrb[0].mxu0  ;;  %v854_v8 = vpop.f32.mrb[0].mxu1 }
 0x1ba   : > { %v873_v11 = vmax.f32 %v801_v3, 0.0  ;;  %v875_v57 = vmax.f32 %v854_v8, 0.0  ;;  %v803_v58 = vpop.f32.mrb[1].mxu0  ;;  %v856_v59 = vpop.f32.mrb[1].mxu1 }
 0x1bb   : > { %v874_v60 = vmax.f32 %v803_v58, 0.0  ;;  %v876_v61 = vmax.f32 %v856_v59, 0.0  ;;  %v805_v62 = vpop.f32.mrb[2].mxu0  ;;  %v858_v63 = vpop.f32.mrb[2].mxu1 }
 0x1bc   : > { %v889_v0 = vmul.f32 %v873_v11, %v873_v11  ;;  %v891_v1 = vmul.f32 %v875_v57, %v875_v57  ;;  %v877_v5 = vmax.f32 %v805_v62, 0.0  ;;  %v879_v2 = vmax.f32 %v858_v63, 0.0  ;;  %v807_v10 = vpop.f32.mrb[3].mxu0  ;;  %v860_v7 = vpop.f32.mrb[3].mxu1 }
 0x1bd   : > { %v890_v12 = vmul.f32 %v874_v60, %v874_v60  ;;  %v892_v13 = vmul.f32 %v876_v61, %v876_v61  ;;  %v878_v14 = vmax.f32 %v807_v10, 0.0  ;;  %v880_v15 = vmax.f32 %v860_v7, 0.0 }
 0x1be   : > { %v893_v16 = vmul.f32 %v877_v5, %v877_v5  ;;  %v895_v17 = vmul.f32 %v879_v2, %v879_v2 }
 0x1bf   : > { %v1177_v18 = vpack.c.bf16 %v890_v12, %v889_v0  ;;  %v1178_v19 = vpack.c.bf16 %v892_v13, %v891_v1  ;;  %v894_v20 = vmul.f32 %v878_v14, %v878_v14  ;;  %v896_v21 = vmul.f32 %v880_v15, %v880_v15 }
 0x1c1   : > { %953 = vst [vmem:[%s1690_s9] sm:$0xff] %v1177_v18  ;;  %954 = vst [vmem:[%s1690_s9 + $0x8] sm:$0xff] %v1178_v19  ;;  %v1179_v22 = vpack.c.bf16 %v894_v20, %v893_v16  ;;  %v1180_v23 = vpack.c.bf16 %v896_v21, %v895_v17  ;;  %v811_v24 = vpop.f32.mrb[4].mxu0  ;;  %v864_v25 = vpop.f32.mrb[4].mxu1 }
 0x1c2   : > { %v881_v26 = vmax.f32 %v811_v24, 0.0  ;;  %v883_v27 = vmax.f32 %v864_v25, 0.0  ;;  %v813_v28 = vpop.f32.mrb[5].mxu0  ;;  %v866_v29 = vpop.f32.mrb[5].mxu1 }
 0x1c3   : > { %955 = vst [vmem:[%s1690_s9 + $0x10] sm:$0xff] %v1179_v22  ;;  %956 = vst [vmem:[%s1690_s9 + $0x18] sm:$0xff] %v1180_v23  ;;  %v882_v30 = vmax.f32 %v813_v28, 0.0  ;;  %v884_v31 = vmax.f32 %v866_v29, 0.0  ;;  %v815_v32 = vpop.f32.mrb[6].mxu0  ;;  %v868_v33 = vpop.f32.mrb[6].mxu1 }
 0x1c4   : > { %v897_v34 = vmul.f32 %v881_v26, %v881_v26  ;;  %v899_v35 = vmul.f32 %v883_v27, %v883_v27  ;;  %v885_v36 = vmax.f32 %v815_v32, 0.0  ;;  %v887_v37 = vmax.f32 %v868_v33, 0.0  ;;  %v817_v38 = vpop.f32.mrb[7].mxu0  ;;  %v870_v39 = vpop.f32.mrb[7].mxu1 }
 0x1c5   : > { %v898_v40 = vmul.f32 %v882_v30, %v882_v30  ;;  %v900_v41 = vmul.f32 %v884_v31, %v884_v31  ;;  %v886_v42 = vmax.f32 %v817_v38, 0.0  ;;  %v888_v43 = vmax.f32 %v870_v39, 0.0  ;;  %967 = sbr.rel (!%p1420_p6) target bundleno = 468 (0x1d4), region = 55 }
 0x1c6   : > { %v901_v44 = vmul.f32 %v885_v36, %v885_v36  ;;  %v903_v45 = vmul.f32 %v887_v37, %v887_v37 }
 0x1c7   : > { %v1181_v46 = vpack.c.bf16 %v898_v40, %v897_v34  ;;  %v1182_v47 = vpack.c.bf16 %v900_v41, %v899_v35  ;;  %v902_v48 = vmul.f32 %v886_v42, %v886_v42  ;;  %v904_v49 = vmul.f32 %v888_v43, %v888_v43 }
 0x1c8   : > { %v986_v52 = vld [vmem:[%s1690_s9] sm:$0xff] (%p1420_p6)  ;;  %v988_v53 = vld [vmem:[%s1690_s9 + $0x8] sm:$0xff] (%p1420_p6) }
 0x1c9   : > { %957 = vst [vmem:[%s1690_s9 + $0x20] sm:$0xff] %v1181_v46  ;;  %958 = vst [vmem:[%s1690_s9 + $0x28] sm:$0xff] %v1182_v47  ;;  %v1183_v50 = vpack.c.bf16 %v902_v48, %v901_v44  ;;  %v1184_v51 = vpack.c.bf16 %v904_v49, %v903_v45 }
 0x1ca   : > { %v990_v54 = vld [vmem:[%s1690_s9 + $0x10] sm:$0xff] (%p1420_p6)  ;;  %v992_v55 = vld [vmem:[%s1690_s9 + $0x18] sm:$0xff] (%p1420_p6)  ;;  %987 = vst [vmem:[%s973_s22] sm:$0xff] (%p1420_p6), %v986_v52  ;;  %989 = vst [vmem:[%s973_s22 + $0x8] sm:$0xff] (%p1420_p6), %v988_v53 }
 0x1cb   : > { %959 = vst [vmem:[%s1690_s9 + $0x30] sm:$0xff] %v1183_v50  ;;  %960 = vst [vmem:[%s1690_s9 + $0x38] sm:$0xff] %v1184_v51 }
 0x1cc   : > { %991 = vst [vmem:[%s973_s22 + $0x20] sm:$0xff] %v990_v54  ;;  %993 = vst [vmem:[%s973_s22 + $0x28] sm:$0xff] %v992_v55 }
 0x1d0   : > { %v994_v56 = vld [vmem:[%s1690_s9 + $0x20] sm:$0xff]  ;;  %v996_v4 = vld [vmem:[%s1690_s9 + $0x28] sm:$0xff] }
 0x1d1   : > { %995 = vst [vmem:[%s973_s22 + $0x40] sm:$0xff] %v994_v56  ;;  %997 = vst [vmem:[%s973_s22 + $0x48] sm:$0xff] %v996_v4 }
 0x1d2   : > { %v998_v6 = vld [vmem:[%s1690_s9 + $0x30] sm:$0xff]  ;;  %v1000_v9 = vld [vmem:[%s1690_s9 + $0x38] sm:$0xff] }
 0x1d3   : > { %999 = vst [vmem:[%s973_s22 + $0x60] sm:$0xff] %v998_v6  ;;  %1001 = vst [vmem:[%s973_s22 + $0x68] sm:$0xff] %v1000_v9 }
 0x1d4 PF: > { %s12_s13 = sadd.s32 1, %s1368_s13   ;;  %s1733_s9 = smov %s1356_s10 }
 0x1d5   : > { %p9_p11 = scmp.ge.s32.totalorder %s12_s13, 4   ;;  %s1734_s10 = smov %s1425_s19 }
 0x1d6   : > { %s1735_s11 = smov %s1364_s12  ;;  %s1736_s12 = smov %s1738_s14 }
 0x1d7   :  { %11 = sbr.rel (!%p9_p11) target bundleno = 3 (0x3), region = 112 }

// kernel: gpt_forward.17
= control target key start
LH: loop header
LB: loop body
LE: loop exit
PB: predicated region body
PF: predicated region fallthrough
CT: control target
= control target key end

     0   :  { %s1743_s24 = smov 0   ;;  %s1745_s25 = smov 0   ;;  %s2090_s0 = inlined_call_operand.vmem [shape: bf16[2,16,768], index: 0, kind: input, shape index: {}, may-alias: {0,1,2}]   ;;  %s2091_s1 = inlined_call_operand.vmem [shape: bf16[2,16,768], index: 1, kind: input, shape index: {}, may-alias: {0,1,2}]   ;;  %s2092_s2 = inlined_call_operand.vmem [shape: bf16[2,16,768], index: 2, kind: input, shape index: {}, may-alias: {0,1,2}]   ;;  %s2093_s3 = inlined_call_operand.vmem [shape: bf16[16,64], index: 3, kind: input, shape index: {}, may-alias: {3,5}]   ;;  %s2094_s4 = inlined_call_operand.vmem [shape: bf16[16,64], index: 4, kind: input, shape index: {}, may-alias: {4,6}]   ;;  %s2095_s5 = inlined_call_operand.vmem [shape: bf16[16,64], index: 5, kind: input, shape index: {}, may-alias: {3,5}]   ;;  %s2096_s6 = inlined_call_operand.vmem [shape: bf16[16,64], index: 6, kind: input, shape index: {}, may-alias: {4,6}]   ;;  %s2097_s7 = inlined_call_operand.vmem [shape: bf16[2,16,256], index: 7, kind: output, shape index: {}]  }
   0x1   :  { %s1747_s26 = smov 0   ;;  %s1749_s27 = smov 0  }
   0x2   :  { %s1751_s28 = smov 0  }
   0x3 LB: > { %s36_s29 = sadd.s32 1, %s1692_s27  ;;  %p52_p1 = scmp.ne.s32.totalorder %s1684_s25, %s1680_s24  ;;  %s1696_s28 = sphi %s1751_s28, %s17_s28   ;;  %s1692_s27 = sphi %s1749_s27, %s2102_s27   ;;  %s1688_s26 = sphi %s1747_s26, %s2101_s26   ;;  %s1684_s25 = sphi %s1745_s25, %s2100_s25   ;;  %s1680_s24 = sphi %s1743_s24, %s2099_s24  }
   0x4   : > { %p38_p0 = scmp.ge.s32.totalorder %s36_s29, 2  ;;  %p53_p2 = scmp.eq.s32.totalorder %s1696_s28, 0 }
   0x5   : > { %s45_s9 = sadd.s32 1, %s1684_s25  ;;  %p1467_p5 = scmp.ge.s32.totalorder %s1696_s28, 2 }
   0x6   : > { %s2104_s29 = smov (%p38_p0, %s36_s29), 0  ;;  %p1774_p3 = por %p53_p2, %p52_p1 }
   0x7   : > { %s40_s8 = ssub.s32 %s1692_s27, %s2104_s29  ;;  %302 = sbr.rel (%p1467_p5) target bundleno = 35 (0x23), region = 32 }
   0x8   : > { %p43_p4 = scmp.eq.s32.totalorder %s40_s8, 0 }
   0xa   : > { %s1782_s10 = scalar_select %p43_p4, %s1684_s25, %s45_s9  }
   0xe   : > { %305 = sbr.rel (!%p1774_p3) target bundleno = 21 (0x15), region = 36  ;;  %s307_s11 = sand.u32 (%p1774_p3), 1, %s1684_s25  }
   0xf   : > { %s1547_s12 = smul.u32 (%p1774_p3), 48, %s1692_s27  ;;  %s1468_s13 = sshll.u32 (%p1774_p3), %s307_s11, 4 }
  0x10   : > { %s309_s17 = scalar_lea.vmem (%p1774_p3), [#allocation5], %s1468_s13 }
  0x11   : > { %s315_s16 = scalar_lea.vmem (%p1774_p3), %s2090_s0, %s1547_s12 }
  0x12   : > { %v345_v0 = vld [vmem:[%s315_s16] sm:$0xff] (%p1774_p3)  ;;  %v347_v1 = vld [vmem:[%s315_s16 + $0x18] sm:$0xff] (%p1774_p3) }
  0x13   : > { %346 = vst [vmem:[%s309_s17] sm:$0xff] (%p1774_p3), %v345_v0  ;;  %348 = vst [vmem:[%s309_s17 + $0x8] sm:$0xff] (%p1774_p3), %v347_v1 }
  0x15 PF: > { %354 = sbr.rel (!%p1774_p3) target bundleno = 28 (0x1c), region = 74  ;;  %s356_s18 = sand.u32 (%p1774_p3), 1, %s1684_s25  }
  0x16   : > { %s1471_s19 = smul.u32 (%p1774_p3), 48, %s1692_s27  ;;  %s1470_s20 = sshll.u32 (%p1774_p3), %s356_s18, 4 }
  0x17   : > { %s358_s8 = scalar_lea.vmem (%p1774_p3), [#allocation6], %s1470_s20 }
  0x18   : > { %s1310_s23 = scalar_lea.vmem (%p1774_p3), %s2091_s1, %s1471_s19 }
  0x19   : > { %v1472_v2 = vld [vmem:[%s1310_s23 + $0x8] sm:$0xff] (%p1774_p3)  ;;  %v1473_v3 = vld [vmem:[%s1310_s23 + $0x20] sm:$0xff] (%p1774_p3) }
  0x1a   : > { %396 = vst [vmem:[%s358_s8] sm:$0xff] (%p1774_p3), %v1472_v2  ;;  %398 = vst [vmem:[%s358_s8 + $0x8] sm:$0xff] (%p1774_p3), %v1473_v3 }
  0x1c PF: > { %404 = sbr.rel (!%p1774_p3) target bundleno = 35 (0x23), region = 112  ;;  %s406_s9 = sand.u32 (%p1774_p3), 1, %s1684_s25  }
  0x1d   : > { %s1475_s11 = smul.u32 (%p1774_p3), 48, %s1692_s27  ;;  %s1474_s12 = sshll.u32 (%p1774_p3), %s406_s9, 4 }
  0x1e   : > { %s408_s16 = scalar_lea.vmem (%p1774_p3), [#allocation7], %s1474_s12 }
  0x1f   : > { %s1318_s15 = scalar_lea.vmem (%p1774_p3), %s2092_s2, %s1475_s11 }
  0x20   : > { %v1476_v4 = vld [vmem:[%s1318_s15 + $0x10] sm:$0xff] (%p1774_p3)  ;;  %v1477_v5 = vld [vmem:[%s1318_s15 + $0x28] sm:$0xff] (%p1774_p3) }
  0x21   : > { %446 = vst [vmem:[%s408_s16] sm:$0xff] (%p1774_p3), %v1476_v4  ;;  %448 = vst [vmem:[%s408_s16 + $0x8] sm:$0xff] (%p1774_p3), %v1477_v5 }
  0x23 PF: > { %p1478_p6 = scmp.ge.s32.totalorder %s1696_s28, 1  ;;  %p453_p7 = scmp.lt.s32.totalorder %s1696_s28, 3 }
  0x25   : > { %p454_p8 = pnand %p1478_p6, %p453_p7 }
  0x26   : > { %s460_s30 = sand.u32 (!%p454_p8), 1, %s1680_s24   ;;  %v1504_v18 = vld [vmem:[%s2094_s4] sm:$0xff] (!%p454_p8)   ;;  %s1698_s12 = smov (!%p454_p8), 64   ;;  %v1699_v57 = vmov (!%p454_p8), 0.0   ;;  %vm1700_vm0 = vmmov (!%p454_p8), 0   ;;  %vm696_vm1 = vcmask (!%p454_p8), 523264  }
  0x27   : > { %457 = sbr.rel (%p454_p8) target bundleno = 1670 (0x686), region = 150  ;;  %s1809_s17 = sshll.u32 (!%p454_p8), %s460_s30, 4  ;;  %v1832_v19 = vunpack.c.l.bf16 (!%p454_p8), %v1504_v18  ;;  %v1834_v20 = vunpack.c.h.bf16 (!%p454_p8), %v1504_v18  ;;  %v1508_v21 = vld [vmem:[%s2095_s5] sm:$0xff] (!%p454_p8)   ;;  %1523 = vmatprep.subr.bf16.mxu0 (!%p454_p8), %v1699_v57  ;;  %1529 = vmatprep.subr.bf16.mxu1 (!%p454_p8), %v1699_v57  ;;  %vm581_vm2 = vcmask (!%p454_p8), 7168   ;;  %vm810_vm4 = vcmask (!%p454_p8), 130048  }
  0x28   : > { %s469_s18 = scalar_lea.vmem (!%p454_p8), [#allocation6], %s1809_s17  ;;  %s462_s19 = scalar_lea.vmem (!%p454_p8), [#allocation5], %s1809_s17  ;;  %v1512_v22 = vld [vmem:[%s2096_s6] sm:$0xff] (!%p454_p8)   ;;  %v1844_v24 = vunpack.c.l.bf16 (!%p454_p8), %v1508_v21  ;;  %v1846_v25 = vunpack.c.h.bf16 (!%p454_p8), %v1508_v21  ;;  %1525 = vmatprep.mubr.msk.bf16.mxu0 (!%p454_p8), %vm1700_vm0, %v1699_v57  ;;  %1531 = vmatprep.mubr.msk.bf16.mxu1 (!%p454_p8), %vm1700_vm0, %v1699_v57  ;;  %586 = vst.msk [vmem:[#allocation3] sm:$0xff] (!%p454_p8), %vm581_vm2, %v1699_v57  ;;  %587 = vst.msk [vmem:[#allocation3 + $0x8] sm:$0xff] (!%p454_p8), %vm581_vm2, %v1699_v57 }
  0x29   : > { %v1812_v6 = vld [vmem:[%s469_s18] sm:$0xff] (!%p454_p8)  ;;  %v1817_v8 = vld [vmem:[%s469_s18 + $0x8] sm:$0xff] (!%p454_p8)  ;;  %v1598_v23 = vpack.i.bf16 (!%p454_p8), %v1834_v20, %v1832_v19  ;;  %v1848_v26 = vunpack.c.l.bf16 (!%p454_p8), %v1512_v22  ;;  %v1850_v27 = vunpack.c.h.bf16 (!%p454_p8), %v1512_v22  ;;  %588 = vst.msk [vmem:[#allocation3 + $0x10] sm:$0xff] (!%p454_p8), %vm581_vm2, %v1699_v57  ;;  %589 = vst.msk [vmem:[#allocation3 + $0x18] sm:$0xff] (!%p454_p8), %vm581_vm2, %v1699_v57  ;;  %s476_s13 = scalar_lea.vmem (!%p454_p8), [#allocation7], %s1809_s17  ;;  %p566_p9 = scmp.lt.s32.totalorder (!%p454_p8), %s1688_s26, 1 }
  0x2a   : > { %v1815_v7 = vld [vmem:[%s462_s19] sm:$0xff] (!%p454_p8)  ;;  %v701_v9 = vunpack.c.l.bf16 (!%p454_p8), %v1812_v6  ;;  %v702_v11 = vunpack.c.l.bf16 (!%p454_p8), %v1817_v8  ;;  %v1824_v12 = vld [vmem:[%s462_s19 + $0x8] sm:$0xff] (!%p454_p8)  ;;  %v1603_v29 = vpack.i.bf16 (!%p454_p8), %v1846_v25, %v1844_v24 }
  0x2b   : > { %v1821_v10 = vunpack.c.l.bf16 (!%p454_p8), %v1815_v7  ;;  %v636_v13 = vunpack.c.l.bf16 (!%p454_p8), %v1824_v12  ;;  %v1500_v28 = vld [vmem:[%s2093_s3] sm:$0xff] (!%p454_p8)   ;;  %v1593_v32 = vpack.i.bf16 (!%p454_p8), %v1850_v27, %v1848_v26 }
  0x2c   : > { %v703_v14 = vmul.f32 (!%p454_p8), %v701_v9, %v701_v9  ;;  %v704_v16 = vmul.f32 (!%p454_p8), %v702_v11, %v702_v11  ;;  %v1858_v30 = vunpack.c.l.bf16 (!%p454_p8), %v1500_v28  ;;  %v1860_v31 = vunpack.c.h.bf16 (!%p454_p8), %v1500_v28 }
  0x2d   : > { %v637_v15 = vmul.f32 (!%p454_p8), %v1821_v10, %v1821_v10  ;;  %v638_v17 = vmul.f32 (!%p454_p8), %v636_v13, %v636_v13 }
  0x2e   : > { %705 = vadd.xlane.f32.xlu0 %v703_v14  ;;  %v1608_v33 = vpack.i.bf16 %v1860_v31, %v1858_v30  ;;  %s2106_s26 = smov (!%p566_p9, %s1688_s26), 1 }
  0x2f   : > { %639 = vadd.xlane.f32.xlu1 %v637_v15  ;;  %s1494_s14 = sshll.u32 %s2106_s26, 4 }
  0x30   : > { %s574_s30 = scalar_lea.vmem %s2097_s7, %s1494_s14 }
  0x32   : > { %707 = vadd.xlane.f32.xlu0 %v704_v16 }
  0x33   : > { %641 = vadd.xlane.f32.xlu1 %v638_v17 }
  0x44   : > { %1599 = vrot.lane.b32.xlu1 %v1598_v23, %s1698_s12 }
  0x48   : > { %1604 = vrot.lane.b32.xlu1 %v1603_v29, %s1698_s12  ;;  %1594 = vrot.lane.b32.xlu0 %v1593_v32, %s1698_s12 }
  0x4c   : > { %1609 = vrot.lane.b32.xlu1 %v1608_v33, %s1698_s12 }
  0xbb   : > { %v706_v34 = vpop.xlane.xlu0 %705 }
  0xbc   : > { %v640_v35 = vpop.xlane.xlu1 %639  ;;  %v709_v36 = vmul.f32 0.0078125, %v706_v34 }
  0xbd   : > { %v644_v40 = vmul.f32 0.0078125, %v640_v35 }
  0xbe   : > { %v711_v37 = vadd.f32 1.1920929e-07, %v709_v36 }
  0xbf   : > { %v708_v38 = vpop.xlane.xlu0 %707  ;;  %v646_v45 = vadd.f32 1.1920929e-07, %v644_v40 }
  0xc0   : > { %v642_v39 = vpop.xlane.xlu1 %641  ;;  %1618 = vrsqrt.f32 %v711_v37  ;;  %v710_v41 = vmul.f32 0.0078125, %v708_v38 }
  0xc1   : > { %v645_v42 = vmul.f32 0.0078125, %v642_v39 }
  0xc2   : > { %v712_v43 = vadd.f32 1.1920929e-07, %v710_v41 }
  0xc3   : > { %v647_v44 = vadd.f32 1.1920929e-07, %v645_v42  ;;  %v1869_v46 = vpop.permute.xlu0 %1594 }
  0xc4   : > { %1620 = vrsqrt.f32 %v712_v43  ;;  %v1596_v47 = vunpack.i.l.bf16 %v1869_v46  ;;  %v1597_v50 = vunpack.i.h.bf16 %v1869_v46  ;;  %v1875_v53 = vpop.permute.xlu1 %1599 }
  0xc5   : > { %1622 = vrsqrt.f32 %v647_v44  ;;  %v1602_v55 = vunpack.i.h.bf16 %v1875_v53  ;;  %v1601_v0 = vunpack.i.l.bf16 %v1875_v53 }
  0xc6   : > { %1624 = vrsqrt.f32 %v646_v45 }
  0xc8   : > { %v1904_v5 = vpop.permute.xlu1 %1604 }
  0xca   : > { %v1619_v48 = vpop.eup %1618 }
  0xcb   : > { %v715_v49 = vmul.f32 %v1619_v48, %v701_v9 }
  0xcc   : > { %v1906_v9 = vpop.permute.xlu1 %1609 }
  0xcd   : > { %v727_v51 = vmul.f32 %v1596_v47, %v715_v49  ;;  %v749_v60 = vmul.f32 %v1848_v26, %v715_v49  ;;  %v1612_v17 = vunpack.i.h.bf16 %v1906_v9  ;;  %v717_v18 = vmul.f32 %v1844_v24, %v715_v49 }
  0xce   : > { %v1621_v52 = vpop.eup %1620  ;;  %v1611_v35 = vunpack.i.l.bf16 %v1906_v9 }
  0xcf   : > { %v1623_v54 = vpop.eup %1622  ;;  %v716_v56 = vmul.f32 %v1621_v52, %v702_v11  ;;  %731 = vrot.lane.b32.xlu1 %v727_v51, %s1698_s12  ;;  %v1606_v11 = vunpack.i.l.bf16 %v1904_v5 }
  0xd0   : > { %v651_v58 = vmul.f32 %v1623_v54, %v636_v13  ;;  %v1625_v61 = vpop.eup %1624  ;;  %v1607_v13 = vunpack.i.h.bf16 %v1904_v5 }
  0xd1   : > { %v728_v59 = vmul.f32 %v1597_v50, %v716_v56  ;;  %v650_v63 = vmul.f32 %v1625_v61, %v1821_v10  ;;  %v750_v1 = vmul.f32 %v1850_v27, %v716_v56  ;;  %v747_v16 = vmul.f32 %v1606_v11, %v715_v49 }
  0xd2   : > { %v663_v62 = vmul.f32 %v1602_v55, %v651_v58  ;;  %v685_v2 = vmul.f32 %v1834_v20, %v651_v58  ;;  %v718_v21 = vmul.f32 %v1846_v25, %v716_v56  ;;  %v748_v23 = vmul.f32 %v1607_v13, %v716_v56 }
  0xd3   : > { %733 = vrot.lane.b32.xlu0 %v728_v59, %s1698_s12  ;;  %753 = vrot.lane.b32.xlu1 %v749_v60, %s1698_s12  ;;  %v662_v3 = vmul.f32 %v1601_v0, %v650_v63  ;;  %v684_v4 = vmul.f32 %v1832_v19, %v650_v63  ;;  %v683_v36 = vmul.f32 %v1612_v17, %v651_v58  ;;  %v1701_v61 = vmov -inf  }
  0xd4   : > { %v653_v42 = vmul.f32 %v1860_v31, %v651_v58  ;;  %v652_v45 = vmul.f32 %v1858_v30, %v650_v63  ;;  %v682_v48 = vmul.f32 %v1611_v35, %v650_v63  ;;  %582 = vst.msk [vmem:[#allocation2] sm:$0xff] %vm581_vm2, %v1701_v61  ;;  %583 = vst.msk [vmem:[#allocation2 + $0x8] sm:$0xff] %vm581_vm2, %v1701_v61 }
  0xd5   : > { %584 = vst.msk [vmem:[#allocation2 + $0x10] sm:$0xff] %vm581_vm2, %v1701_v61  ;;  %585 = vst.msk [vmem:[#allocation2 + $0x18] sm:$0xff] %vm581_vm2, %v1701_v61 }
  0xd7   : > { %755 = vrot.lane.b32.xlu0 %v750_v1, %s1698_s12  ;;  %668 = vrot.lane.b32.xlu1 %v663_v62, %s1698_s12  ;;  %v617_v62 = vlaneseq }
  0xd9   : > { %v1943_v63 = vshrl.u32 %v617_v62, 7  ;;  %v1945_v1 = vand.u32 127, %v617_v62 }
  0xdb   : > { %690 = vrot.lane.b32.xlu1 %v685_v2, %s1698_s12  ;;  %666 = vrot.lane.b32.xlu0 %v662_v3, %s1698_s12  ;;  %v983_v2 = vrot.slane %v1812_v6, 4  ;;  %v1949_v3 = vadd.s32 8, %v1943_v63  ;;  %vm627_vm3 = vcmp.le.s32.totalorder %v1945_v1, %v1943_v63 }
  0xdd   : > { %vm628_vm5 = vcmp.le.s32.totalorder %v1945_v1, %v1949_v3 }
  0xdf   : > { %688 = vrot.lane.b32.xlu0 %v684_v4, %s1698_s12  ;;  %v930_v4 = vrot.slane %v1824_v12, 4 }
 0x141   : > { %v732_v10 = vpop.permute.xlu1 %731 }
 0x142   : > { %v737_v32 = vadd.f32 %v732_v10, %v717_v18  ;;  %v987_v10 = vunpack.c.l.bf16 %v983_v2  ;;  %v934_v18 = vunpack.c.l.bf16 %v930_v4  ;;  %v1615_v4 = vld [vmem:[%s476_s13] ss:$8 sps:$4 sm:$0xff]  }
 0x143   : > { %1530 = vmatpush3.bf16.msra.mxu1 %v1615_v4 }
 0x144   : > { %1535 = vmatprep.subr.bf16.mxu1 %v1699_v57 }
 0x145   : > { %v734_v14 = vpop.permute.xlu0 %733  ;;  %v754_v15 = vpop.permute.xlu1 %753 }
 0x146   : > { %v759_v22 = vsub.f32 %v747_v16, %v754_v15  ;;  %v738_v33 = vadd.f32 %v734_v14, %v718_v21  ;;  %v984_v14 = vrot.slane %v1817_v8, 4 }
 0x148   : > { %v761_v37 = vsel %vm696_vm1, %v737_v32, %v759_v22 }
 0x149   : > { %v756_v28 = vpop.permute.xlu0 %755  ;;  %v669_v29 = vpop.permute.xlu1 %668 }
 0x14a   : > { %v760_v34 = vsub.f32 %v748_v23, %v756_v28  ;;  %v673_v44 = vadd.f32 %v669_v29, %v653_v42  ;;  %v989_v23 = vmul.f32 %v987_v10, %v987_v10  ;;  %v988_v28 = vunpack.c.l.bf16 %v984_v14 }
 0x14b   : > { %v929_v29 = vrot.slane %v1815_v7, 4 }
 0x14c   : > { %v762_v38 = vsel %vm696_vm1, %v738_v33, %v760_v34  ;;  %v936_v33 = vmul.f32 %v934_v18, %v934_v18  ;;  %v990_v34 = vmul.f32 %v988_v28, %v988_v28 }
 0x14d   : > { %v691_v39 = vpop.permute.xlu1 %690  ;;  %v667_v40 = vpop.permute.xlu0 %666  ;;  %v764_v41 = vpack.c.bf16 %v762_v38, %v761_v37  ;;  %v1702_v38 = vmov 0  }
 0x14e   : > { %v695_v43 = vsub.f32 %v683_v36, %v691_v39  ;;  %v672_v52 = vadd.f32 %v667_v40, %v652_v45  ;;  %v933_v36 = vunpack.c.l.bf16 %v929_v29  ;;  %1613 = vset.pattern.permute.xlu0 %v1702_v38  ;;  %1614 = vset.pattern.permute.xlu1 %v1702_v38  ;;  %v1972_v39 = vld [vmem:[#allocation2] sm:$0xff] }
 0x14f   : > { %1524 = vmatpush3.bf16.xpose.msra.mxu0 %v764_v41  ;;  %v1974_v41 = vld [vmem:[#allocation2 + $0x8] sm:$0xff] }
 0x150   : > { %1541 = vmatprep.subr.bf16.mxu0 %v1699_v57  ;;  %v698_v51 = vsel %vm696_vm1, %v673_v44, %v695_v43  ;;  %v935_v37 = vmul.f32 %v933_v36, %v933_v36 }
 0x151   : > { %v689_v49 = vpop.permute.xlu0 %688  ;;  %v700_v59 = vmul.f32 0.088388346, %v698_v51 }
 0x152   : > { %v694_v54 = vsub.f32 %v682_v48, %v689_v49 }
 0x154   : > { %v697_v56 = vsel %vm696_vm1, %v672_v52, %v694_v54 }
 0x155   : > { %v699_v60 = vmul.f32 0.088388346, %v697_v56 }
 0x157   : > { %v763_v58 = vpack.c.bf16 %v700_v59, %v699_v60 }
 0x159   : > { %1526 = vmatmul.mubr.bf16.vlgmr.msra.gmra.mrb[0].mxu0 %v763_v58 }
 0x15a   : > { %1543 = vmatprep.mubr.msk.bf16.mxu0 %vm1700_vm0, %v1699_v57 }
 0x22c   : > { %v799_v15 = vpop.f32.mrb[0].mxu0 }
 0x22d   : > { %v1960_v6 = vsel %vm627_vm3, %v799_v15, -1e+30  ;;  %v1527_v16 = vpop.f32.mrb[1].mxu0 }
 0x22e   : > { %v802_v21 = vpop.f32.mrb[2].mxu0  ;;  %v811_v12 = vsel %vm810_vm4, %v1960_v6, -inf }
 0x22f   : > { %v1967_v22 = vsel %vm628_vm5, %v802_v21, -1e+30  ;;  %812 = vmax.xlane.f32.xlu0 %v811_v12  ;;  %v1528_v8 = vpop.f32.mrb[3].mxu0  ;;  %v1617_v12 = vld [vmem:[%s476_s13 + $0x4] ss:$8 sps:$4 sm:$0xff]  }
 0x230   : > { %v814_v32 = vsel %vm810_vm4, %v1967_v22, -inf  ;;  %1542 = vmatpush3.bf16.msra.mxu0 %v1617_v12 }
 0x231   : > { %815 = vmax.xlane.f32.xlu1 %v814_v32 }
 0x233   : > { %991 = vadd.xlane.f32.xlu0 %v989_v23 }
 0x235   : > { %939 = vadd.xlane.f32.xlu1 %v936_v33 }
 0x237   : > { %993 = vadd.xlane.f32.xlu0 %v990_v34 }
 0x23b   : > { %937 = vadd.xlane.f32.xlu0 %v935_v37 }
 0x2bc   : > { %v813_v40 = vpop.xlane.xlu0 %812 }
 0x2bd   : > { %v1977_v7 = vmax.f32 %v1972_v39, %v813_v40 }
 0x2be   : > { %v816_v42 = vpop.xlane.xlu1 %815 }
 0x2bf   : > { %v819_v43 = vsub.f32 %v1972_v39, %v1977_v7  ;;  %925 = vst.msk [vmem:[#allocation2] sm:$0xff] %vm581_vm2, %v1977_v7  ;;  %v1984_v44 = vmax.f32 %v1974_v41, %v816_v42  ;;  %827 = vperm.xlu0 %1613, %v1977_v7   ;;  %v841_v39 = vld [vmem:[#allocation3] sm:$0xff] }
 0x2c0   : > { %v992_v45 = vpop.xlane.xlu0 %991 }
 0x2c1   : > { %v820_v48 = vsub.f32 %v1974_v41, %v1984_v44  ;;  %926 = vst.msk [vmem:[#allocation2 + $0x8] sm:$0xff] %vm581_vm2, %v1984_v44  ;;  %v995_v49 = vmul.f32 0.0078125, %v992_v45  ;;  %832 = vperm.xlu1 %1614, %v1984_v44  }
 0x2c2   : > { %v940_v51 = vpop.xlane.xlu1 %939 }
 0x2c3   : > { %v997_v52 = vadd.f32 1.1920929e-07, %v995_v49  ;;  %v942_v54 = vmul.f32 0.0078125, %v940_v51 }
 0x2c4   : > { %v994_v56 = vpop.xlane.xlu0 %993 }
 0x2c5   : > { %v944_v59 = vadd.f32 1.1920929e-07, %v942_v54  ;;  %v996_v60 = vmul.f32 0.0078125, %v994_v56  ;;  %1626 = vrsqrt.f32 %v997_v52 }
 0x2c7   : > { %1628 = vrsqrt.f32 %v944_v59  ;;  %v998_v58 = vadd.f32 1.1920929e-07, %v996_v60 }
 0x2c8   : > { %v938_v61 = vpop.xlane.xlu0 %937 }
 0x2c9   : > { %1630 = vrsqrt.f32 %v998_v58  ;;  %v941_v62 = vmul.f32 0.0078125, %v938_v61 }
 0x2cb   : > { %v943_v2 = vadd.f32 1.1920929e-07, %v941_v62 }
 0x2cd   : > { %1632 = vrsqrt.f32 %v943_v2 }
 0x2cf   : > { %v1627_v14 = vpop.eup %1626 }
 0x2d0   : > { %v1001_v16 = vmul.f32 %v1627_v14, %v987_v10 }
 0x2d1   : > { %v1629_v15 = vpop.eup %1628 }
 0x2d2   : > { %v948_v21 = vmul.f32 %v1629_v15, %v934_v18  ;;  %v1005_v23 = vmul.f32 %v1596_v47, %v1001_v16  ;;  %v1019_v18 = vmul.f32 %v1848_v26, %v1001_v16 }
 0x2d3   : > { %v1631_v8 = vpop.eup %1630 }
 0x2d4   : > { %v966_v29 = vmul.f32 %v1834_v20, %v948_v21  ;;  %v1002_v32 = vmul.f32 %v1631_v8, %v988_v28  ;;  %1009 = vrot.lane.b32.xlu1 %v1005_v23, %s1698_s12  ;;  %v952_v46 = vmul.f32 %v1602_v55, %v948_v21  ;;  %v964_v5 = vmul.f32 %v1612_v17, %v948_v21 }
 0x2d6   : > { %971 = vrot.lane.b32.xlu0 %v966_v29, %s1698_s12  ;;  %v1006_v10 = vmul.f32 %v1597_v50, %v1002_v32  ;;  %v1020_v47 = vmul.f32 %v1850_v27, %v1002_v32  ;;  %v1004_v49 = vmul.f32 %v1846_v25, %v1002_v32  ;;  %v950_v25 = vmul.f32 %v1860_v31, %v948_v21 }
 0x2d7   : > { %v1633_v33 = vpop.eup %1632 }
 0x2d8   : > { %1011 = vrot.lane.b32.xlu1 %v1006_v10, %s1698_s12  ;;  %v947_v34 = vmul.f32 %v1633_v33, %v933_v36 }
 0x2da   : > { %v951_v20 = vmul.f32 %v1601_v0, %v947_v34  ;;  %v965_v26 = vmul.f32 %v1832_v19, %v947_v34  ;;  %v1017_v19 = vmul.f32 %v1606_v11, %v1001_v16  ;;  %v963_v4 = vmul.f32 %v1611_v35, %v947_v34 }
 0x2dc   : > { %1023 = vrot.lane.b32.xlu1 %v1019_v18, %s1698_s12 }
 0x2e0   : > { %1025 = vrot.lane.b32.xlu1 %v1020_v47, %s1698_s12 }
 0x2e4   : > { %955 = vrot.lane.b32.xlu1 %v951_v20, %s1698_s12 }
 0x2e8   : > { %957 = vrot.lane.b32.xlu1 %v952_v46, %s1698_s12  ;;  %v1079_v46 = vld [vmem:[#allocation2 + $0x10] sm:$0xff] }
 0x2ec   : > { %969 = vrot.lane.b32.xlu1 %v965_v26, %s1698_s12 }
 0x33e   : > { %v828_v50 = vpop.permute.xlu0 %827 }
 0x33f   : > { %v835_v27 = vsub.f32 %v1960_v6, %v828_v50  ;;  %v1003_v6 = vmul.f32 %v1844_v24, %v1001_v16  ;;  %v1080_v50 = vld [vmem:[#allocation2 + $0x18] sm:$0xff] }
 0x340   : > { %v833_v28 = vpop.permute.xlu1 %832 }
 0x341   : > { %v837_v36 = vmul.f32 1.442695, %v835_v27  ;;  %v836_v37 = vsub.f32 %v1967_v22, %v833_v28  ;;  %v1018_v22 = vmul.f32 %v1607_v13, %v1002_v32 }
 0x343   : > { %v839_v38 = vmul.f32 1.442695, %v836_v37  ;;  %1634 = vpow2.f32 %v837_v36 }
 0x345   : > { %1636 = vpow2.f32 %v839_v38 }
 0x346   : > { %v1010_v0 = vpop.permute.xlu1 %1009 }
 0x347   : > { %v1015_v54 = vadd.f32 %v1010_v0, %v1003_v6 }
 0x348   : > { %v972_v61 = vpop.permute.xlu0 %971 }
 0x349   : > { %v976_v2 = vsub.f32 %v964_v5, %v972_v61 }
 0x34a   : > { %v1012_v40 = vpop.permute.xlu1 %1011 }
 0x34b   : > { %v1016_v56 = vadd.f32 %v1012_v40, %v1004_v49 }
 0x34d   : > { %v2016_v53 = vpop.eup %1634 }
 0x34e   : > { %v1024_v42 = vpop.permute.xlu1 %1023  ;;  %v845_v3 = vsel %vm810_vm4, %v2016_v53, 0.0 }
 0x34f   : > { %v1637_v55 = vpop.eup %1636  ;;  %v1029_v51 = vsub.f32 %v1017_v19, %v1024_v42 }
 0x350   : > { %v870_v45 = vpack.c.bf16 %v1637_v55, %v2016_v53  ;;  %v848_v1 = vsel %vm810_vm4, %v1637_v55, 0.0  ;;  %v823_v53 = vmul.f32 1.442695, %v820_v48 }
 0x351   : > { %v1031_v11 = vsel %vm696_vm1, %v1015_v54, %v1029_v51 }
 0x352   : > { %1532 = vmatmul.mubr.msk.bf16.vlgmr.msra.gmra.mrb[0].mxu1 %vm810_vm4, %v870_v45  ;;  %v1026_v52 = vpop.permute.xlu1 %1025 }
 0x353   : > { %1537 = vmatprep.mubr.msk.bf16.mxu1 %vm1700_vm0, %v1699_v57  ;;  %v1030_v59 = vsub.f32 %v1018_v22, %v1026_v52  ;;  %v949_v57 = vmul.f32 %v1858_v30, %v947_v34  ;;  %v821_v52 = vmul.f32 1.442695, %v819_v43 }
 0x355   : > { %v1032_v60 = vsel %vm696_vm1, %v1016_v56, %v1030_v59 }
 0x356   : > { %v1034_v24 = vpack.c.bf16 %v1032_v60, %v1031_v11  ;;  %v956_v58 = vpop.permute.xlu1 %955 }
 0x357   : > { %v961_v15 = vadd.f32 %v956_v58, %v949_v57  ;;  %v1113_v57 = vld [vmem:[#allocation3 + $0x18] sm:$0xff] }
 0x358   : > { %1536 = vmatpush3.bf16.xpose.msra.mxu1 %v1034_v24  ;;  %v842_v24 = vld [vmem:[#allocation3 + $0x8] sm:$0xff] }
 0x35a   : > { %v958_v62 = vpop.permute.xlu1 %957 }
 0x35b   : > { %v962_v13 = vadd.f32 %v958_v62, %v950_v25 }
 0x35d   : > { %v978_v16 = vsel %vm696_vm1, %v962_v13, %v976_v2  ;;  %v1112_v2 = vld [vmem:[#allocation3 + $0x10] sm:$0xff] }
 0x35e   : > { %v970_v14 = vpop.permute.xlu1 %969  ;;  %v980_v31 = vmul.f32 0.088388346, %v978_v16 }
 0x35f   : > { %v975_v12 = vsub.f32 %v963_v4, %v970_v14 }
 0x361   : > { %v977_v8 = vsel %vm696_vm1, %v961_v15, %v975_v12 }
 0x362   : > { %v979_v23 = vmul.f32 0.088388346, %v977_v8 }
 0x364   : > { %v1033_v29 = vpack.c.bf16 %v980_v31, %v979_v23 }
 0x366   : > { %1538 = vmatmul.mubr.bf16.vlgmr.msra.gmra.mrb[4].mxu1 %v1033_v29 }
 0x425   : > { %v2038_v32 = vpop.f32.mrb[0].mxu1 }
 0x426   : > { %v1533_v17 = vpop.f32.mrb[1].mxu1 }
 0x427   : > { %v2040_v21 = vpop.f32.mrb[2].mxu1 }
 0x428   : > { %v1534_v30 = vpop.f32.mrb[3].mxu1 }
 0x439   : > { %v1069_v10 = vpop.f32.mrb[4].mxu1 }
 0x43a   : > { %v1076_v9 = vsel %vm627_vm3, %v1069_v10, -1e+30  ;;  %v1539_v35 = vpop.f32.mrb[5].mxu1 }
 0x43b   : > { %v1072_v18 = vpop.f32.mrb[6].mxu1  ;;  %v1081_v33 = vsel %vm810_vm4, %v1076_v9, -inf }
 0x43c   : > { %v1077_v47 = vsel %vm628_vm5, %v1072_v18, -1e+30  ;;  %1082 = vmax.xlane.f32.xlu1 %v1081_v33  ;;  %v1540_v34 = vpop.f32.mrb[7].mxu1 }
 0x43d   : > { %v1084_v20 = vsel %vm810_vm4, %v1077_v47, -inf }
 0x43e   : > { %1085 = vmax.xlane.f32.xlu0 %v1084_v20 }
 0x4c9   : > { %v1083_v26 = vpop.xlane.xlu1 %1082 }
 0x4ca   : > { %v1087_v27 = vmax.f32 %v1079_v46, %v1083_v26 }
 0x4cb   : > { %v1086_v28 = vpop.xlane.xlu0 %1085 }
 0x4cc   : > { %v1089_v63 = vsub.f32 %v1079_v46, %v1087_v27  ;;  %1194 = vst.msk [vmem:[#allocation2 + $0x10] sm:$0xff] %vm581_vm2, %v1087_v27  ;;  %v1088_v36 = vmax.f32 %v1080_v50, %v1086_v28  ;;  %1097 = vperm.xlu0 %1613, %v1087_v27  }
 0x4ce   : > { %v1090_v37 = vsub.f32 %v1080_v50, %v1088_v36  ;;  %1195 = vst.msk [vmem:[#allocation2 + $0x18] sm:$0xff] %vm581_vm2, %v1088_v36  ;;  %1102 = vperm.xlu1 %1614, %v1088_v36   ;;  %v1091_v54 = vmul.f32 1.442695, %v1089_v63 }
 0x4d0   : > { %v1093_v56 = vmul.f32 1.442695, %v1090_v37 }
 0x4eb   : > { %849 = vadd.xlane.f32.xlu0 %v848_v1 }
 0x4f2   : > { %846 = vadd.xlane.f32.xlu1 %v845_v3 }
 0x54b   : > { %v1098_v38 = vpop.permute.xlu0 %1097 }
 0x54c   : > { %v1105_v0 = vsub.f32 %v1076_v9, %v1098_v38 }
 0x54d   : > { %v1103_v40 = vpop.permute.xlu1 %1102 }
 0x54e   : > { %v1107_v42 = vmul.f32 1.442695, %v1105_v0  ;;  %v1106_v19 = vsub.f32 %v1077_v47, %v1103_v40 }
 0x550   : > { %1638 = vpow2.f32 %v1107_v42  ;;  %v1109_v45 = vmul.f32 1.442695, %v1106_v19 }
 0x552   : > { %1640 = vpow2.f32 %v1109_v45 }
 0x553   : > { %1642 = vpow2.f32 %v823_v53 }
 0x554   : > { %1644 = vpow2.f32 %v821_v52 }
 0x555   : > { %1646 = vpow2.f32 %v1091_v54 }
 0x556   : > { %1648 = vpow2.f32 %v1093_v56 }
 0x55a   : > { %v1639_v6 = vpop.eup %1638 }
 0x55b   : > { %v1116_v49 = vsel %vm810_vm4, %v1639_v6, 0.0 }
 0x55c   : > { %v1641_v51 = vpop.eup %1640  ;;  %1117 = vadd.xlane.f32.xlu0 %v1116_v49 }
 0x55d   : > { %v1119_v55 = vsel %vm810_vm4, %v1641_v51, 0.0  ;;  %v1141_v22 = vpack.c.bf16 %v1641_v51, %v1639_v6  ;;  %v1643_v59 = vpop.eup %1642 }
 0x55e   : > { %1120 = vadd.xlane.f32.xlu1 %v1119_v55  ;;  %v1645_v11 = vpop.eup %1644  ;;  %v844_v41 = vmul.f32 %v1643_v59, %v842_v24 }
 0x55f   : > { %1544 = vmatmul.mubr.msk.bf16.vlgmr.msra.gmra.mrb[4].mxu0 %vm810_vm4, %v1141_v22  ;;  %v1647_v60 = vpop.eup %1646  ;;  %v843_v7 = vmul.f32 %v1645_v11, %v841_v39 }
 0x560   : > { %v1649_v58 = vpop.eup %1648  ;;  %v1114_v4 = vmul.f32 %v1647_v60, %v1112_v2 }
 0x561   : > { %v1115_v16 = vmul.f32 %v1649_v58, %v1113_v57 }
 0x56f   : > { %865 = vperm.xlu1 %1614, %v1643_v59  }
 0x572   : > { %860 = vperm.xlu0 %1613, %v1645_v11  }
 0x573   : > { %1131 = vperm.xlu1 %1614, %v1647_v60  }
 0x576   : > { %1136 = vperm.xlu0 %1613, %v1649_v58  }
 0x578   : > { %v850_v44 = vpop.xlane.xlu0 %849 }
 0x579   : > { %v852_v48 = vadd.f32 %v850_v44, %v844_v41 }
 0x57b   : > { %855 = vst.msk [vmem:[#allocation3 + $0x8] sm:$0xff] %vm581_vm2, %v852_v48 }
 0x57f   : > { %v847_v43 = vpop.xlane.xlu1 %846 }
 0x580   : > { %v851_v25 = vadd.f32 %v847_v43, %v843_v7 }
 0x582   : > { %854 = vst.msk [vmem:[#allocation3] sm:$0xff] %vm581_vm2, %v851_v25  ;;  %v1200_v61 = vld [vmem:[#allocation3 + $0x8] sm:$0xff] }
 0x583   : > { %1650 = vrcp.f32 %v1200_v61 }
 0x589   : > { %v1199_v62 = vld [vmem:[#allocation3] sm:$0xff] }
 0x58a   : > { %1652 = vrcp.f32 %v1199_v62 }
 0x58d   : > { %v1651_v5 = vpop.eup %1650 }
 0x58e   : > { %1212 = vperm.xlu0 %1613, %v1651_v5  }
 0x594   : > { %v1653_v13 = vpop.eup %1652 }
 0x595   : > { %1207 = vperm.xlu1 %1614, %v1653_v13  }
 0x5e9   : > { %v1118_v14 = vpop.xlane.xlu0 %1117 }
 0x5ea   : > { %v1122_v15 = vadd.f32 %v1118_v14, %v1114_v4 }
 0x5eb   : > { %v1121_v12 = vpop.xlane.xlu1 %1120 }
 0x5ec   : > { %1124 = vst.msk [vmem:[#allocation3 + $0x10] sm:$0xff] %vm581_vm2, %v1122_v15  ;;  %v1123_v8 = vadd.f32 %v1121_v12, %v1115_v16 }
 0x5ee   : > { %1125 = vst.msk [vmem:[#allocation3 + $0x18] sm:$0xff] %vm581_vm2, %v1123_v8 }
 0x5ef   : > { %v866_v10 = vpop.permute.xlu1 %865 }
 0x5f0   : > { %v869_v9 = vmul.f32 0.0, %v866_v10 }
 0x5f1   : > { %v861_v30 = vpop.permute.xlu0 %860 }
 0x5f2   : > { %v922_v18 = vadd.f32 %v2040_v21, %v869_v9  ;;  %v868_v34 = vmul.f32 0.0, %v861_v30 }
 0x5f3   : > { %v1228_v31 = vld [vmem:[#allocation3 + $0x10] sm:$0xff]  ;;  %v1132_v20 = vpop.permute.xlu1 %1131 }
 0x5f4   : > { %1654 = vrcp.f32 %v1228_v31  ;;  %v921_v26 = vadd.f32 %v2038_v32, %v868_v34  ;;  %v1139_v63 = vmul.f32 0.0, %v1132_v20 }
 0x5f5   : > { %v1229_v23 = vld [vmem:[#allocation3 + $0x18] sm:$0xff]  ;;  %v1137_v35 = vpop.permute.xlu0 %1136 }
 0x5f6   : > { %1656 = vrcp.f32 %v1229_v23  ;;  %v1140_v37 = vmul.f32 0.0, %v1137_v35 }
 0x5fe   : > { %v1655_v29 = vpop.eup %1654 }
 0x5ff   : > { %1237 = vperm.xlu1 %1614, %v1655_v29  }
 0x600   : > { %v1657_v17 = vpop.eup %1656 }
 0x601   : > { %1242 = vperm.xlu0 %1613, %v1657_v17  }
 0x60d   : > { %v1213_v33 = vpop.permute.xlu0 %1212 }
 0x60e   : > { %v1216_v47 = vmul.f32 %v1213_v33, %v922_v18 }
 0x610   : > { %v1496_v46 = vpack.c.bf16 %v1216_v47, %v1216_v47 }
 0x612   : > { %1226 = vst [vmem:[%s574_s30 + $0x8] sm:$0xf] %v1496_v46 }
 0x614   : > { %v1208_v50 = vpop.permute.xlu1 %1207 }
 0x615   : > { %v1215_v27 = vmul.f32 %v1208_v50, %v921_v26 }
 0x617   : > { %v1495_v28 = vpack.c.bf16 %v1215_v27, %v1215_v27 }
 0x619   : > { %1225 = vst [vmem:[%s574_s30] sm:$0xf] %v1495_v28 }
 0x632   : > { %v1183_v36 = vpop.f32.mrb[4].mxu0 }
 0x633   : > { %v1190_v21 = vadd.f32 %v1183_v36, %v1139_v63  ;;  %v1545_v1 = vpop.f32.mrb[5].mxu0 }
 0x634   : > { %v1186_v3 = vpop.f32.mrb[6].mxu0 }
 0x635   : > { %v1191_v38 = vadd.f32 %v1186_v3, %v1140_v37  ;;  %v1546_v0 = vpop.f32.mrb[7].mxu0 }
 0x67e   : > { %v1238_v40 = vpop.permute.xlu1 %1237 }
 0x67f   : > { %v1245_v42 = vmul.f32 %v1238_v40, %v1190_v21 }
 0x680   : > { %v1243_v19 = vpop.permute.xlu0 %1242 }
 0x681   : > { %v1497_v45 = vpack.c.bf16 %v1245_v42, %v1245_v42  ;;  %v1246_v6 = vmul.f32 %v1243_v19, %v1191_v38 }
 0x683   : > { %1255 = vst [vmem:[%s574_s30 + $0x4] sm:$0xf] %v1497_v45  ;;  %v1498_v49 = vpack.c.bf16 %v1246_v6, %v1246_v6 }
 0x685   : > { %1256 = vst [vmem:[%s574_s30 + $0xc] sm:$0xf] %v1498_v49 }
 0x686 PF: > { %s17_s28 = sadd.s32 1, %s1696_s28   ;;  %s2099_s24 = smov %s1684_s25 }
 0x687   : > { %p14_p10 = scmp.ge.s32.totalorder %s17_s28, 4   ;;  %s2100_s25 = smov %s1782_s10 }
 0x688   : > { %s2101_s26 = smov %s1692_s27  ;;  %s2102_s27 = smov %s2104_s29 }
 0x689   :  { %16 = sbr.rel (!%p14_p10) target bundleno = 3 (0x3), region = 242 }

// kernel: gpt_forward.20
= control target key start
LH: loop header
LB: loop body
LE: loop exit
PB: predicated region body
PF: predicated region fallthrough
CT: control target
= control target key end

     0   :  { %s1411_s12 = smov 0   ;;  %s1413_s13 = smov 0   ;;  %s1578_s0 = inlined_call_operand.vmem [shape: bf16[32,1024], index: 0, kind: input, shape index: {}]   ;;  %s1579_s1 = inlined_call_operand.vmem [shape: bf16[1024,256], index: 1, kind: input, shape index: {}]   ;;  %s1580_s2 = inlined_call_operand.vmem [shape: bf16[32,256], index: 2, kind: input, shape index: {}]   ;;  %s1581_s3 = inlined_call_operand.vmem [shape: bf16[32,256], index: 3, kind: output, shape index: {}]  }
   0x1   :  { %s1415_s14 = smov 0   ;;  %s1417_s15 = smov 0  }
   0x2   :  { %s1419_s16 = smov 0  }
   0x3 LB: > { %s25_s17 = sadd.s32 1, %s1384_s15  ;;  %p48_p1 = scmp.ne.s32.totalorder %s1376_s13, %s1372_s12  ;;  %s1388_s16 = sphi %s1419_s16, %s13_s16   ;;  %s1384_s15 = sphi %s1417_s15, %s1585_s15   ;;  %s1380_s14 = sphi %s1415_s14, %s1584_s14   ;;  %s1376_s13 = sphi %s1413_s13, %s1583_s13   ;;  %s1372_s12 = sphi %s1411_s12, %s1582_s12  }
   0x4   : > { %p26_p0 = scmp.ge.s32.totalorder %s25_s17, 2  ;;  %p49_p2 = scmp.eq.s32.totalorder %s1388_s16, 0 }
   0x5   : > { %s41_s19 = sadd.s32 1, %s1376_s13  ;;  %p1096_p5 = scmp.ge.s32.totalorder %s1388_s16, 2 }
   0x6   : > { %s1587_s17 = smov (%p26_p0, %s25_s17), 0  ;;  %p50_p3 = por %p49_p2, %p48_p1 }
   0x7   : > { %s37_s18 = ssub.s32 %s1384_s15, %s1587_s17  ;;  %173 = sbr.rel (%p1096_p5) target bundleno = 22 (0x16), region = 20 }
   0x8   : > { %p39_p4 = scmp.eq.s32.totalorder %s37_s18, 0 }
   0xa   : > { %s1446_s20 = scalar_select %p39_p4, %s1376_s13, %s41_s19  }
   0xe   : > { %176 = sbr.rel (!%p50_p3) target bundleno = 22 (0x16), region = 24  ;;  %s178_s21 = sand.u32 (%p50_p3), 1, %s1376_s13  }
   0xf   : > { %s1187_s22 = sshll.u32 (%p50_p3), %s1384_s15, 4  ;;  %s1097_s23 = sshll.u32 (%p50_p3), %s178_s21, 6 }
  0x10   : > { %s186_s26 = scalar_lea.vmem (%p50_p3), %s1578_s0, %s1187_s22  ;;  %s180_s27 = scalar_lea.vmem (%p50_p3), [#allocation3], %s1097_s23 }
  0x11   : > { %v199_v0 = vld [vmem:[%s186_s26] sm:$0xff] (%p50_p3)  ;;  %v201_v1 = vld [vmem:[%s186_s26 + $0x8] sm:$0xff] (%p50_p3) }
  0x12   : > { %v203_v2 = vld [vmem:[%s186_s26 + $0x20] sm:$0xff] (%p50_p3)  ;;  %200 = vst [vmem:[%s180_s27] sm:$0xff] (%p50_p3), %v199_v0  ;;  %202 = vst [vmem:[%s180_s27 + $0x8] sm:$0xff] (%p50_p3), %v201_v1  ;;  %v205_v3 = vld [vmem:[%s186_s26 + $0x28] sm:$0xff] (%p50_p3) }
  0x13   : > { %204 = vst [vmem:[%s180_s27 + $0x10] sm:$0xff] (%p50_p3), %v203_v2  ;;  %v207_v4 = vld [vmem:[%s186_s26 + $0x40] sm:$0xff] (%p50_p3)  ;;  %v209_v5 = vld [vmem:[%s186_s26 + $0x48] sm:$0xff] (%p50_p3)  ;;  %206 = vst [vmem:[%s180_s27 + $0x18] sm:$0xff] (%p50_p3), %v205_v3 }
  0x14   : > { %208 = vst [vmem:[%s180_s27 + $0x20] sm:$0xff] (%p50_p3), %v207_v4  ;;  %210 = vst [vmem:[%s180_s27 + $0x28] sm:$0xff] (%p50_p3), %v209_v5  ;;  %v211_v6 = vld [vmem:[%s186_s26 + $0x60] sm:$0xff] (%p50_p3)  ;;  %v213_v7 = vld [vmem:[%s186_s26 + $0x68] sm:$0xff] (%p50_p3) }
  0x15   : > { %212 = vst [vmem:[%s180_s27 + $0x30] sm:$0xff] %v211_v6  ;;  %214 = vst [vmem:[%s180_s27 + $0x38] sm:$0xff] %v213_v7 }
  0x16 PF: > { %p1100_p6 = scmp.ge.s32.totalorder %s1388_s16, 1  ;;  %p234_p7 = scmp.lt.s32.totalorder %s1388_s16, 3 }
  0x18   : > { %p235_p8 = pnand %p1100_p6, %p234_p7 }
  0x19   : > { %s241_s28 = sand.u32 (!%p235_p8), 1, %s1372_s12   ;;  %s1102_s29 = sshll.u32 (!%p235_p8), %s1380_s14, 6 }
  0x1a   : > { %238 = sbr.rel (%p235_p8) target bundleno = 346 (0x15a), region = 51  ;;  %s1101_s30 = sshll.u32 (!%p235_p8), %s241_s28, 6 }
  0x1b   : > { %p293_p9 = scmp.lt.s32.totalorder (!%p235_p8), %s1102_s29, 127  ;;  %s1463_s8 = scalar_lea.vmem (!%p235_p8), [#allocation3], %s1101_s30 }
  0x1c   : > { %p1105_p10 = scmp.ne.s32.totalorder (!%p235_p8), %s1380_s14, 0 }
  0x21   : > { %s1589_s29 = smov (!%p293_p9, %s1102_s29), 127  ;;  %330 = sbr.rel (%p1105_p10) target bundleno = 40 (0x28), region = 59 }
  0x22   : > { %s1188_s4 = sshll.u32 %s1589_s29, 3  ;;  %v1390_v8 = vmov (!%p1105_p10), 0.0  }
  0x23   : > { %s1461_s7 = scalar_lea.vmem %s1579_s1, %s1188_s4  ;;  %331 = vst [vmem:[#allocation2] sm:$0xff] (!%p1105_p10), %v1390_v8  ;;  %332 = vst [vmem:[#allocation2 + $0x8] sm:$0xff] (!%p1105_p10), %v1390_v8 }
  0x24   : > { %333 = vst [vmem:[#allocation2 + $0x10] sm:$0xff] (!%p1105_p10), %v1390_v8  ;;  %334 = vst [vmem:[#allocation2 + $0x18] sm:$0xff] (!%p1105_p10), %v1390_v8 }
  0x25   : > { %335 = vst [vmem:[#allocation2 + $0x20] sm:$0xff] (!%p1105_p10), %v1390_v8  ;;  %336 = vst [vmem:[#allocation2 + $0x28] sm:$0xff] (!%p1105_p10), %v1390_v8 }
  0x26   : > { %337 = vst [vmem:[#allocation2 + $0x30] sm:$0xff] (!%p1105_p10), %v1390_v8  ;;  %338 = vst [vmem:[#allocation2 + $0x38] sm:$0xff] (!%p1105_p10), %v1390_v8 }
  0x28 PF: > { %v1242_v9 = vld [vmem:[%s1461_s7 + $0x4] ss:$8 sps:$4 sm:$0xff]   ;;  %v1246_v11 = vld [vmem:[%s1461_s7] ss:$8 sps:$4 sm:$0xff]   ;;  %v1248_v13 = vld [vmem:[%s1461_s7 + $0x14] ss:$8 sps:$4 sm:$0xff]  }
  0x29   : > { %v1244_v10 = vld [vmem:[%s1461_s7 + $0x104] ss:$8 sps:$4 sm:$0xff]   ;;  %779 = vmatprep.subr.bf16.mxu1 %v1242_v9  ;;  %v1247_v12 = vld [vmem:[%s1461_s7 + $0x100] ss:$8 sps:$4 sm:$0xff]   ;;  %v1250_v14 = vld [vmem:[%s1461_s7 + $0x114] ss:$8 sps:$4 sm:$0xff]  }
  0x2a   : > { %832 = vmatprep.subr.bf16.mxu0 %v1244_v10  ;;  %780 = vmatpush1.bf16.msra.mxu1 %v1246_v11  ;;  %v1252_v15 = vld [vmem:[%s1461_s7 + $0x10] ss:$8 sps:$4 sm:$0xff]   ;;  %v1254_v17 = vld [vmem:[%s1461_s7 + $0x24] ss:$8 sps:$4 sm:$0xff]   ;;  %v1258_v19 = vld [vmem:[%s1461_s7 + $0x20] ss:$8 sps:$4 sm:$0xff]  }
  0x2b   : > { %833 = vmatpush1.bf16.msra.mxu0 %v1247_v12  ;;  %781 = vmatprep.subr.bf16.mxu1 %v1248_v13  ;;  %v1253_v16 = vld [vmem:[%s1461_s7 + $0x110] ss:$8 sps:$4 sm:$0xff]   ;;  %v1256_v18 = vld [vmem:[%s1461_s7 + $0x124] ss:$8 sps:$4 sm:$0xff]   ;;  %v1259_v20 = vld [vmem:[%s1461_s7 + $0x120] ss:$8 sps:$4 sm:$0xff]  }
  0x2c   : > { %834 = vmatprep.subr.bf16.mxu0 %v1250_v14  ;;  %v1260_v21 = vld [vmem:[%s1461_s7 + $0x34] ss:$8 sps:$4 sm:$0xff]   ;;  %v1264_v23 = vld [vmem:[%s1461_s7 + $0x30] ss:$8 sps:$4 sm:$0xff]   ;;  %v1266_v25 = vld [vmem:[%s1461_s7 + $0x44] ss:$8 sps:$4 sm:$0xff]  }
  0x2d   : > { %v1262_v22 = vld [vmem:[%s1461_s7 + $0x134] ss:$8 sps:$4 sm:$0xff]   ;;  %v1265_v24 = vld [vmem:[%s1461_s7 + $0x130] ss:$8 sps:$4 sm:$0xff]   ;;  %v1268_v26 = vld [vmem:[%s1461_s7 + $0x144] ss:$8 sps:$4 sm:$0xff]  }
  0x2e   : > { %782 = vmatpush1.bf16.msra.mxu1 %v1252_v15  ;;  %v1270_v27 = vld [vmem:[%s1461_s7 + $0x40] ss:$8 sps:$4 sm:$0xff]   ;;  %v1272_v29 = vld [vmem:[%s1461_s7 + $0x54] ss:$8 sps:$4 sm:$0xff]   ;;  %v1276_v31 = vld [vmem:[%s1461_s7 + $0x50] ss:$8 sps:$4 sm:$0xff]  }
  0x2f   : > { %835 = vmatpush1.bf16.msra.mxu0 %v1253_v16  ;;  %783 = vmatprep.subr.bf16.mxu1 %v1254_v17  ;;  %v1271_v28 = vld [vmem:[%s1461_s7 + $0x140] ss:$8 sps:$4 sm:$0xff]   ;;  %v1274_v30 = vld [vmem:[%s1461_s7 + $0x154] ss:$8 sps:$4 sm:$0xff]   ;;  %v1277_v32 = vld [vmem:[%s1461_s7 + $0x150] ss:$8 sps:$4 sm:$0xff]  }
  0x30   : > { %836 = vmatprep.subr.bf16.mxu0 %v1256_v18  ;;  %v1278_v33 = vld [vmem:[%s1461_s7 + $0x64] ss:$8 sps:$4 sm:$0xff]   ;;  %v1282_v35 = vld [vmem:[%s1461_s7 + $0x60] ss:$8 sps:$4 sm:$0xff]   ;;  %v1284_v37 = vld [vmem:[%s1461_s7 + $0x74] ss:$8 sps:$4 sm:$0xff]  }
  0x31   : > { %v1280_v34 = vld [vmem:[%s1461_s7 + $0x164] ss:$8 sps:$4 sm:$0xff]   ;;  %v1283_v36 = vld [vmem:[%s1461_s7 + $0x160] ss:$8 sps:$4 sm:$0xff]   ;;  %v1286_v38 = vld [vmem:[%s1461_s7 + $0x174] ss:$8 sps:$4 sm:$0xff]  }
  0x32   : > { %784 = vmatpush1.bf16.msra.mxu1 %v1258_v19  ;;  %v1288_v39 = vld [vmem:[%s1461_s7 + $0x70] ss:$8 sps:$4 sm:$0xff]   ;;  %v1290_v41 = vld [vmem:[%s1461_s7 + $0x84] ss:$8 sps:$4 sm:$0xff]   ;;  %v1294_v43 = vld [vmem:[%s1461_s7 + $0x80] ss:$8 sps:$4 sm:$0xff]  }
  0x33   : > { %837 = vmatpush1.bf16.msra.mxu0 %v1259_v20  ;;  %785 = vmatprep.subr.bf16.mxu1 %v1260_v21  ;;  %v1289_v40 = vld [vmem:[%s1461_s7 + $0x170] ss:$8 sps:$4 sm:$0xff]   ;;  %v1292_v42 = vld [vmem:[%s1461_s7 + $0x184] ss:$8 sps:$4 sm:$0xff]   ;;  %v1295_v44 = vld [vmem:[%s1461_s7 + $0x180] ss:$8 sps:$4 sm:$0xff]  }
  0x34   : > { %838 = vmatprep.subr.bf16.mxu0 %v1262_v22  ;;  %v1296_v45 = vld [vmem:[%s1461_s7 + $0x94] ss:$8 sps:$4 sm:$0xff]   ;;  %v1300_v47 = vld [vmem:[%s1461_s7 + $0x90] ss:$8 sps:$4 sm:$0xff]   ;;  %v1302_v49 = vld [vmem:[%s1461_s7 + $0xa4] ss:$8 sps:$4 sm:$0xff]  }
  0x35   : > { %v1298_v46 = vld [vmem:[%s1461_s7 + $0x194] ss:$8 sps:$4 sm:$0xff]   ;;  %v1301_v48 = vld [vmem:[%s1461_s7 + $0x190] ss:$8 sps:$4 sm:$0xff]   ;;  %v1304_v50 = vld [vmem:[%s1461_s7 + $0x1a4] ss:$8 sps:$4 sm:$0xff]  }
  0x36   : > { %786 = vmatpush1.bf16.msra.mxu1 %v1264_v23  ;;  %v1306_v51 = vld [vmem:[%s1461_s7 + $0xa0] ss:$8 sps:$4 sm:$0xff]   ;;  %v1308_v53 = vld [vmem:[%s1461_s7 + $0xb4] ss:$8 sps:$4 sm:$0xff]   ;;  %v1312_v55 = vld [vmem:[%s1461_s7 + $0xb0] ss:$8 sps:$4 sm:$0xff]  }
  0x37   : > { %839 = vmatpush1.bf16.msra.mxu0 %v1265_v24  ;;  %787 = vmatprep.subr.bf16.mxu1 %v1266_v25  ;;  %v1307_v52 = vld [vmem:[%s1461_s7 + $0x1a0] ss:$8 sps:$4 sm:$0xff]   ;;  %v1310_v54 = vld [vmem:[%s1461_s7 + $0x1b4] ss:$8 sps:$4 sm:$0xff]   ;;  %v1313_v56 = vld [vmem:[%s1461_s7 + $0x1b0] ss:$8 sps:$4 sm:$0xff]  }
  0x38   : > { %840 = vmatprep.subr.bf16.mxu0 %v1268_v26  ;;  %v1314_v57 = vld [vmem:[%s1461_s7 + $0xc4] ss:$8 sps:$4 sm:$0xff]   ;;  %v1318_v61 = vld [vmem:[%s1461_s7 + $0xc0] ss:$8 sps:$4 sm:$0xff]   ;;  %v1320_v63 = vld [vmem:[%s1461_s7 + $0xd4] ss:$8 sps:$4 sm:$0xff]  }
  0x39   : > { %v1340_v58 = vld [vmem:[%s1463_s8 + $0x4] ss:$16 sps:$4 sm:$0xff]   ;;  %v1343_v60 = vld [vmem:[%s1463_s8 + $0xc] ss:$16 sps:$4 sm:$0xff]   ;;  %v1319_v62 = vld [vmem:[%s1461_s7 + $0x1c0] ss:$8 sps:$4 sm:$0xff]  }
  0x3a   : > { %788 = vmatpush1.bf16.msra.mxu1 %v1270_v27  ;;  %v1316_v59 = vld [vmem:[%s1461_s7 + $0x1c4] ss:$8 sps:$4 sm:$0xff]   ;;  %811 = vmatprep.mubr.bf16.mxu1 %v1340_v58  ;;  %v1322_v0 = vld [vmem:[%s1461_s7 + $0x1d4] ss:$8 sps:$4 sm:$0xff]   ;;  %v1324_v1 = vld [vmem:[%s1461_s7 + $0xd0] ss:$8 sps:$4 sm:$0xff]  }
  0x3b   : > { %841 = vmatpush1.bf16.msra.mxu0 %v1271_v28  ;;  %789 = vmatprep.subr.bf16.mxu1 %v1272_v29  ;;  %v1325_v2 = vld [vmem:[%s1461_s7 + $0x1d0] ss:$8 sps:$4 sm:$0xff]   ;;  %v1326_v3 = vld [vmem:[%s1461_s7 + $0xe4] ss:$8 sps:$4 sm:$0xff]   ;;  %v1330_v5 = vld [vmem:[%s1461_s7 + $0xe0] ss:$8 sps:$4 sm:$0xff]  }
  0x3c   : > { %842 = vmatprep.subr.bf16.mxu0 %v1274_v30  ;;  %864 = vmatprep.mubr.bf16.mxu0 %v1343_v60  ;;  %v1328_v4 = vld [vmem:[%s1461_s7 + $0x1e4] ss:$8 sps:$4 sm:$0xff]   ;;  %v1331_v6 = vld [vmem:[%s1461_s7 + $0x1e0] ss:$8 sps:$4 sm:$0xff]   ;;  %v1332_v7 = vld [vmem:[%s1461_s7 + $0xf4] ss:$8 sps:$4 sm:$0xff]  }
  0x3d   : > { %v1334_v8 = vld [vmem:[%s1461_s7 + $0x1f4] ss:$8 sps:$4 sm:$0xff]   ;;  %v1336_v9 = vld [vmem:[%s1461_s7 + $0xf0] ss:$8 sps:$4 sm:$0xff]   ;;  %v339_v18 = vld [vmem:[#allocation2] sm:$0xff]  ;;  %p1178_p11 = scmp.ne.s32.totalorder %s1380_s14, 1 }
  0x3e   : > { %790 = vmatpush1.bf16.msra.mxu1 %v1276_v31  ;;  %v1337_v10 = vld [vmem:[%s1461_s7 + $0x1f0] ss:$8 sps:$4 sm:$0xff]   ;;  %v1344_v13 = vld [vmem:[%s1463_s8 + $0x24] ss:$16 sps:$4 sm:$0xff]   ;;  %v1346_v14 = vld [vmem:[%s1463_s8 + $0x2c] ss:$16 sps:$4 sm:$0xff]  }
  0x3f   : > { %843 = vmatpush1.bf16.msra.mxu0 %v1277_v32  ;;  %791 = vmatprep.subr.bf16.mxu1 %v1278_v33  ;;  %v1338_v11 = vld [vmem:[%s1463_s8] ss:$16 sps:$4 sm:$0xff]   ;;  %v1341_v12 = vld [vmem:[%s1463_s8 + $0x8] ss:$16 sps:$4 sm:$0xff]  }
  0x40   : > { %844 = vmatprep.subr.bf16.mxu0 %v1280_v34  ;;  %v1348_v15 = vld [vmem:[%s1463_s8 + $0x20] ss:$16 sps:$4 sm:$0xff]   ;;  %v1349_v16 = vld [vmem:[%s1463_s8 + $0x28] ss:$16 sps:$4 sm:$0xff]  }
  0x41   : > { %v340_v22 = vld [vmem:[#allocation2 + $0x8] sm:$0xff]  ;;  %v341_v26 = vld [vmem:[#allocation2 + $0x10] sm:$0xff]  ;;  %v342_v31 = vld [vmem:[#allocation2 + $0x18] sm:$0xff] }
  0x42   : > { %792 = vmatpush1.bf16.msra.mxu1 %v1282_v35 }
  0x43   : > { %845 = vmatpush1.bf16.msra.mxu0 %v1283_v36  ;;  %793 = vmatprep.subr.bf16.mxu1 %v1284_v37 }
  0x44   : > { %846 = vmatprep.subr.bf16.mxu0 %v1286_v38  ;;  %v343_v38 = vld [vmem:[#allocation2 + $0x20] sm:$0xff] }
  0x46   : > { %794 = vmatpush1.bf16.msra.mxu1 %v1288_v39 }
  0x47   : > { %847 = vmatpush1.bf16.msra.mxu0 %v1289_v40  ;;  %795 = vmatprep.subr.bf16.mxu1 %v1290_v41 }
  0x48   : > { %848 = vmatprep.subr.bf16.mxu0 %v1292_v42  ;;  %v344_v42 = vld [vmem:[#allocation2 + $0x28] sm:$0xff] }
  0x4a   : > { %796 = vmatpush1.bf16.msra.mxu1 %v1294_v43 }
  0x4b   : > { %849 = vmatpush1.bf16.msra.mxu0 %v1295_v44  ;;  %797 = vmatprep.subr.bf16.mxu1 %v1296_v45 }
  0x4c   : > { %850 = vmatprep.subr.bf16.mxu0 %v1298_v46  ;;  %v345_v46 = vld [vmem:[#allocation2 + $0x30] sm:$0xff] }
  0x4e   : > { %798 = vmatpush1.bf16.msra.mxu1 %v1300_v47 }
  0x4f   : > { %851 = vmatpush1.bf16.msra.mxu0 %v1301_v48  ;;  %799 = vmatprep.subr.bf16.mxu1 %v1302_v49 }
  0x50   : > { %852 = vmatprep.subr.bf16.mxu0 %v1304_v50 }
  0x52   : > { %800 = vmatpush1.bf16.msra.mxu1 %v1306_v51  ;;  %v346_v51 = vld [vmem:[#allocation2 + $0x38] sm:$0xff] }
  0x53   : > { %853 = vmatpush1.bf16.msra.mxu0 %v1307_v52  ;;  %801 = vmatprep.subr.bf16.mxu1 %v1308_v53 }
  0x54   : > { %854 = vmatprep.subr.bf16.mxu0 %v1310_v54 }
  0x56   : > { %802 = vmatpush1.bf16.msra.mxu1 %v1312_v55 }
  0x57   : > { %855 = vmatpush1.bf16.msra.mxu0 %v1313_v56  ;;  %803 = vmatprep.subr.bf16.mxu1 %v1314_v57 }
  0x58   : > { %856 = vmatprep.subr.bf16.mxu0 %v1316_v59  ;;  %v913_v59 = vld [vmem:[%s1580_s2] sm:$0xff] (!%p1178_p11) }
  0x59   : > { %v917_v60 = vunpack.c.l.bf16 (!%p1178_p11), %v913_v59 }
  0x5a   : > { %804 = vmatpush1.bf16.msra.mxu1 %v1318_v61  ;;  %v918_v61 = vunpack.c.h.bf16 (!%p1178_p11), %v913_v59 }
  0x5b   : > { %857 = vmatpush1.bf16.msra.mxu0 %v1319_v62  ;;  %805 = vmatprep.subr.bf16.mxu1 %v1320_v63 }
  0x5c   : > { %858 = vmatprep.subr.bf16.mxu0 %v1322_v0  ;;  %v914_v0 = vld [vmem:[%s1580_s2 + $0x8] sm:$0xff] (!%p1178_p11) }
  0x5e   : > { %806 = vmatpush1.bf16.msra.mxu1 %v1324_v1  ;;  %v919_v1 = vunpack.c.l.bf16 (!%p1178_p11), %v914_v0 }
  0x5f   : > { %859 = vmatpush1.bf16.msra.mxu0 %v1325_v2  ;;  %807 = vmatprep.subr.bf16.mxu1 %v1326_v3  ;;  %v920_v2 = vunpack.c.h.bf16 (!%p1178_p11), %v914_v0 }
  0x60   : > { %860 = vmatprep.subr.bf16.mxu0 %v1328_v4 }
  0x62   : > { %808 = vmatpush1.bf16.msra.mxu1 %v1330_v5  ;;  %v915_v5 = vld [vmem:[%s1580_s2 + $0x10] sm:$0xff] (!%p1178_p11) }
  0x63   : > { %861 = vmatpush1.bf16.msra.mxu0 %v1331_v6  ;;  %809 = vmatprep.subr.bf16.mxu1 %v1332_v7 }
  0x64   : > { %862 = vmatprep.subr.bf16.mxu0 %v1334_v8  ;;  %v921_v8 = vunpack.c.l.bf16 (!%p1178_p11), %v915_v5 }
  0x66   : > { %810 = vmatpush1.bf16.msra.mxu1 %v1336_v9  ;;  %v922_v9 = vunpack.c.h.bf16 (!%p1178_p11), %v915_v5 }
  0x67   : > { %863 = vmatpush1.bf16.msra.mxu0 %v1337_v10 }
  0x69   : > { %812 = vmatmul.mubr.bf16.vlgmr.msra.gmra.mrb[0].mxu1 %v1338_v11 }
  0x6a   : > { %865 = vmatmul.mubr.bf16.vlgmr.msra.gmra.mrb[0].mxu0 %v1341_v12  ;;  %821 = vmatprep.mubr.bf16.mxu1 %v1344_v13  ;;  %v916_v12 = vld [vmem:[%s1580_s2 + $0x18] sm:$0xff] (!%p1178_p11) }
  0x6b   : > { %874 = vmatprep.mubr.bf16.mxu0 %v1346_v14 }
  0x71   : > { %822 = vmatmul.mubr.bf16.gmra.mrb[4].mxu1 %v1348_v15  ;;  %v923_v15 = vunpack.c.l.bf16 (!%p1178_p11), %v916_v12 }
  0x72   : > { %875 = vmatmul.mubr.bf16.gmra.mrb[4].mxu0 %v1349_v16  ;;  %v924_v16 = vunpack.c.h.bf16 (!%p1178_p11), %v916_v12 }
 0x13c   : > { %v813_v17 = vpop.f32.mrb[0].mxu1 }
 0x13d   : > { %v866_v19 = vpop.f32.mrb[0].mxu0  ;;  %v815_v21 = vpop.f32.mrb[1].mxu1 }
 0x13e   : > { %v867_v20 = vadd.f32 %v866_v19, %v813_v17  ;;  %v868_v23 = vpop.f32.mrb[1].mxu0  ;;  %v817_v25 = vpop.f32.mrb[2].mxu1 }
 0x13f   : > { %v869_v24 = vadd.f32 %v868_v23, %v815_v21  ;;  %v870_v27 = vpop.f32.mrb[2].mxu0  ;;  %v819_v30 = vpop.f32.mrb[3].mxu1 }
 0x140   : > { %v885_v28 = vadd.f32 %v867_v20, %v339_v18  ;;  %v871_v29 = vadd.f32 %v870_v27, %v817_v25  ;;  %v872_v32 = vpop.f32.mrb[3].mxu0 }
 0x141   : > { %v886_v33 = vadd.f32 %v869_v24, %v340_v22  ;;  %v873_v34 = vadd.f32 %v872_v32, %v819_v30 }
 0x142   : > { %893 = vst [vmem:[#allocation2] sm:$0xff] %v885_v28  ;;  %v887_v35 = vadd.f32 %v871_v29, %v341_v26 }
 0x143   : > { %894 = vst [vmem:[#allocation2 + $0x8] sm:$0xff] %v886_v33  ;;  %v888_v36 = vadd.f32 %v873_v34, %v342_v31 }
 0x144   : > { %895 = vst [vmem:[#allocation2 + $0x10] sm:$0xff] %v887_v35  ;;  %v823_v37 = vpop.f32.mrb[4].mxu1 }
 0x145   : > { %896 = vst [vmem:[#allocation2 + $0x18] sm:$0xff] %v888_v36  ;;  %v876_v39 = vpop.f32.mrb[4].mxu0  ;;  %v825_v41 = vpop.f32.mrb[5].mxu1 }
 0x146   : > { %v877_v40 = vadd.f32 %v876_v39, %v823_v37  ;;  %v878_v43 = vpop.f32.mrb[5].mxu0  ;;  %v827_v45 = vpop.f32.mrb[6].mxu1 }
 0x147   : > { %v879_v44 = vadd.f32 %v878_v43, %v825_v41  ;;  %v880_v47 = vpop.f32.mrb[6].mxu0  ;;  %v829_v50 = vpop.f32.mrb[7].mxu1  ;;  %904 = sbr.rel (%p1178_p11) target bundleno = 346 (0x15a), region = 63 }
 0x148   : > { %v889_v48 = vadd.f32 %v877_v40, %v343_v38  ;;  %v881_v49 = vadd.f32 %v880_v47, %v827_v45  ;;  %v882_v52 = vpop.f32.mrb[7].mxu0 }
 0x149   : > { %v890_v53 = vadd.f32 %v879_v44, %v344_v42  ;;  %v883_v54 = vadd.f32 %v882_v52, %v829_v50  ;;  %v905_v57 = vld [vmem:[#allocation2] sm:$0xff] (!%p1178_p11) }
 0x14a   : > { %897 = vst [vmem:[#allocation2 + $0x20] sm:$0xff] %v889_v48  ;;  %v891_v55 = vadd.f32 %v881_v49, %v345_v46  ;;  %v906_v58 = vld [vmem:[#allocation2 + $0x8] sm:$0xff] (!%p1178_p11)  ;;  %v925_v6 = vadd.f32 (!%p1178_p11), %v917_v60, %v905_v57 }
 0x14b   : > { %898 = vst [vmem:[#allocation2 + $0x28] sm:$0xff] %v890_v53  ;;  %v892_v56 = vadd.f32 %v883_v54, %v346_v51  ;;  %v907_v62 = vld [vmem:[#allocation2 + $0x10] sm:$0xff] (!%p1178_p11)  ;;  %v926_v7 = vadd.f32 (!%p1178_p11), %v918_v61, %v906_v58 }
 0x14c   : > { %899 = vst [vmem:[#allocation2 + $0x30] sm:$0xff] %v891_v55  ;;  %v908_v63 = vld [vmem:[#allocation2 + $0x18] sm:$0xff] (!%p1178_p11)  ;;  %v927_v13 = vadd.f32 (!%p1178_p11), %v919_v1, %v907_v62 }
 0x14d   : > { %900 = vst [vmem:[#allocation2 + $0x38] sm:$0xff] %v892_v56  ;;  %v928_v14 = vadd.f32 (!%p1178_p11), %v920_v2, %v908_v63  ;;  %v1189_v17 = vpack.c.bf16 (!%p1178_p11), %v926_v7, %v925_v6 }
 0x14f   : > { %v1190_v20 = vpack.c.bf16 %v928_v14, %v927_v13  ;;  %957 = vst [vmem:[%s1581_s3] sm:$0xff] %v1189_v17 }
 0x151   : > { %v909_v3 = vld [vmem:[#allocation2 + $0x20] sm:$0xff]  ;;  %958 = vst [vmem:[%s1581_s3 + $0x8] sm:$0xff] %v1190_v20 }
 0x152   : > { %v910_v4 = vld [vmem:[#allocation2 + $0x28] sm:$0xff]  ;;  %v929_v18 = vadd.f32 %v921_v8, %v909_v3 }
 0x153   : > { %v911_v10 = vld [vmem:[#allocation2 + $0x30] sm:$0xff]  ;;  %v930_v19 = vadd.f32 %v922_v9, %v910_v4 }
 0x154   : > { %v912_v11 = vld [vmem:[#allocation2 + $0x38] sm:$0xff]  ;;  %v931_v21 = vadd.f32 %v923_v15, %v911_v10 }
 0x155   : > { %v932_v22 = vadd.f32 %v924_v16, %v912_v11  ;;  %v1191_v23 = vpack.c.bf16 %v930_v19, %v929_v18 }
 0x157   : > { %v1192_v24 = vpack.c.bf16 %v932_v22, %v931_v21  ;;  %959 = vst [vmem:[%s1581_s3 + $0x10] sm:$0xff] %v1191_v23 }
 0x159   : > { %960 = vst [vmem:[%s1581_s3 + $0x18] sm:$0xff] %v1192_v24 }
 0x15a PF: > { %s13_s16 = sadd.s32 1, %s1388_s16   ;;  %s1582_s12 = smov %s1376_s13 }
 0x15b   : > { %p10_p12 = scmp.ge.s32.totalorder %s13_s16, 4   ;;  %s1583_s13 = smov %s1446_s20 }
 0x15c   : > { %s1584_s14 = smov %s1384_s15  ;;  %s1585_s15 = smov %s1587_s17 }
 0x15d   :  { %12 = sbr.rel (!%p10_p12) target bundleno = 3 (0x3), region = 104 }

// kernel: gpt_forward.31
= control target key start
LH: loop header
LB: loop body
LE: loop exit
PB: predicated region body
PF: predicated region fallthrough
CT: control target
= control target key end

     0   :  { %s663_s0 = inlined_call_operand.vmem [shape: bf16[32,256], index: 0, kind: input, shape index: {}]   ;;  %s664_s1 = inlined_call_operand.vmem [shape: bf16[256,256], index: 1, kind: input, shape index: {}]   ;;  %s665_s2 = inlined_call_operand.hbm [shape: f32[32,256], index: 2, kind: output, shape index: {}]  }
   0x1   :  { %v14_v0 = vld [vmem:[%s663_s0 + $0x10] sm:$0xff]  ;;  %v12_v1 = vld [vmem:[%s663_s0] sm:$0xff]  ;;  %v15_v2 = vld [vmem:[%s663_s0 + $0x18] sm:$0xff] }
   0x2   :  { %v512_v3 = vunpack.c.l.bf16 %v14_v0  ;;  %v514_v4 = vunpack.c.h.bf16 %v14_v0  ;;  %v516_v5 = vunpack.c.l.bf16 %v12_v1  ;;  %v518_v6 = vunpack.c.h.bf16 %v12_v1  ;;  %v13_v7 = vld [vmem:[%s663_s0 + $0x8] sm:$0xff]  ;;  %v408_v18 = vld [vmem:[%s664_s1 + $0x14] ss:$8 sps:$4 sm:$0xff]   ;;  %v410_v25 = vld [vmem:[%s664_s1 + $0x10] ss:$8 sps:$4 sm:$0xff]  }
   0x3   :  { %v523_v8 = vunpack.c.l.bf16 %v15_v2  ;;  %v525_v9 = vunpack.c.h.bf16 %v15_v2  ;;  %v527_v10 = vunpack.c.l.bf16 %v13_v7  ;;  %v529_v11 = vunpack.c.h.bf16 %v13_v7  ;;  %v405_v12 = vld [vmem:[%s664_s1 + $0x4] ss:$8 sps:$4 sm:$0xff]   ;;  %v407_v13 = vld [vmem:[%s664_s1] ss:$8 sps:$4 sm:$0xff]   ;;  %v414_v30 = vld [vmem:[%s664_s1 + $0x34] ss:$8 sps:$4 sm:$0xff]  }
   0x4   :  { %v28_v14 = vmul.f32 %v512_v3, %v512_v3  ;;  %v29_v15 = vmul.f32 %v514_v4, %v514_v4  ;;  %v24_v16 = vmul.f32 %v516_v5, %v516_v5  ;;  %v25_v17 = vmul.f32 %v518_v6, %v518_v6  ;;  %261 = vmatprep.subr.bf16.mxu0 %v405_v12  ;;  %v411_v26 = vld [vmem:[%s664_s1 + $0x24] ss:$8 sps:$4 sm:$0xff]   ;;  %v413_v29 = vld [vmem:[%s664_s1 + $0x20] ss:$8 sps:$4 sm:$0xff]   ;;  %v416_v31 = vld [vmem:[%s664_s1 + $0x30] ss:$8 sps:$4 sm:$0xff]  }
   0x5   :  { %v30_v19 = vmul.f32 %v523_v8, %v523_v8  ;;  %v31_v20 = vmul.f32 %v525_v9, %v525_v9  ;;  %v26_v21 = vmul.f32 %v527_v10, %v527_v10  ;;  %v27_v22 = vmul.f32 %v529_v11, %v529_v11  ;;  %370 = vmatprep.subr.bf16.mxu1 %v405_v12  ;;  %v417_v32 = vld [vmem:[%s664_s1 + $0x44] ss:$8 sps:$4 sm:$0xff]   ;;  %v419_v33 = vld [vmem:[%s664_s1 + $0x40] ss:$8 sps:$4 sm:$0xff]   ;;  %v420_v34 = vld [vmem:[%s664_s1 + $0x54] ss:$8 sps:$4 sm:$0xff]  }
   0x6   :  { %v38_v23 = vadd.f32 %v29_v15, %v28_v14  ;;  %v32_v24 = vadd.f32 %v25_v17, %v24_v16  ;;  %262 = vmatpush1.bf16.msra.mxu0 %v407_v13  ;;  %386 = vmatpush1.bf16.msra.mxu1 %v407_v13 }
   0x7   :  { %263 = vmatprep.subr.bf16.mxu0 %v408_v18  ;;  %v41_v27 = vadd.f32 %v31_v20, %v30_v19  ;;  %v35_v28 = vadd.f32 %v27_v22, %v26_v21  ;;  %371 = vmatprep.subr.bf16.mxu1 %v408_v18 }
   0x8   :  { %39 = vadd.xlane.f32.xlu1 %v38_v23  ;;  %33 = vadd.xlane.f32.xlu0 %v32_v24 }
   0xa   :  { %264 = vmatpush1.bf16.msra.mxu0 %v410_v25  ;;  %387 = vmatpush1.bf16.msra.mxu1 %v410_v25 }
   0xb   :  { %265 = vmatprep.subr.bf16.mxu0 %v411_v26  ;;  %372 = vmatprep.subr.bf16.mxu1 %v411_v26 }
   0xc   :  { %42 = vadd.xlane.f32.xlu1 %v41_v27  ;;  %36 = vadd.xlane.f32.xlu0 %v35_v28 }
   0xe   :  { %266 = vmatpush1.bf16.msra.mxu0 %v413_v29  ;;  %388 = vmatpush1.bf16.msra.mxu1 %v413_v29 }
   0xf   :  { %267 = vmatprep.subr.bf16.mxu0 %v414_v30  ;;  %373 = vmatprep.subr.bf16.mxu1 %v414_v30 }
  0x12   :  { %268 = vmatpush1.bf16.msra.mxu0 %v416_v31  ;;  %389 = vmatpush1.bf16.msra.mxu1 %v416_v31 }
  0x13   :  { %269 = vmatprep.subr.bf16.mxu0 %v417_v32 }
  0x14   :  { %7 = vsyncpa [#allocation3], 0  ;;  %374 = vmatprep.subr.bf16.mxu1 %v417_v32  ;;  %v422_v35 = vld [vmem:[%s664_s1 + $0x50] ss:$8 sps:$4 sm:$0xff]   ;;  %v423_v36 = vld [vmem:[%s664_s1 + $0x64] ss:$8 sps:$4 sm:$0xff]  }
  0x15   :  { %v425_v37 = vld [vmem:[%s664_s1 + $0x60] ss:$8 sps:$4 sm:$0xff]   ;;  %v426_v38 = vld [vmem:[%s664_s1 + $0x74] ss:$8 sps:$4 sm:$0xff]   ;;  %v428_v39 = vld [vmem:[%s664_s1 + $0x70] ss:$8 sps:$4 sm:$0xff]  }
  0x16   :  { %270 = vmatpush1.bf16.msra.mxu0 %v419_v33  ;;  %390 = vmatpush1.bf16.msra.mxu1 %v419_v33  ;;  %v429_v40 = vld [vmem:[%s664_s1 + $0x84] ss:$8 sps:$4 sm:$0xff]   ;;  %v431_v41 = vld [vmem:[%s664_s1 + $0x80] ss:$8 sps:$4 sm:$0xff]   ;;  %v432_v42 = vld [vmem:[%s664_s1 + $0x94] ss:$8 sps:$4 sm:$0xff]  }
  0x17   :  { %271 = vmatprep.subr.bf16.mxu0 %v420_v34  ;;  %375 = vmatprep.subr.bf16.mxu1 %v420_v34  ;;  %v434_v43 = vld [vmem:[%s664_s1 + $0x90] ss:$8 sps:$4 sm:$0xff]   ;;  %v435_v44 = vld [vmem:[%s664_s1 + $0xa4] ss:$8 sps:$4 sm:$0xff]   ;;  %v437_v45 = vld [vmem:[%s664_s1 + $0xa0] ss:$8 sps:$4 sm:$0xff]  }
  0x18   :  { %v438_v46 = vld [vmem:[%s664_s1 + $0xb4] ss:$8 sps:$4 sm:$0xff]   ;;  %v440_v47 = vld [vmem:[%s664_s1 + $0xb0] ss:$8 sps:$4 sm:$0xff]   ;;  %v441_v48 = vld [vmem:[%s664_s1 + $0xc4] ss:$8 sps:$4 sm:$0xff]  }
  0x19   :  { %v443_v49 = vld [vmem:[%s664_s1 + $0xc0] ss:$8 sps:$4 sm:$0xff]   ;;  %v444_v50 = vld [vmem:[%s664_s1 + $0xd4] ss:$8 sps:$4 sm:$0xff]   ;;  %v446_v51 = vld [vmem:[%s664_s1 + $0xd0] ss:$8 sps:$4 sm:$0xff]  }
  0x1a   :  { %272 = vmatpush1.bf16.msra.mxu0 %v422_v35  ;;  %391 = vmatpush1.bf16.msra.mxu1 %v422_v35  ;;  %v447_v52 = vld [vmem:[%s664_s1 + $0xe4] ss:$8 sps:$4 sm:$0xff]   ;;  %v449_v53 = vld [vmem:[%s664_s1 + $0xe0] ss:$8 sps:$4 sm:$0xff]   ;;  %v450_v54 = vld [vmem:[%s664_s1 + $0xf4] ss:$8 sps:$4 sm:$0xff]  }
  0x1b   :  { %273 = vmatprep.subr.bf16.mxu0 %v423_v36  ;;  %376 = vmatprep.subr.bf16.mxu1 %v423_v36  ;;  %v452_v55 = vld [vmem:[%s664_s1 + $0xf0] ss:$8 sps:$4 sm:$0xff]   ;;  %s485_s1 = smov [#allocation2]  }
  0x1c   :  { %s327_s22 = sshll.u32 %s485_s1, 4  ;;  %s328_s22 = int_to_ptr.vmem [resolvable:$true] %s327_s22 }
  0x1d   :  { %s461_s23 = scalar_lea.vmem %s328_s22, 1024  ;;  %p466_p1 = scmp.lt.s32.totalorder %s328_s22, %s328_s22 }
  0x1e   :  { %274 = vmatpush1.bf16.msra.mxu0 %v425_v37  ;;  %392 = vmatpush1.bf16.msra.mxu1 %v425_v37  ;;  %p462_p0 = scmp.ne.s32.totalorder %s328_s22, %s461_s23  ;;  %p467_p2 = scmp.lt.s32.totalorder %s461_s23, %s461_s23 }
  0x1f   :  { %275 = vmatprep.subr.bf16.mxu0 %v426_v38  ;;  %377 = vmatprep.subr.bf16.mxu1 %v426_v38 }
  0x20   :  { %p468_p3 = por %p467_p2, %p466_p1 }
  0x22   :  { %276 = vmatpush1.bf16.msra.mxu0 %v428_v39  ;;  %393 = vmatpush1.bf16.msra.mxu1 %v428_v39  ;;  %p469_p4 = pnand %p468_p3, %p462_p0 }
  0x23   :  { %277 = vmatprep.subr.bf16.mxu0 %v429_v40  ;;  %378 = vmatprep.subr.bf16.mxu1 %v429_v40 }
  0x26   :  { %278 = vmatpush1.bf16.msra.mxu0 %v431_v41  ;;  %394 = vmatpush1.bf16.msra.mxu1 %v431_v41 }
  0x27   :  { %279 = vmatprep.subr.bf16.mxu0 %v432_v42  ;;  %379 = vmatprep.subr.bf16.mxu1 %v432_v42 }
  0x2a   :  { %280 = vmatpush1.bf16.msra.mxu0 %v434_v43  ;;  %395 = vmatpush1.bf16.msra.mxu1 %v434_v43 }
  0x2b   :  { %281 = vmatprep.subr.bf16.mxu0 %v435_v44  ;;  %380 = vmatprep.subr.bf16.mxu1 %v435_v44 }
  0x2e   :  { %282 = vmatpush1.bf16.msra.mxu0 %v437_v45  ;;  %396 = vmatpush1.bf16.msra.mxu1 %v437_v45 }
  0x2f   :  { %283 = vmatprep.subr.bf16.mxu0 %v438_v46  ;;  %381 = vmatprep.subr.bf16.mxu1 %v438_v46 }
  0x32   :  { %284 = vmatpush1.bf16.msra.mxu0 %v440_v47  ;;  %397 = vmatpush1.bf16.msra.mxu1 %v440_v47 }
  0x33   :  { %285 = vmatprep.subr.bf16.mxu0 %v441_v48  ;;  %382 = vmatprep.subr.bf16.mxu1 %v441_v48 }
  0x36   :  { %286 = vmatpush1.bf16.msra.mxu0 %v443_v49  ;;  %398 = vmatpush1.bf16.msra.mxu1 %v443_v49 }
  0x37   :  { %287 = vmatprep.subr.bf16.mxu0 %v444_v50  ;;  %383 = vmatprep.subr.bf16.mxu1 %v444_v50 }
  0x3a   :  { %288 = vmatpush1.bf16.msra.mxu0 %v446_v51  ;;  %399 = vmatpush1.bf16.msra.mxu1 %v446_v51 }
  0x3b   :  { %289 = vmatprep.subr.bf16.mxu0 %v447_v52  ;;  %384 = vmatprep.subr.bf16.mxu1 %v447_v52 }
  0x3e   :  { %290 = vmatpush1.bf16.msra.mxu0 %v449_v53  ;;  %400 = vmatpush1.bf16.msra.mxu1 %v449_v53 }
  0x3f   :  { %291 = vmatprep.subr.bf16.mxu0 %v450_v54  ;;  %385 = vmatprep.subr.bf16.mxu1 %v450_v54 }
  0x42   :  { %292 = vmatpush1.bf16.msra.mxu0 %v452_v55  ;;  %401 = vmatpush1.bf16.msra.mxu1 %v452_v55 }
  0x95   :  { %v40_v56 = vpop.xlane.xlu1 %39  ;;  %v34_v57 = vpop.xlane.xlu0 %33 }
  0x96   :  { %v47_v58 = vmul.f32 0.00390625, %v40_v56  ;;  %v45_v59 = vmul.f32 0.00390625, %v34_v57 }
  0x98   :  { %v51_v60 = vadd.f32 1.1920929e-07, %v47_v58  ;;  %v49_v61 = vadd.f32 1.1920929e-07, %v45_v59 }
  0x99   :  { %v43_v62 = vpop.xlane.xlu1 %42  ;;  %v37_v63 = vpop.xlane.xlu0 %36 }
  0x9a   :  { %v48_v0 = vmul.f32 0.00390625, %v43_v62  ;;  %v46_v1 = vmul.f32 0.00390625, %v37_v63  ;;  %453 = vrsqrt.f32 %v51_v60 }
  0x9b   :  { %455 = vrsqrt.f32 %v49_v61 }
  0x9c   :  { %v52_v2 = vadd.f32 1.1920929e-07, %v48_v0  ;;  %v50_v7 = vadd.f32 1.1920929e-07, %v46_v1 }
  0x9e   :  { %457 = vrsqrt.f32 %v52_v2 }
  0x9f   :  { %459 = vrsqrt.f32 %v50_v7 }
  0xa4   :  { %v454_v12 = vpop.eup %453 }
  0xa5   :  { %v456_v13 = vpop.eup %455  ;;  %v62_v16 = vmul.f32 %v454_v12, %v514_v4  ;;  %v61_v18 = vmul.f32 %v454_v12, %v512_v3 }
  0xa6   :  { %v58_v20 = vmul.f32 %v456_v13, %v518_v6  ;;  %v57_v22 = vmul.f32 %v456_v13, %v516_v5 }
  0xa8   :  { %v458_v14 = vpop.eup %457 }
  0xa9   :  { %v460_v15 = vpop.eup %459  ;;  %v64_v17 = vmul.f32 %v458_v14, %v525_v9  ;;  %v63_v19 = vmul.f32 %v458_v14, %v523_v8 }
  0xaa   :  { %v60_v21 = vmul.f32 %v460_v15, %v529_v11  ;;  %v59_v23 = vmul.f32 %v460_v15, %v527_v10 }
  0xab   :  { %v68_v24 = vpack.c.bf16 %v64_v17, %v62_v16  ;;  %v67_v25 = vpack.c.bf16 %v63_v19, %v61_v18 }
  0xac   :  { %v66_v26 = vpack.c.bf16 %v60_v21, %v58_v20  ;;  %v65_v27 = vpack.c.bf16 %v59_v23, %v57_v22 }
  0xad   :  { %303 = vmatprep.mubr.bf16.mxu1 %v68_v24 }
  0xae   :  { %293 = vmatprep.mubr.bf16.mxu0 %v66_v26  ;;  %304 = vmatmul.mubr.bf16.vlgmr.msra.gmra.mrb[0].mxu1 %v67_v25 }
  0xaf   :  { %294 = vmatmul.mubr.bf16.vlgmr.msra.gmra.mrb[0].mxu0 %v65_v27 }
 0x181   :  { %v305_v3 = vpop.f32.mrb[0].mxu1 }
 0x182   :  { %v295_v4 = vpop.f32.mrb[0].mxu0  ;;  %318 = vst [vmem:[#allocation2 + $0x20] sm:$0xff] %v305_v3  ;;  %v307_v6 = vpop.f32.mrb[1].mxu1 }
 0x183   :  { %314 = vst [vmem:[#allocation2] sm:$0xff] %v295_v4  ;;  %v297_v8 = vpop.f32.mrb[1].mxu0  ;;  %319 = vst [vmem:[#allocation2 + $0x28] sm:$0xff] %v307_v6  ;;  %v309_v5 = vpop.f32.mrb[2].mxu1 }
 0x184   :  { %315 = vst [vmem:[#allocation2 + $0x8] sm:$0xff] %v297_v8  ;;  %v299_v9 = vpop.f32.mrb[2].mxu0  ;;  %320 = vst [vmem:[#allocation2 + $0x30] sm:$0xff] %v309_v5  ;;  %v311_v10 = vpop.f32.mrb[3].mxu1 }
 0x185   :  { %316 = vst [vmem:[#allocation2 + $0x10] sm:$0xff] %v299_v9  ;;  %v301_v11 = vpop.f32.mrb[3].mxu0  ;;  %321 = vst [vmem:[#allocation2 + $0x38] sm:$0xff] %v311_v10 }
 0x186   :  { %317 = vst [vmem:[#allocation2 + $0x18] sm:$0xff] %v301_v11 }
 0x187   :  { %472 = shalt.err (!%p469_p4)
}
 0x188   :  { %s473_s26 = scalar_lea.hbm %s665_s2, 1024 }
 0x189   :  { %p474_p5 = scmp.ne.s32.totalorder %s665_s2, %s473_s26  ;;  %p477_p6 = scmp.lt.u32.totalorder %s473_s26, %s665_s2 }
 0x18b   :  { %p479_p7 = pnand %p477_p6, %p474_p5 }
 0x18d   :  { %482 = shalt.err (!%p479_p7)
}
 0x18e   :  { %s486_s3 = smov 256   ;;  %s487_s4 = smov 16  }
 0x18f   :  { %333 = dma.vmem_to_hbm [thread:$0]  %s328_s22, 1024, %s665_s2, [#allocation3], %s486_s3, %s486_s3, %s487_s4  }
 0x190   :  { %483 = dma.done.wait [#allocation3], 1024  }
 0x191   :  { %484 = vsyncadd [#allocation3], 4294966272 }
 0x192   :  { %337 = vsyncpa [#allocation3], 1 }

// kernel: gpt_forward.21
= control target key start
LH: loop header
LB: loop body
LE: loop exit
PB: predicated region body
PF: predicated region fallthrough
CT: control target
= control target key end

     0   :  { %s1353_s9 = smov 0   ;;  %s1355_s10 = smov 0   ;;  %s1681_s0 = inlined_call_operand.vmem [shape: bf16[32,256], index: 0, kind: input, shape index: {}]   ;;  %s1682_s1 = inlined_call_operand.vmem [shape: bf16[256,768], index: 1, kind: input, shape index: {}]   ;;  %s1683_s2 = inlined_call_operand.vmem [shape: bf16[32,768], index: 2, kind: output, shape index: {}]  }
   0x1   :  { %s1357_s11 = smov 0   ;;  %s1359_s12 = smov 0  }
   0x2   :  { %s1361_s13 = smov 0  }
   0x3 LB: > { %s21_s14 = sadd.s32 1, %s1332_s12  ;;  %s1007_s15 = sadd.s32 4294967295, %s1336_s13   ;;  %s1336_s13 = sphi %s1361_s13, %s12_s13   ;;  %s1332_s12 = sphi %s1359_s12, %s1688_s12   ;;  %s1328_s11 = sphi %s1357_s11, %s1687_s11   ;;  %s1324_s10 = sphi %s1355_s10, %s1686_s10   ;;  %s1320_s9 = sphi %s1353_s9, %s1685_s9  }
   0x4   : > { %p22_p0 = scmp.ge.s32.totalorder %s21_s14, 2  ;;  %p64_p1 = scmp.ne.s32.totalorder %s1324_s10, %s1320_s9 }
   0x5   : > { %p65_p2 = scmp.eq.s32.totalorder %s1336_s13, 0  ;;  %p96_p4 = scmp.eq.s32.totalorder %s1007_s15, 1 }
   0x6   : > { %s1690_s14 = smov (%p22_p0, %s21_s14), 0  ;;  %s57_s17 = sadd.s32 1, %s1324_s10 }
   0x7   : > { %p66_p3 = por %p65_p2, %p64_p1  ;;  %s54_s16 = ssub.s32 %s1332_s12, %s1690_s14 }
   0x8   : > { %p55_p5 = scmp.eq.s32.totalorder %s54_s16, 0  ;;  %p1388_p6 = por %p96_p4, %p64_p1 }
   0x9   : > { %p1011_p7 = scmp.ge.s32.totalorder %s1336_s13, 2 }
   0xa   : > { %s1393_s19 = scalar_select %p55_p5, %s1324_s10, %s57_s17  }
   0xb   : > { %128 = sbr.rel (%p1011_p7) target bundleno = 60 (0x3c), region = 20 }
  0x12   : > { %131 = sbr.rel (!%p66_p3) target bundleno = 60 (0x3c), region = 24  ;;  %s133_s20 = sand.u32 (%p66_p3), 1, %s1324_s10  }
  0x13   : > { %s1145_s21 = smul.u32 (%p66_p3), 12, %s1332_s12 }
  0x14   : > { %s1183_s22 = smul.u32 (%p66_p3), 384, %s133_s20 }
  0x15   : > { %s1401_s25 = scalar_lea.vmem (%p66_p3), %s1682_s1, %s1145_s21 }
  0x16   : > { %v153_v0 = vld [vmem:[%s1401_s25] sm:$0xff] (%p66_p3)  ;;  %v155_v1 = vld [vmem:[%s1401_s25 + $0x18] sm:$0xff] (%p66_p3)  ;;  %v157_v2 = vld [vmem:[%s1401_s25 + $0x30] sm:$0xff] (%p66_p3)  ;;  %s1406_s26 = scalar_lea.vmem (%p66_p3), [#allocation2], %s1183_s22 }
  0x17   : > { %154 = vst [vmem:[%s1406_s26] sm:$0xff] (%p66_p3), %v153_v0  ;;  %156 = vst [vmem:[%s1406_s26 + $0xc] sm:$0xff] (%p66_p3), %v155_v1  ;;  %v159_v3 = vld [vmem:[%s1401_s25 + $0x48] sm:$0xff] (%p66_p3)  ;;  %v161_v4 = vld [vmem:[%s1401_s25 + $0x60] sm:$0xff] (%p66_p3) }
  0x18   : > { %158 = vst [vmem:[%s1406_s26 + $0x18] sm:$0xff] (%p66_p3), %v157_v2  ;;  %v163_v5 = vld [vmem:[%s1401_s25 + $0x78] sm:$0xff] (%p66_p3)  ;;  %160 = vst [vmem:[%s1406_s26 + $0x24] sm:$0xff] (%p66_p3), %v159_v3  ;;  %v165_v6 = vld [vmem:[%s1401_s25 + $0x90] sm:$0xff] (%p66_p3) }
  0x19   : > { %162 = vst [vmem:[%s1406_s26 + $0x30] sm:$0xff] %v161_v4  ;;  %164 = vst [vmem:[%s1406_s26 + $0x3c] sm:$0xff] %v163_v5  ;;  %v167_v7 = vld [vmem:[%s1401_s25 + $0xa8] sm:$0xff]  ;;  %v169_v8 = vld [vmem:[%s1401_s25 + $0xc0] sm:$0xff] }
  0x1a   : > { %166 = vst [vmem:[%s1406_s26 + $0x48] sm:$0xff] %v165_v6  ;;  %168 = vst [vmem:[%s1406_s26 + $0x54] sm:$0xff] %v167_v7  ;;  %v171_v9 = vld [vmem:[%s1401_s25 + $0xd8] sm:$0xff]  ;;  %v173_v10 = vld [vmem:[%s1401_s25 + $0xf0] sm:$0xff] }
  0x1b   : > { %170 = vst [vmem:[%s1406_s26 + $0x60] sm:$0xff] %v169_v8  ;;  %v175_v11 = vld [vmem:[%s1401_s25 + $0x108] sm:$0xff]  ;;  %172 = vst [vmem:[%s1406_s26 + $0x6c] sm:$0xff] %v171_v9  ;;  %v177_v12 = vld [vmem:[%s1401_s25 + $0x120] sm:$0xff] }
  0x1c   : > { %174 = vst [vmem:[%s1406_s26 + $0x78] sm:$0xff] %v173_v10  ;;  %176 = vst [vmem:[%s1406_s26 + $0x84] sm:$0xff] %v175_v11  ;;  %v179_v13 = vld [vmem:[%s1401_s25 + $0x138] sm:$0xff]  ;;  %v181_v14 = vld [vmem:[%s1401_s25 + $0x150] sm:$0xff] }
  0x1d   : > { %178 = vst [vmem:[%s1406_s26 + $0x90] sm:$0xff] %v177_v12  ;;  %180 = vst [vmem:[%s1406_s26 + $0x9c] sm:$0xff] %v179_v13  ;;  %v183_v15 = vld [vmem:[%s1401_s25 + $0x168] sm:$0xff]  ;;  %v185_v16 = vld [vmem:[%s1401_s25 + $0x180] sm:$0xff] }
  0x1e   : > { %182 = vst [vmem:[%s1406_s26 + $0xa8] sm:$0xff] %v181_v14  ;;  %v187_v17 = vld [vmem:[%s1401_s25 + $0x198] sm:$0xff]  ;;  %184 = vst [vmem:[%s1406_s26 + $0xb4] sm:$0xff] %v183_v15  ;;  %v189_v18 = vld [vmem:[%s1401_s25 + $0x1b0] sm:$0xff] }
  0x1f   : > { %186 = vst [vmem:[%s1406_s26 + $0xc0] sm:$0xff] %v185_v16  ;;  %188 = vst [vmem:[%s1406_s26 + $0xcc] sm:$0xff] %v187_v17  ;;  %v191_v19 = vld [vmem:[%s1401_s25 + $0x1c8] sm:$0xff]  ;;  %v193_v20 = vld [vmem:[%s1401_s25 + $0x1e0] sm:$0xff] }
  0x20   : > { %190 = vst [vmem:[%s1406_s26 + $0xd8] sm:$0xff] %v189_v18  ;;  %192 = vst [vmem:[%s1406_s26 + $0xe4] sm:$0xff] %v191_v19  ;;  %v195_v21 = vld [vmem:[%s1401_s25 + $0x1f8] sm:$0xff]  ;;  %v197_v22 = vld [vmem:[%s1401_s25 + $0x210] sm:$0xff] }
  0x21   : > { %194 = vst [vmem:[%s1406_s26 + $0xf0] sm:$0xff] %v193_v20  ;;  %v199_v23 = vld [vmem:[%s1401_s25 + $0x228] sm:$0xff]  ;;  %196 = vst [vmem:[%s1406_s26 + $0xfc] sm:$0xff] %v195_v21  ;;  %v201_v24 = vld [vmem:[%s1401_s25 + $0x240] sm:$0xff] }
  0x22   : > { %198 = vst [vmem:[%s1406_s26 + $0x108] sm:$0xff] %v197_v22  ;;  %200 = vst [vmem:[%s1406_s26 + $0x114] sm:$0xff] %v199_v23  ;;  %v203_v25 = vld [vmem:[%s1401_s25 + $0x258] sm:$0xff]  ;;  %v205_v26 = vld [vmem:[%s1401_s25 + $0x270] sm:$0xff] }
  0x23   : > { %202 = vst [vmem:[%s1406_s26 + $0x120] sm:$0xff] %v201_v24  ;;  %204 = vst [vmem:[%s1406_s26 + $0x12c] sm:$0xff] %v203_v25  ;;  %v207_v27 = vld [vmem:[%s1401_s25 + $0x288] sm:$0xff]  ;;  %v209_v28 = vld [vmem:[%s1401_s25 + $0x2a0] sm:$0xff] }
  0x24   : > { %206 = vst [vmem:[%s1406_s26 + $0x138] sm:$0xff] %v205_v26  ;;  %v211_v29 = vld [vmem:[%s1401_s25 + $0x2b8] sm:$0xff]  ;;  %208 = vst [vmem:[%s1406_s26 + $0x144] sm:$0xff] %v207_v27  ;;  %v213_v30 = vld [vmem:[%s1401_s25 + $0x2d0] sm:$0xff] }
  0x25   : > { %210 = vst [vmem:[%s1406_s26 + $0x150] sm:$0xff] %v209_v28  ;;  %212 = vst [vmem:[%s1406_s26 + $0x15c] sm:$0xff] %v211_v29  ;;  %v215_v31 = vld [vmem:[%s1401_s25 + $0x2e8] sm:$0xff]  ;;  %v1015_v33 = vld [vmem:[%s1401_s25 + $0x20] sm:$0xf] }
  0x26   : > { %v1013_v32 = vld [vmem:[%s1401_s25 + $0x8] sm:$0xf]  ;;  %214 = vst [vmem:[%s1406_s26 + $0x168] sm:$0xff] %v213_v30  ;;  %216 = vst [vmem:[%s1406_s26 + $0x174] sm:$0xff] %v215_v31  ;;  %v1017_v34 = vld [vmem:[%s1401_s25 + $0x38] sm:$0xf] }
  0x27   : > { %1014 = vst [vmem:[%s1406_s26 + $0x8] sm:$0xf] %v1013_v32  ;;  %v1019_v35 = vld [vmem:[%s1401_s25 + $0x50] sm:$0xf]  ;;  %1016 = vst [vmem:[%s1406_s26 + $0x14] sm:$0xf] %v1015_v33 }
  0x28   : > { %1018 = vst [vmem:[%s1406_s26 + $0x20] sm:$0xf] %v1017_v34  ;;  %1020 = vst [vmem:[%s1406_s26 + $0x2c] sm:$0xf] %v1019_v35  ;;  %v1021_v36 = vld [vmem:[%s1401_s25 + $0x68] sm:$0xf] }
  0x29   : > { %v1023_v37 = vld [vmem:[%s1401_s25 + $0x80] sm:$0xf]  ;;  %v1025_v38 = vld [vmem:[%s1401_s25 + $0x98] sm:$0xf]  ;;  %1022 = vst [vmem:[%s1406_s26 + $0x38] sm:$0xf] %v1021_v36 }
  0x2a   : > { %1024 = vst [vmem:[%s1406_s26 + $0x44] sm:$0xf] %v1023_v37  ;;  %1026 = vst [vmem:[%s1406_s26 + $0x50] sm:$0xf] %v1025_v38  ;;  %v1027_v39 = vld [vmem:[%s1401_s25 + $0xb0] sm:$0xf] }
  0x2b   : > { %v1029_v40 = vld [vmem:[%s1401_s25 + $0xc8] sm:$0xf]  ;;  %v1031_v41 = vld [vmem:[%s1401_s25 + $0xe0] sm:$0xf]  ;;  %1028 = vst [vmem:[%s1406_s26 + $0x5c] sm:$0xf] %v1027_v39 }
  0x2c   : > { %1030 = vst [vmem:[%s1406_s26 + $0x68] sm:$0xf] %v1029_v40  ;;  %1032 = vst [vmem:[%s1406_s26 + $0x74] sm:$0xf] %v1031_v41  ;;  %v1033_v42 = vld [vmem:[%s1401_s25 + $0xf8] sm:$0xf] }
  0x2d   : > { %v1035_v43 = vld [vmem:[%s1401_s25 + $0x110] sm:$0xf]  ;;  %v1037_v44 = vld [vmem:[%s1401_s25 + $0x128] sm:$0xf]  ;;  %1034 = vst [vmem:[%s1406_s26 + $0x80] sm:$0xf] %v1033_v42 }
  0x2e   : > { %1036 = vst [vmem:[%s1406_s26 + $0x8c] sm:$0xf] %v1035_v43  ;;  %1038 = vst [vmem:[%s1406_s26 + $0x98] sm:$0xf] %v1037_v44  ;;  %v1039_v45 = vld [vmem:[%s1401_s25 + $0x140] sm:$0xf] }
  0x2f   : > { %v1041_v46 = vld [vmem:[%s1401_s25 + $0x158] sm:$0xf]  ;;  %v1043_v47 = vld [vmem:[%s1401_s25 + $0x170] sm:$0xf]  ;;  %1040 = vst [vmem:[%s1406_s26 + $0xa4] sm:$0xf] %v1039_v45 }
  0x30   : > { %1042 = vst [vmem:[%s1406_s26 + $0xb0] sm:$0xf] %v1041_v46  ;;  %1044 = vst [vmem:[%s1406_s26 + $0xbc] sm:$0xf] %v1043_v47  ;;  %v1045_v48 = vld [vmem:[%s1401_s25 + $0x188] sm:$0xf] }
  0x31   : > { %v1047_v49 = vld [vmem:[%s1401_s25 + $0x1a0] sm:$0xf]  ;;  %v1049_v50 = vld [vmem:[%s1401_s25 + $0x1b8] sm:$0xf]  ;;  %1046 = vst [vmem:[%s1406_s26 + $0xc8] sm:$0xf] %v1045_v48 }
  0x32   : > { %1048 = vst [vmem:[%s1406_s26 + $0xd4] sm:$0xf] %v1047_v49  ;;  %1050 = vst [vmem:[%s1406_s26 + $0xe0] sm:$0xf] %v1049_v50  ;;  %v1051_v51 = vld [vmem:[%s1401_s25 + $0x1d0] sm:$0xf] }
  0x33   : > { %v1053_v52 = vld [vmem:[%s1401_s25 + $0x1e8] sm:$0xf]  ;;  %v1055_v53 = vld [vmem:[%s1401_s25 + $0x200] sm:$0xf]  ;;  %1052 = vst [vmem:[%s1406_s26 + $0xec] sm:$0xf] %v1051_v51 }
  0x34   : > { %1054 = vst [vmem:[%s1406_s26 + $0xf8] sm:$0xf] %v1053_v52  ;;  %1056 = vst [vmem:[%s1406_s26 + $0x104] sm:$0xf] %v1055_v53  ;;  %v1057_v54 = vld [vmem:[%s1401_s25 + $0x218] sm:$0xf] }
  0x35   : > { %v1059_v55 = vld [vmem:[%s1401_s25 + $0x230] sm:$0xf]  ;;  %v1061_v56 = vld [vmem:[%s1401_s25 + $0x248] sm:$0xf]  ;;  %1058 = vst [vmem:[%s1406_s26 + $0x110] sm:$0xf] %v1057_v54 }
  0x36   : > { %1060 = vst [vmem:[%s1406_s26 + $0x11c] sm:$0xf] %v1059_v55  ;;  %1062 = vst [vmem:[%s1406_s26 + $0x128] sm:$0xf] %v1061_v56  ;;  %v1063_v57 = vld [vmem:[%s1401_s25 + $0x260] sm:$0xf] }
  0x37   : > { %v1065_v58 = vld [vmem:[%s1401_s25 + $0x278] sm:$0xf]  ;;  %v1067_v59 = vld [vmem:[%s1401_s25 + $0x290] sm:$0xf]  ;;  %1064 = vst [vmem:[%s1406_s26 + $0x134] sm:$0xf] %v1063_v57 }
  0x38   : > { %1066 = vst [vmem:[%s1406_s26 + $0x140] sm:$0xf] %v1065_v58  ;;  %1068 = vst [vmem:[%s1406_s26 + $0x14c] sm:$0xf] %v1067_v59  ;;  %v1069_v60 = vld [vmem:[%s1401_s25 + $0x2a8] sm:$0xf] }
  0x39   : > { %v1071_v61 = vld [vmem:[%s1401_s25 + $0x2c0] sm:$0xf]  ;;  %v1073_v62 = vld [vmem:[%s1401_s25 + $0x2d8] sm:$0xf]  ;;  %1070 = vst [vmem:[%s1406_s26 + $0x158] sm:$0xf] %v1069_v60 }
  0x3a   : > { %1072 = vst [vmem:[%s1406_s26 + $0x164] sm:$0xf] %v1071_v61  ;;  %1074 = vst [vmem:[%s1406_s26 + $0x170] sm:$0xf] %v1073_v62  ;;  %v1075_v63 = vld [vmem:[%s1401_s25 + $0x2f0] sm:$0xf] }
  0x3b   : > { %1076 = vst [vmem:[%s1406_s26 + $0x17c] sm:$0xf] %v1075_v63 }
  0x3c PF: > { %p1077_p8 = scmp.ge.s32.totalorder %s1336_s13, 1  ;;  %p292_p9 = scmp.lt.s32.totalorder %s1336_s13, 3 }
  0x3e   : > { %p293_p10 = pnand %p1077_p8, %p292_p9 }
  0x3f   : > { %v336_v0 = vld [vmem:[%s1681_s0] sm:$0xff] (!%p293_p10)  ;;  %v338_v1 = vld [vmem:[%s1681_s0 + $0x10] sm:$0xff] (!%p293_p10)  ;;  %v337_v2 = vld [vmem:[%s1681_s0 + $0x8] sm:$0xff] (!%p293_p10)  ;;  %s299_s5 = sand.u32 (!%p293_p10), 1, %s1320_s9  }
  0x40   : > { %296 = sbr.rel (%p293_p10) target bundleno = 472 (0x1d8), region = 50  ;;  %v1545_v3 = vunpack.c.l.bf16 (!%p293_p10), %v336_v0  ;;  %v1547_v4 = vunpack.c.h.bf16 (!%p293_p10), %v336_v0  ;;  %v1549_v5 = vunpack.c.l.bf16 (!%p293_p10), %v338_v1  ;;  %v1551_v6 = vunpack.c.h.bf16 (!%p293_p10), %v338_v1  ;;  %v339_v7 = vld [vmem:[%s1681_s0 + $0x18] sm:$0xff] (!%p293_p10) }
  0x41   : > { %s1184_s8 = smul.u32 (!%p293_p10), 384, %s299_s5  ;;  %v1558_v8 = vunpack.c.l.bf16 (!%p293_p10), %v337_v2  ;;  %v1560_v9 = vunpack.c.h.bf16 (!%p293_p10), %v337_v2  ;;  %v1562_v10 = vunpack.c.l.bf16 (!%p293_p10), %v339_v7  ;;  %v1564_v11 = vunpack.c.h.bf16 (!%p293_p10), %v339_v7 }
  0x42   : > { %v348_v12 = vmul.f32 (!%p293_p10), %v1545_v3, %v1545_v3  ;;  %v349_v13 = vmul.f32 (!%p293_p10), %v1547_v4, %v1547_v4  ;;  %v352_v14 = vmul.f32 (!%p293_p10), %v1549_v5, %v1549_v5  ;;  %v353_v15 = vmul.f32 (!%p293_p10), %v1551_v6, %v1551_v6  ;;  %s1185_s16 = smul.u32 (!%p293_p10), 48, %s299_s5 }
  0x43   : > { %v350_v16 = vmul.f32 (!%p293_p10), %v1558_v8, %v1558_v8  ;;  %v351_v17 = vmul.f32 (!%p293_p10), %v1560_v9, %v1560_v9  ;;  %v354_v18 = vmul.f32 (!%p293_p10), %v1562_v10, %v1562_v10  ;;  %v355_v19 = vmul.f32 (!%p293_p10), %v1564_v11, %v1564_v11  ;;  %s1582_s15 = scalar_lea.vmem (!%p293_p10), [#allocation2], %s1184_s8 }
  0x44   : > { %v1226_v20 = vld [vmem:[%s1582_s15 + $0x4] ss:$12 sps:$4 sm:$0xff] (!%p293_p10)   ;;  %v356_v21 = vadd.f32 (!%p293_p10), %v349_v13, %v348_v12  ;;  %v362_v22 = vadd.f32 (!%p293_p10), %v353_v15, %v352_v14  ;;  %v1228_v23 = vld [vmem:[%s1582_s15] ss:$12 sps:$4 sm:$0xff] (!%p293_p10)   ;;  %v1229_v24 = vld [vmem:[%s1582_s15 + $0x1c] ss:$12 sps:$4 sm:$0xff] (!%p293_p10)  }
  0x45   : > { %713 = vmatprep.subr.bf16.mxu0 (!%p293_p10), %v1226_v20  ;;  %v359_v25 = vadd.f32 (!%p293_p10), %v351_v17, %v350_v16  ;;  %v365_v26 = vadd.f32 (!%p293_p10), %v355_v19, %v354_v18  ;;  %v1231_v27 = vld [vmem:[%s1582_s15 + $0x18] ss:$12 sps:$4 sm:$0xff] (!%p293_p10)   ;;  %v1232_v28 = vld [vmem:[%s1582_s15 + $0x34] ss:$12 sps:$4 sm:$0xff] (!%p293_p10)   ;;  %v1234_v29 = vld [vmem:[%s1582_s15 + $0x30] ss:$12 sps:$4 sm:$0xff] (!%p293_p10)  }
  0x46   : > { %357 = vadd.xlane.f32.xlu0 (!%p293_p10), %v356_v21  ;;  %363 = vadd.xlane.f32.xlu1 (!%p293_p10), %v362_v22  ;;  %v1235_v30 = vld [vmem:[%s1582_s15 + $0x4c] ss:$12 sps:$4 sm:$0xff] (!%p293_p10)   ;;  %v1237_v31 = vld [vmem:[%s1582_s15 + $0x48] ss:$12 sps:$4 sm:$0xff] (!%p293_p10)   ;;  %v1238_v32 = vld [vmem:[%s1582_s15 + $0x64] ss:$12 sps:$4 sm:$0xff] (!%p293_p10)  }
  0x47   : > { %714 = vmatpush1.bf16.msra.mxu0 %v1228_v23  ;;  %v1252_v33 = vld [vmem:[%s1582_s15 + $0xc8] ss:$12 sps:$4 sm:$0xff]   ;;  %v1240_v35 = vld [vmem:[%s1582_s15 + $0x60] ss:$12 sps:$4 sm:$0xff]   ;;  %v1243_v39 = vld [vmem:[%s1582_s15 + $0x78] ss:$12 sps:$4 sm:$0xff]  }
  0x48   : > { %715 = vmatprep.subr.bf16.mxu0 %v1229_v24  ;;  %v1254_v34 = vld [vmem:[%s1582_s15 + $0x8] ss:$12 sps:$4 sm:$0xff]   ;;  %1155 = vmatprep.subr.bf16.mxu1 %v1252_v33  ;;  %v1257_v36 = vld [vmem:[%s1582_s15 + $0xe0] ss:$12 sps:$4 sm:$0xff]   ;;  %v1262_v40 = vld [vmem:[%s1582_s15 + $0xf8] ss:$12 sps:$4 sm:$0xff]  }
  0x49   : > { %1156 = vmatpush3.bf16.msra.mxu1 %v1254_v34  ;;  %v1241_v37 = vld [vmem:[%s1582_s15 + $0x7c] ss:$12 sps:$4 sm:$0xff]   ;;  %v1259_v38 = vld [vmem:[%s1582_s15 + $0x20] ss:$12 sps:$4 sm:$0xff]   ;;  %v1264_v41 = vld [vmem:[%s1582_s15 + $0x38] ss:$12 sps:$4 sm:$0xff]  }
  0x4a   : > { %360 = vadd.xlane.f32.xlu0 %v359_v25  ;;  %366 = vadd.xlane.f32.xlu1 %v365_v26  ;;  %v1244_v42 = vld [vmem:[%s1582_s15 + $0x94] ss:$12 sps:$4 sm:$0xff]   ;;  %v1246_v43 = vld [vmem:[%s1582_s15 + $0x90] ss:$12 sps:$4 sm:$0xff]   ;;  %v1247_v46 = vld [vmem:[%s1582_s15 + $0xac] ss:$12 sps:$4 sm:$0xff]  }
  0x4b   : > { %716 = vmatpush1.bf16.msra.mxu0 %v1231_v27  ;;  %1157 = vmatprep.subr.bf16.mxu1 %v1257_v36  ;;  %v1267_v44 = vld [vmem:[%s1582_s15 + $0x110] ss:$12 sps:$4 sm:$0xff]   ;;  %v1272_v47 = vld [vmem:[%s1582_s15 + $0x128] ss:$12 sps:$4 sm:$0xff]   ;;  %v1277_v51 = vld [vmem:[%s1582_s15 + $0x140] ss:$12 sps:$4 sm:$0xff]  }
  0x4c   : > { %717 = vmatprep.subr.bf16.mxu0 %v1232_v28  ;;  %v1269_v45 = vld [vmem:[%s1582_s15 + $0x50] ss:$12 sps:$4 sm:$0xff]   ;;  %v1274_v48 = vld [vmem:[%s1582_s15 + $0x68] ss:$12 sps:$4 sm:$0xff]   ;;  %v1279_v52 = vld [vmem:[%s1582_s15 + $0x80] ss:$12 sps:$4 sm:$0xff]  }
  0x4d   : > { %1158 = vmatpush3.bf16.msra.mxu1 %v1259_v38  ;;  %v1249_v49 = vld [vmem:[%s1582_s15 + $0xa8] ss:$12 sps:$4 sm:$0xff]   ;;  %v1250_v50 = vld [vmem:[%s1582_s15 + $0xc4] ss:$12 sps:$4 sm:$0xff]   ;;  %v1253_v53 = vld [vmem:[%s1582_s15 + $0xc0] ss:$12 sps:$4 sm:$0xff]  }
  0x4e   : > { %1159 = vmatprep.subr.bf16.mxu1 %v1262_v40  ;;  %v1282_v54 = vld [vmem:[%s1582_s15 + $0x158] ss:$12 sps:$4 sm:$0xff]   ;;  %v1255_v55 = vld [vmem:[%s1582_s15 + $0xdc] ss:$12 sps:$4 sm:$0xff]   ;;  %v1260_v59 = vld [vmem:[%s1582_s15 + $0xf4] ss:$12 sps:$4 sm:$0xff]  }
  0x4f   : > { %718 = vmatpush1.bf16.msra.mxu0 %v1234_v29  ;;  %v1258_v56 = vld [vmem:[%s1582_s15 + $0xd8] ss:$12 sps:$4 sm:$0xff]   ;;  %v1287_v58 = vld [vmem:[%s1582_s15 + $0x170] ss:$12 sps:$4 sm:$0xff]   ;;  %v1268_v63 = vld [vmem:[%s1582_s15 + $0x108] ss:$12 sps:$4 sm:$0xff]  }
  0x50   : > { %719 = vmatprep.subr.bf16.mxu0 %v1235_v30  ;;  %v1284_v57 = vld [vmem:[%s1582_s15 + $0x98] ss:$12 sps:$4 sm:$0xff]   ;;  %v1289_v60 = vld [vmem:[%s1582_s15 + $0xb0] ss:$12 sps:$4 sm:$0xff]   ;;  %v1273_v1 = vld [vmem:[%s1582_s15 + $0x120] ss:$12 sps:$4 sm:$0xff]  }
  0x51   : > { %1160 = vmatpush3.bf16.msra.mxu1 %v1264_v41  ;;  %v1263_v61 = vld [vmem:[%s1582_s15 + $0xf0] ss:$12 sps:$4 sm:$0xff]   ;;  %v1265_v62 = vld [vmem:[%s1582_s15 + $0x10c] ss:$12 sps:$4 sm:$0xff]   ;;  %v1280_v12 = vld [vmem:[%s1582_s15 + $0x154] ss:$12 sps:$4 sm:$0xff]  }
  0x52   : > { %1161 = vmatprep.subr.bf16.mxu1 %v1267_v44  ;;  %v1270_v0 = vld [vmem:[%s1582_s15 + $0x124] ss:$12 sps:$4 sm:$0xff]   ;;  %v1275_v2 = vld [vmem:[%s1582_s15 + $0x13c] ss:$12 sps:$4 sm:$0xff]   ;;  %v1285_v14 = vld [vmem:[%s1582_s15 + $0x16c] ss:$12 sps:$4 sm:$0xff]  }
  0x53   : > { %720 = vmatpush1.bf16.msra.mxu0 %v1237_v31  ;;  %v1278_v7 = vld [vmem:[%s1582_s15 + $0x138] ss:$12 sps:$4 sm:$0xff]   ;;  %v1283_v13 = vld [vmem:[%s1582_s15 + $0x150] ss:$12 sps:$4 sm:$0xff]   ;;  %v1288_v15 = vld [vmem:[%s1582_s15 + $0x168] ss:$12 sps:$4 sm:$0xff]  }
  0x54   : > { %721 = vmatprep.subr.bf16.mxu0 %v1238_v32  ;;  %s1642_s17 = scalar_lea.vmem [#allocation3], %s1185_s16  ;;  %s1154_s9 = smul.u32 (%p1388_p6), 12, %s1328_s11 }
  0x55   : > { %1162 = vmatpush3.bf16.msra.mxu1 %v1269_v45 }
  0x56   : > { %1163 = vmatprep.subr.bf16.mxu1 %v1272_v47  ;;  %s875_s18 = scalar_lea.vmem (%p1388_p6), %s1683_s2, %s1154_s9 }
  0x57   : > { %722 = vmatpush1.bf16.msra.mxu0 %v1240_v35 }
  0x58   : > { %723 = vmatprep.subr.bf16.mxu0 %v1241_v37 }
  0x59   : > { %1164 = vmatpush3.bf16.msra.mxu1 %v1274_v48 }
  0x5a   : > { %1165 = vmatprep.subr.bf16.mxu1 %v1277_v51 }
  0x5b   : > { %724 = vmatpush1.bf16.msra.mxu0 %v1243_v39 }
  0x5c   : > { %725 = vmatprep.subr.bf16.mxu0 %v1244_v42 }
  0x5d   : > { %1166 = vmatpush3.bf16.msra.mxu1 %v1279_v52 }
  0x5e   : > { %1167 = vmatprep.subr.bf16.mxu1 %v1282_v54 }
  0x5f   : > { %726 = vmatpush1.bf16.msra.mxu0 %v1246_v43 }
  0x60   : > { %727 = vmatprep.subr.bf16.mxu0 %v1247_v46 }
  0x61   : > { %1168 = vmatpush3.bf16.msra.mxu1 %v1284_v57 }
  0x62   : > { %1169 = vmatprep.subr.bf16.mxu1 %v1287_v58 }
  0x63   : > { %728 = vmatpush1.bf16.msra.mxu0 %v1249_v49 }
  0x64   : > { %729 = vmatprep.subr.bf16.mxu0 %v1250_v50 }
  0x65   : > { %1170 = vmatpush3.bf16.msra.mxu1 %v1289_v60 }
  0x67   : > { %730 = vmatpush1.bf16.msra.mxu0 %v1253_v53 }
  0x68   : > { %731 = vmatprep.subr.bf16.mxu0 %v1255_v55 }
  0x6b   : > { %732 = vmatpush1.bf16.msra.mxu0 %v1258_v56 }
  0x6c   : > { %733 = vmatprep.subr.bf16.mxu0 %v1260_v59 }
  0x6f   : > { %734 = vmatpush1.bf16.msra.mxu0 %v1263_v61 }
  0x70   : > { %735 = vmatprep.subr.bf16.mxu0 %v1265_v62 }
  0x73   : > { %736 = vmatpush1.bf16.msra.mxu0 %v1268_v63 }
  0x74   : > { %737 = vmatprep.subr.bf16.mxu0 %v1270_v0 }
  0x77   : > { %738 = vmatpush1.bf16.msra.mxu0 %v1273_v1 }
  0x78   : > { %739 = vmatprep.subr.bf16.mxu0 %v1275_v2 }
  0x7b   : > { %740 = vmatpush1.bf16.msra.mxu0 %v1278_v7 }
  0x7c   : > { %741 = vmatprep.subr.bf16.mxu0 %v1280_v12 }
  0x7f   : > { %742 = vmatpush1.bf16.msra.mxu0 %v1283_v13 }
  0x80   : > { %743 = vmatprep.subr.bf16.mxu0 %v1285_v14 }
  0x83   : > { %744 = vmatpush1.bf16.msra.mxu0 %v1288_v15 }
  0xd3   : > { %v358_v16 = vpop.xlane.xlu0 %357  ;;  %v364_v17 = vpop.xlane.xlu1 %363 }
  0xd4   : > { %v369_v18 = vmul.f32 0.00390625, %v358_v16  ;;  %v371_v19 = vmul.f32 0.00390625, %v364_v17 }
  0xd6   : > { %v373_v20 = vadd.f32 1.1920929e-07, %v369_v18  ;;  %v375_v21 = vadd.f32 1.1920929e-07, %v371_v19 }
  0xd7   : > { %v361_v22 = vpop.xlane.xlu0 %360  ;;  %v367_v23 = vpop.xlane.xlu1 %366 }
  0xd8   : > { %v370_v24 = vmul.f32 0.00390625, %v361_v22  ;;  %v372_v25 = vmul.f32 0.00390625, %v367_v23  ;;  %1290 = vrsqrt.f32 %v375_v21 }
  0xd9   : > { %1292 = vrsqrt.f32 %v373_v20 }
  0xda   : > { %v374_v26 = vadd.f32 1.1920929e-07, %v370_v24  ;;  %v376_v27 = vadd.f32 1.1920929e-07, %v372_v25 }
  0xdc   : > { %1294 = vrsqrt.f32 %v374_v26 }
  0xdd   : > { %1296 = vrsqrt.f32 %v376_v27 }
  0xe2   : > { %v1291_v28 = vpop.eup %1290 }
  0xe3   : > { %v1293_v29 = vpop.eup %1292  ;;  %v386_v31 = vmul.f32 %v1291_v28, %v1551_v6 }
  0xe4   : > { %v382_v33 = vmul.f32 %v1293_v29, %v1547_v4  ;;  %v381_v35 = vmul.f32 %v1293_v29, %v1545_v3  ;;  %v385_v4 = vmul.f32 %v1291_v28, %v1549_v5 }
  0xe6   : > { %v1295_v30 = vpop.eup %1294 }
  0xe7   : > { %v1297_v32 = vpop.eup %1296  ;;  %v384_v34 = vmul.f32 %v1295_v30, %v1560_v9  ;;  %v383_v36 = vmul.f32 %v1295_v30, %v1558_v8 }
  0xe8   : > { %v388_v37 = vmul.f32 %v1297_v32, %v1564_v11  ;;  %v387_v6 = vmul.f32 %v1297_v32, %v1562_v10 }
  0xe9   : > { %v390_v38 = vpack.c.bf16 %v384_v34, %v382_v33  ;;  %v389_v39 = vpack.c.bf16 %v383_v36, %v381_v35 }
  0xea   : > { %v392_v40 = vpack.c.bf16 %v388_v37, %v386_v31  ;;  %v391_v9 = vpack.c.bf16 %v387_v6, %v385_v4 }
  0xeb   : > { %745 = vmatprep.mubr.bf16.mxu0 %v390_v38  ;;  %798 = vmatprep.mubr.bf16.mxu1 %v390_v38 }
  0xec   : > { %746 = vmatmul.mubr.bf16.vlgmr.msra.gmra.mrb[0].mxu0 %v389_v39  ;;  %799 = vmatmul.mubr.bf16.vlgmr.msra.gmra.mrb[0].mxu1 %v389_v39 }
  0xed   : > { %755 = vmatprep.mubr.bf16.mxu0 %v392_v40  ;;  %806 = vmatprep.mubr.bf16.mxu1 %v392_v40 }
  0xf4   : > { %756 = vmatmul.mubr.bf16.gmra.mrb[4].mxu0 %v391_v9  ;;  %807 = vmatmul.mubr.bf16.gmra.mrb[4].mxu1 %v391_v9 }
 0x1bf   : > { %v747_v3 = vpop.f32.mrb[0].mxu0  ;;  %v1171_v8 = vpop.f32.mrb[0].mxu1 }
 0x1c0   : > { %v749_v11 = vpop.f32.mrb[1].mxu0  ;;  %v1172_v41 = vpop.f32.mrb[1].mxu1 }
 0x1c1   : > { %v1146_v42 = vpack.c.bf16 %v749_v11, %v747_v3  ;;  %v1173_v43 = vadd.f32 %v1172_v41, %v1171_v8  ;;  %v751_v44 = vpop.f32.mrb[2].mxu0  ;;  %v1174_v45 = vpop.f32.mrb[2].mxu1 }
 0x1c2   : > { %v753_v46 = vpop.f32.mrb[3].mxu0  ;;  %v1175_v47 = vpop.f32.mrb[3].mxu1 }
 0x1c3   : > { %855 = vst [vmem:[%s1642_s17] sm:$0xff] %v1146_v42  ;;  %v1147_v5 = vpack.c.bf16 %v1173_v43, %v1173_v43  ;;  %v1148_v10 = vpack.c.bf16 %v753_v46, %v751_v44  ;;  %v1176_v48 = vadd.f32 %v1175_v47, %v1174_v45 }
 0x1c5   : > { %856 = vst [vmem:[%s1642_s17 + $0x8] sm:$0xf] %v1147_v5  ;;  %857 = vst [vmem:[%s1642_s17 + $0xc] sm:$0xff] %v1148_v10  ;;  %v1149_v49 = vpack.c.bf16 %v1176_v48, %v1176_v48 }
 0x1c7   : > { %858 = vst [vmem:[%s1642_s17 + $0x14] sm:$0xf] %v1149_v49  ;;  %v757_v50 = vpop.f32.mrb[4].mxu0  ;;  %v1177_v51 = vpop.f32.mrb[4].mxu1 }
 0x1c8   : > { %v759_v52 = vpop.f32.mrb[5].mxu0  ;;  %v1178_v53 = vpop.f32.mrb[5].mxu1 }
 0x1c9   : > { %v1150_v54 = vpack.c.bf16 %v759_v52, %v757_v50  ;;  %v1179_v55 = vadd.f32 %v1178_v53, %v1177_v51  ;;  %v761_v56 = vpop.f32.mrb[6].mxu0  ;;  %v1180_v57 = vpop.f32.mrb[6].mxu1  ;;  %869 = sbr.rel (!%p1388_p6) target bundleno = 472 (0x1d8), region = 58 }
 0x1ca   : > { %v763_v58 = vpop.f32.mrb[7].mxu0  ;;  %v1181_v59 = vpop.f32.mrb[7].mxu1  ;;  %v890_v0 = vld [vmem:[%s1642_s17] sm:$0xff] (%p1388_p6) }
 0x1cb   : > { %859 = vst [vmem:[%s1642_s17 + $0x18] sm:$0xff] %v1150_v54  ;;  %v1151_v60 = vpack.c.bf16 %v1179_v55, %v1179_v55  ;;  %v1152_v61 = vpack.c.bf16 %v763_v58, %v761_v56  ;;  %v1182_v62 = vadd.f32 %v1181_v59, %v1180_v57  ;;  %891 = vst [vmem:[%s875_s18] sm:$0xff] (%p1388_p6), %v890_v0 }
 0x1cc   : > { %v892_v1 = vld [vmem:[%s1642_s17 + $0xc] sm:$0xff] (%p1388_p6)  ;;  %v1135_v12 = vld [vmem:[%s1642_s17 + $0x8] sm:$0xf] (%p1388_p6) }
 0x1cd   : > { %860 = vst [vmem:[%s1642_s17 + $0x20] sm:$0xf] %v1151_v60  ;;  %861 = vst [vmem:[%s1642_s17 + $0x24] sm:$0xff] %v1152_v61  ;;  %v1153_v63 = vpack.c.bf16 %v1182_v62, %v1182_v62 }
 0x1ce   : > { %v1137_v13 = vld [vmem:[%s1642_s17 + $0x14] sm:$0xf] (%p1388_p6)  ;;  %893 = vst [vmem:[%s875_s18 + $0x18] sm:$0xff] (%p1388_p6), %v892_v1  ;;  %1136 = vst [vmem:[%s875_s18 + $0x8] sm:$0xf] (%p1388_p6), %v1135_v12 }
 0x1cf   : > { %862 = vst [vmem:[%s1642_s17 + $0x2c] sm:$0xf] %v1153_v63  ;;  %1138 = vst [vmem:[%s875_s18 + $0x20] sm:$0xf] (%p1388_p6), %v1137_v13 }
 0x1d2   : > { %v894_v2 = vld [vmem:[%s1642_s17 + $0x18] sm:$0xff] }
 0x1d3   : > { %895 = vst [vmem:[%s875_s18 + $0x30] sm:$0xff] %v894_v2 }
 0x1d4   : > { %v896_v7 = vld [vmem:[%s1642_s17 + $0x24] sm:$0xff]  ;;  %v1139_v14 = vld [vmem:[%s1642_s17 + $0x20] sm:$0xf] }
 0x1d5   : > { %897 = vst [vmem:[%s875_s18 + $0x48] sm:$0xff] %v896_v7  ;;  %1140 = vst [vmem:[%s875_s18 + $0x38] sm:$0xf] %v1139_v14 }
 0x1d6   : > { %v1141_v15 = vld [vmem:[%s1642_s17 + $0x2c] sm:$0xf] }
 0x1d7   : > { %1142 = vst [vmem:[%s875_s18 + $0x50] sm:$0xf] %v1141_v15 }
 0x1d8 PF: > { %s12_s13 = sadd.s32 1, %s1336_s13   ;;  %s1685_s9 = smov %s1324_s10 }
 0x1d9   : > { %p9_p11 = scmp.ge.s32.totalorder %s12_s13, 4   ;;  %s1686_s10 = smov %s1393_s19 }
 0x1da   : > { %s1687_s11 = smov %s1332_s12  ;;  %s1688_s12 = smov %s1690_s14 }
 0x1db   :  { %11 = sbr.rel (!%p9_p11) target bundleno = 3 (0x3), region = 130 }

</bundles_post_ra>
